<compile_context>
chip_gen: v6e
topology: v6e:2x2x1
jax: 0.10.0
libtpu: 0.0.40
codegen_flags: <defaults>
</compile_context>

<pallas_src>
import functools

import jax
import jax.numpy as jnp
from jax.experimental import pallas as pl
from jax.experimental.pallas import tpu as pltpu


# ----------------------------------------------------------------------------
# Fused forward kernel (runs once, no grid; everything resident on-chip)
# ----------------------------------------------------------------------------
def _reconnet_kernel(x_ref,
                     w1_ref, s1_ref, p1_ref,
                     w2_ref, s2_ref, p2_ref,
                     u1_ref, w3_ref, s3_ref, w4_ref, s4_ref,
                     u2_ref, w5_ref, s5_ref, w6_ref, s6_ref,
                     o_ref, *, H, W):
    f32 = jnp.float32

    def coords(M, Hc, Wc):
        """(h, w) coordinates for every flat lane index m = n*Hc*Wc + h*Wc + w."""
        lane = jax.lax.broadcasted_iota(jnp.int32, (1, M), 1)
        if (Wc & (Wc - 1)) == 0 and (Hc & (Hc - 1)) == 0:   # power-of-two fast path (shift/and)
            ww = lane & (Wc - 1)
            hh = (lane >> (Wc.bit_length() - 1)) & (Hc - 1)
        else:
            ww = lane % Wc
            hh = (lane // Wc) % Hc
        return hh, ww

    def conv3x3(x, w_ref, s_ref, Hc, Wc, relu):
        """3x3 conv (stride 1, pad 1) + folded-BN affine + optional ReLU on a (Cin, N*Hc*Wc) slab."""
        Cin, M = x.shape
        Cout = w_ref.shape[1]
        hh, ww = coords(M, Hc, Wc)
        acc = jnp.zeros((Cout, M), f32)
        t = 0
        for dy in (-1, 0, 1):
            for dx in (-1, 0, 1):
                d = dy * Wc + dx
                # shifted[:, m] == x[:, m + d]  (wrap-around columns are masked to the pad value 0)
                shifted = x if d == 0 else pltpu.roll(x, shift=(-d) % M, axis=1)
                conds = []
                if dy < 0:
                    conds.append(hh >= -dy)
                if dy > 0:
                    conds.append(hh < Hc - dy)
                if dx < 0:
                    conds.append(ww >= -dx)
                if dx > 0:
                    conds.append(ww < Wc - dx)
                if conds:
                    msk = conds[0]
                    for cnd in conds[1:]:
                        msk = jnp.logical_and(msk, cnd)
                    shifted = shifted * msk.astype(f32)
                w_tap = w_ref[t]                                    # (Cout, Cin), BN scale folded in
                if Cin == 1:
                    acc = acc + w_tap * shifted                     # outer product on the VPU
                else:
                    acc = acc + jnp.dot(w_tap, shifted, preferred_element_type=f32)
                t += 1
        y = acc + s_ref[...]                                        # folded bias/BN shift (Cout, 1)
        if relu:
            y = jnp.maximum(y, 0.0)
        return y

    def maxpool2x2(x, Wc, sel_ref):
        """MaxPool2d(2,2): roll+max over the 2x2 window, then a 0/1 matmul does the stride-2 gather."""
        _, M = x.shape
        y = jnp.maximum(x, pltpu.roll(x, shift=M - 1, axis=1))      # max(x[m], x[m+1])
        z = jnp.maximum(y, pltpu.roll(y, shift=M - Wc, axis=1))     # max over the full 2x2 window
        return jnp.dot(z, sel_ref[...], preferred_element_type=f32)

    H2, W2 = H // 2, W // 2

    # ---- encoder (copy of reg_net.features): Conv-BN-ReLU-MaxPool x2 ----
    h = conv3x3(x_ref[...], w1_ref, s1_ref, H, W, relu=True)        # (4, N*H*W)
    h = maxpool2x2(h, W, p1_ref)                                    # (4, N*H2*W2)
    h = conv3x3(h, w2_ref, s2_ref, H2, W2, relu=True)               # (8, N*H2*W2)
    h = maxpool2x2(h, W2, p2_ref)                                   # (8, N*H4*W4)
    # ---- decoder (mirror): Up, Conv-BN-ReLU, Conv-BN-ReLU, Up, Conv-BN-ReLU, Conv ----
    h = jnp.dot(h, u1_ref[...], preferred_element_type=f32)         # bilinear x2 upsample
    h = conv3x3(h, w3_ref, s3_ref, H2, W2, relu=True)               # (8, N*H2*W2)
    h = conv3x3(h, w4_ref, s4_ref, H2, W2, relu=True)               # (4, N*H2*W2)
    h = jnp.dot(h, u2_ref[...], preferred_element_type=f32)         # bilinear x2 upsample
    h = conv3x3(h, w5_ref, s5_ref, H, W, relu=True)                 # (4, N*H*W)
    h = conv3x3(h, w6_ref, s6_ref, H, W, relu=False)                # (1, N*H*W)
    o_ref[...] = h.astype(o_ref.dtype)


# ----------------------------------------------------------------------------
# Host-side constant construction (weights folding, pool/upsample matrices)
# ----------------------------------------------------------------------------
def _fold_conv_bn(conv, bn):
    """Fold eval-mode BN into conv weights; return (w_taps (9,Cout,Cin), shift (Cout,1))."""
    w, b = conv
    cout, cin = w.shape[0], w.shape[1]
    if bn is None:
        s = jnp.ones((cout,), jnp.float32)
        shift = b
    else:
        gamma, beta, mean, var, eps = bn
        s = gamma / jnp.sqrt(var + eps)
        shift = b * s + beta - mean * s
    w_taps = (w * s[:, None, None, None]).transpose(2, 3, 0, 1).reshape(9, cout, cin)
    return w_taps.astype(jnp.float32), shift.reshape(cout, 1).astype(jnp.float32)


def _bilinear_matrix(h_in):
    """(2H, H) interpolation matrix matching nn.Upsample(scale_factor=2, mode='bilinear')."""
    h_out = 2 * h_in
    src = (jnp.arange(h_out, dtype=jnp.float32) + 0.5) / 2.0 - 0.5
    src = jnp.maximum(src, 0.0)                       # PyTorch clamps negative source coords
    i0 = jnp.clip(jnp.floor(src).astype(jnp.int32), 0, h_in - 1)
    i1 = jnp.minimum(i0 + 1, h_in - 1)
    lam = src - i0.astype(jnp.float32)
    rows = jnp.arange(h_out)
    u = jnp.zeros((h_out, h_in), jnp.float32)
    u = u.at[rows, i0].add(1.0 - lam)
    u = u.at[rows, i1].add(lam)
    return u


def _upsample_matrix(n, h_in, w_in):
    """(N*Hin*Win, N*2Hin*2Win) flat bilinear-x2 operator: out = x_flat @ this."""
    per_image = jnp.kron(_bilinear_matrix(h_in), _bilinear_matrix(w_in))   # (4*HW, HW)
    full = jnp.kron(jnp.eye(n, dtype=jnp.float32), per_image)              # block-diag over batch
    return full.T


def _pool_select_matrix(n, h, w):
    """(N*H*W, N*(H/2)*(W/2)) 0/1 matrix selecting the even-(h,w) positions: out = z_flat @ this."""
    ho, wo = h // 2, w // 2
    eh = jnp.zeros((h, ho), jnp.float32).at[2 * jnp.arange(ho), jnp.arange(ho)].set(1.0)
    ew = jnp.zeros((w, wo), jnp.float32).at[2 * jnp.arange(wo), jnp.arange(wo)].set(1.0)
    return jnp.kron(jnp.eye(n, dtype=jnp.float32), jnp.kron(eh, ew))


# ----------------------------------------------------------------------------
# Parameters (deterministic synthetic init) and forward pass
# ----------------------------------------------------------------------------
def _conv_params(key, cin, cout):
    k1, k2 = jax.random.split(key)
    w = jax.random.normal(k1, (cout, cin, 3, 3), jnp.float32) / jnp.sqrt(cin * 9.0)
    b = 0.01 * jax.random.normal(k2, (cout,), jnp.float32)
    return w, b


def _bn_params(key, c):
    # eval-mode BatchNorm2d: (gamma, beta, running_mean, running_var, eps)
    k1, k2, k3, k4 = jax.random.split(key, 4)
    gamma = 1.0 + 0.1 * jax.random.normal(k1, (c,), jnp.float32)
    beta = 0.1 * jax.random.normal(k2, (c,), jnp.float32)
    mean = 0.1 * jax.random.normal(k3, (c,), jnp.float32)
    var = 1.0 + 0.1 * jnp.abs(jax.random.normal(k4, (c,), jnp.float32))
    return (gamma, beta, mean, var, 1e-5)


def init_params(key):
    ks = jax.random.split(key, 12)
    return {
        # encoder == copy of reg_net.features
        "enc_conv1": _conv_params(ks[0], 1, 4),  "enc_bn1": _bn_params(ks[1], 4),
        "enc_conv2": _conv_params(ks[2], 4, 8),  "enc_bn2": _bn_params(ks[3], 8),
        # decoder built by _build_dec_from_enc (mirrored encoder)
        "dec_conv1": _conv_params(ks[4], 8, 8),  "dec_bn1": _bn_params(ks[5], 8),
        "dec_conv2": _conv_params(ks[6], 8, 4),  "dec_bn2": _bn_params(ks[7], 4),
        "dec_conv3": _conv_params(ks[8], 4, 4),  "dec_bn3": _bn_params(ks[9], 4),
        "dec_conv4": _conv_params(ks[10], 4, 1),  # trailing BN/ReLU stripped by the builder
    }


def recon_net_forward(x, params):
    N, C, H, W = x.shape
    assert C == 1 and H % 4 == 0 and W % 4 == 0
    M0 = N * H * W
    # lane-dense layout: channels on sublanes, flattened (n, h, w) on the 128-lane axis
    x_flat = x.transpose(1, 0, 2, 3).reshape(C, M0)

    w1, s1 = _fold_conv_bn(params["enc_conv1"], params["enc_bn1"])
    w2, s2 = _fold_conv_bn(params["enc_conv2"], params["enc_bn2"])
    w3, s3 = _fold_conv_bn(params["dec_conv1"], params["dec_bn1"])
    w4, s4 = _fold_conv_bn(params["dec_conv2"], params["dec_bn2"])
    w5, s5 = _fold_conv_bn(params["dec_conv3"], params["dec_bn3"])
    w6, s6 = _fold_conv_bn(params["dec_conv4"], None)

    H2, W2 = H // 2, W // 2
    H4, W4 = H2 // 2, W2 // 2
    p1 = _pool_select_matrix(N, H, W)       # (N*H*W,   N*H2*W2)
    p2 = _pool_select_matrix(N, H2, W2)     # (N*H2*W2, N*H4*W4)
    u1 = _upsample_matrix(N, H4, W4)        # (N*H4*W4, N*H2*W2)
    u2 = _upsample_matrix(N, H2, W2)        # (N*H2*W2, N*H*W)

    out_flat = pl.pallas_call(
        functools.partial(_reconnet_kernel, H=H, W=W),
        out_shape=jax.ShapeDtypeStruct((1, M0), jnp.float32),
        in_specs=[pl.BlockSpec(memory_space=pltpu.MemorySpace.VMEM)] * 17,
        out_specs=pl.BlockSpec(memory_space=pltpu.MemorySpace.VMEM),
    )(x_flat, w1, s1, p1, w2, s2, p2, u1, w3, s3, w4, s4, u2, w5, s5, w6, s6)

    # output spatial size equals input size -> the `dif > 0` fixup branch is not triggered.
    # TODO(synk): torchsummary-based architecture introspection has no runtime equivalent;
    # the decoder topology is derived statically above.
    return out_flat.reshape(1, N, H, W).transpose(1, 0, 2, 3)


if __name__ == "__main__":
    key = jax.random.PRNGKey(0)
    pkey, xkey = jax.random.split(key)
    params = init_params(pkey)
    x = jax.random.normal(xkey, (2, 1, 16, 16), jnp.float32)

    out = jax.jit(lambda inp: recon_net_forward(inp, params))(x)
    out = jax.block_until_ready(out)
    assert out.shape == (2, 1, 16, 16), out.shape
    assert jnp.all(jnp.isfinite(out))
    print("KERNEL_OK")
</pallas_src>

<mosaic_0001>
module attributes {stable_mosaic.version = 11 : i64} {
  func.func private @main(%arg0: i32) attributes {dimension_semantics = [#tpu.dimension_semantics<core_parallel>], iteration_bounds = array<i64: 2>, tpu.core_type = #tpu.core_type<sc_scalar_subcore>, window_params = []} {
    return
  }
}

module attributes {stable_mosaic.version = 11 : i64} {
  func.func private @main(%arg0: i32) attributes {dimension_semantics = [#tpu.dimension_semantics<core_parallel>], iteration_bounds = array<i64: 2>, tpu.core_type = #tpu.core_type<sc_scalar_subcore>, window_params = []} {
    return
  }
}

module attributes {stable_mosaic.version = 11 : i64} {
  func.func @_reconnet_kernel(%arg0: memref<1x512xf32, #tpu.memory_space<vmem>>, %arg1: memref<9x4x1xf32, #tpu.memory_space<vmem>>, %arg2: memref<4x1xf32, #tpu.memory_space<vmem>>, %arg3: memref<512x128xf32, #tpu.memory_space<vmem>>, %arg4: memref<9x8x4xf32, #tpu.memory_space<vmem>>, %arg5: memref<8x1xf32, #tpu.memory_space<vmem>>, %arg6: memref<128x32xf32, #tpu.memory_space<vmem>>, %arg7: memref<32x128xf32, #tpu.memory_space<vmem>>, %arg8: memref<9x8x8xf32, #tpu.memory_space<vmem>>, %arg9: memref<8x1xf32, #tpu.memory_space<vmem>>, %arg10: memref<9x4x8xf32, #tpu.memory_space<vmem>>, %arg11: memref<4x1xf32, #tpu.memory_space<vmem>>, %arg12: memref<128x512xf32, #tpu.memory_space<vmem>>, %arg13: memref<9x4x4xf32, #tpu.memory_space<vmem>>, %arg14: memref<4x1xf32, #tpu.memory_space<vmem>>, %arg15: memref<9x1x4xf32, #tpu.memory_space<vmem>>, %arg16: memref<1x1xf32, #tpu.memory_space<vmem>>, %arg17: memref<1x512xf32, #tpu.memory_space<vmem>>) attributes {dimension_semantics = [], scalar_prefetch = 0 : i64, scratch_operands = 0 : i64, tpu.core_type = #tpu.core_type<tc>} {
    %c0 = arith.constant 0 : index
    %c0_0 = arith.constant 0 : index
    %0 = vector.load %arg0[%c0, %c0_0] : memref<1x512xf32, #tpu.memory_space<vmem>>, vector<1x512xf32>
    %1 = tpu.iota {dimensions = array<i32: 1>} : vector<1x512xi32>
    %c15_i32 = arith.constant 15 : i32
    %2 = vector.broadcast %c15_i32 : i32 to vector<1x512xi32>
    %3 = arith.andi %1, %2 : vector<1x512xi32>
    %c4_i32 = arith.constant 4 : i32
    %4 = vector.broadcast %c4_i32 : i32 to vector<1x512xi32>
    %5 = arith.shrsi %1, %4 : vector<1x512xi32>
    %c15_i32_1 = arith.constant 15 : i32
    %6 = vector.broadcast %c15_i32_1 : i32 to vector<1x512xi32>
    %7 = arith.andi %5, %6 : vector<1x512xi32>
    %cst = arith.constant 0.000000e+00 : f32
    %8 = vector.broadcast %cst : f32 to vector<4x512xf32>
    %c17_i32 = arith.constant 17 : i32
    %9 = tpu.dynamic_rotate %0 by %c17_i32 dim 1 : vector<1x512xf32>, i32 -> vector<1x512xf32>
    %c1_i32 = arith.constant 1 : i32
    %10 = vector.broadcast %c1_i32 : i32 to vector<1x512xi32>
    %11 = arith.cmpi sge, %7, %10 : vector<1x512xi32>
    %c1_i32_2 = arith.constant 1 : i32
    %12 = vector.broadcast %c1_i32_2 : i32 to vector<1x512xi32>
    %13 = arith.cmpi sge, %3, %12 : vector<1x512xi32>
    %14 = arith.andi %11, %13 : vector<1x512xi1>
    %15 = arith.extui %14 : vector<1x512xi1> to vector<1x512xi32>
    %16 = arith.sitofp %15 : vector<1x512xi32> to vector<1x512xf32>
    %17 = arith.mulf %9, %16 : vector<1x512xf32>
    %c0_3 = arith.constant 0 : index
    %c0_4 = arith.constant 0 : index
    %c0_5 = arith.constant 0 : index
    %18 = vector.load %arg1[%c0_3, %c0_4, %c0_5] : memref<9x4x1xf32, #tpu.memory_space<vmem>>, vector<1x4x1xf32>
    %19 = vector.shape_cast %18 : vector<1x4x1xf32> to vector<4x1xf32>
    %20 = vector.broadcast %19 : vector<4x1xf32> to vector<4x512xf32>
    %21 = vector.broadcast %17 : vector<1x512xf32> to vector<4x512xf32>
    %22 = arith.mulf %20, %21 : vector<4x512xf32>
    %23 = arith.addf %8, %22 : vector<4x512xf32>
    %c16_i32 = arith.constant 16 : i32
    %24 = tpu.dynamic_rotate %0 by %c16_i32 dim 1 : vector<1x512xf32>, i32 -> vector<1x512xf32>
    %c1_i32_6 = arith.constant 1 : i32
    %25 = vector.broadcast %c1_i32_6 : i32 to vector<1x512xi32>
    %26 = arith.cmpi sge, %7, %25 : vector<1x512xi32>
    %27 = arith.extui %26 : vector<1x512xi1> to vector<1x512xi32>
    %28 = arith.sitofp %27 : vector<1x512xi32> to vector<1x512xf32>
    %29 = arith.mulf %24, %28 : vector<1x512xf32>
    %c1 = arith.constant 1 : index
    %c0_7 = arith.constant 0 : index
    %c0_8 = arith.constant 0 : index
    %30 = vector.load %arg1[%c1, %c0_7, %c0_8] : memref<9x4x1xf32, #tpu.memory_space<vmem>>, vector<1x4x1xf32>
    %31 = vector.shape_cast %30 : vector<1x4x1xf32> to vector<4x1xf32>
    %32 = vector.broadcast %31 : vector<4x1xf32> to vector<4x512xf32>
    %33 = vector.broadcast %29 : vector<1x512xf32> to vector<4x512xf32>
    %34 = arith.mulf %32, %33 : vector<4x512xf32>
    %35 = arith.addf %23, %34 : vector<4x512xf32>
    %c15_i32_9 = arith.constant 15 : i32
    %36 = tpu.dynamic_rotate %0 by %c15_i32_9 dim 1 : vector<1x512xf32>, i32 -> vector<1x512xf32>
    %c1_i32_10 = arith.constant 1 : i32
    %37 = vector.broadcast %c1_i32_10 : i32 to vector<1x512xi32>
    %38 = arith.cmpi sge, %7, %37 : vector<1x512xi32>
    %c15_i32_11 = arith.constant 15 : i32
    %39 = vector.broadcast %c15_i32_11 : i32 to vector<1x512xi32>
    %40 = arith.cmpi slt, %3, %39 : vector<1x512xi32>
    %41 = arith.andi %38, %40 : vector<1x512xi1>
    %42 = arith.extui %41 : vector<1x512xi1> to vector<1x512xi32>
    %43 = arith.sitofp %42 : vector<1x512xi32> to vector<1x512xf32>
    %44 = arith.mulf %36, %43 : vector<1x512xf32>
    %c2 = arith.constant 2 : index
    %c0_12 = arith.constant 0 : index
    %c0_13 = arith.constant 0 : index
    %45 = vector.load %arg1[%c2, %c0_12, %c0_13] : memref<9x4x1xf32, #tpu.memory_space<vmem>>, vector<1x4x1xf32>
    %46 = vector.shape_cast %45 : vector<1x4x1xf32> to vector<4x1xf32>
    %47 = vector.broadcast %46 : vector<4x1xf32> to vector<4x512xf32>
    %48 = vector.broadcast %44 : vector<1x512xf32> to vector<4x512xf32>
    %49 = arith.mulf %47, %48 : vector<4x512xf32>
    %50 = arith.addf %35, %49 : vector<4x512xf32>
    %c1_i32_14 = arith.constant 1 : i32
    %51 = tpu.dynamic_rotate %0 by %c1_i32_14 dim 1 : vector<1x512xf32>, i32 -> vector<1x512xf32>
    %c1_i32_15 = arith.constant 1 : i32
    %52 = vector.broadcast %c1_i32_15 : i32 to vector<1x512xi32>
    %53 = arith.cmpi sge, %3, %52 : vector<1x512xi32>
    %54 = arith.extui %53 : vector<1x512xi1> to vector<1x512xi32>
    %55 = arith.sitofp %54 : vector<1x512xi32> to vector<1x512xf32>
    %56 = arith.mulf %51, %55 : vector<1x512xf32>
    %c3 = arith.constant 3 : index
    %c0_16 = arith.constant 0 : index
    %c0_17 = arith.constant 0 : index
    %57 = vector.load %arg1[%c3, %c0_16, %c0_17] : memref<9x4x1xf32, #tpu.memory_space<vmem>>, vector<1x4x1xf32>
    %58 = vector.shape_cast %57 : vector<1x4x1xf32> to vector<4x1xf32>
    %59 = vector.broadcast %58 : vector<4x1xf32> to vector<4x512xf32>
    %60 = vector.broadcast %56 : vector<1x512xf32> to vector<4x512xf32>
    %61 = arith.mulf %59, %60 : vector<4x512xf32>
    %62 = arith.addf %50, %61 : vector<4x512xf32>
    %c4 = arith.constant 4 : index
    %c0_18 = arith.constant 0 : index
    %c0_19 = arith.constant 0 : index
    %63 = vector.load %arg1[%c4, %c0_18, %c0_19] : memref<9x4x1xf32, #tpu.memory_space<vmem>>, vector<1x4x1xf32>
    %64 = vector.shape_cast %63 : vector<1x4x1xf32> to vector<4x1xf32>
    %65 = vector.broadcast %64 : vector<4x1xf32> to vector<4x512xf32>
    %66 = vector.broadcast %0 : vector<1x512xf32> to vector<4x512xf32>
    %67 = arith.mulf %65, %66 : vector<4x512xf32>
    %68 = arith.addf %62, %67 : vector<4x512xf32>
    %c511_i32 = arith.constant 511 : i32
    %69 = tpu.dynamic_rotate %0 by %c511_i32 dim 1 : vector<1x512xf32>, i32 -> vector<1x512xf32>
    %c15_i32_20 = arith.constant 15 : i32
    %70 = vector.broadcast %c15_i32_20 : i32 to vector<1x512xi32>
    %71 = arith.cmpi slt, %3, %70 : vector<1x512xi32>
    %72 = arith.extui %71 : vector<1x512xi1> to vector<1x512xi32>
    %73 = arith.sitofp %72 : vector<1x512xi32> to vector<1x512xf32>
    %74 = arith.mulf %69, %73 : vector<1x512xf32>
    %c5 = arith.constant 5 : index
    %c0_21 = arith.constant 0 : index
    %c0_22 = arith.constant 0 : index
    %75 = vector.load %arg1[%c5, %c0_21, %c0_22] : memref<9x4x1xf32, #tpu.memory_space<vmem>>, vector<1x4x1xf32>
    %76 = vector.shape_cast %75 : vector<1x4x1xf32> to vector<4x1xf32>
    %77 = vector.broadcast %76 : vector<4x1xf32> to vector<4x512xf32>
    %78 = vector.broadcast %74 : vector<1x512xf32> to vector<4x512xf32>
    %79 = arith.mulf %77, %78 : vector<4x512xf32>
    %80 = arith.addf %68, %79 : vector<4x512xf32>
    %c497_i32 = arith.constant 497 : i32
    %81 = tpu.dynamic_rotate %0 by %c497_i32 dim 1 : vector<1x512xf32>, i32 -> vector<1x512xf32>
    %c15_i32_23 = arith.constant 15 : i32
    %82 = vector.broadcast %c15_i32_23 : i32 to vector<1x512xi32>
    %83 = arith.cmpi slt, %7, %82 : vector<1x512xi32>
    %c1_i32_24 = arith.constant 1 : i32
    %84 = vector.broadcast %c1_i32_24 : i32 to vector<1x512xi32>
    %85 = arith.cmpi sge, %3, %84 : vector<1x512xi32>
    %86 = arith.andi %83, %85 : vector<1x512xi1>
    %87 = arith.extui %86 : vector<1x512xi1> to vector<1x512xi32>
    %88 = arith.sitofp %87 : vector<1x512xi32> to vector<1x512xf32>
    %89 = arith.mulf %81, %88 : vector<1x512xf32>
    %c6 = arith.constant 6 : index
    %c0_25 = arith.constant 0 : index
    %c0_26 = arith.constant 0 : index
    %90 = vector.load %arg1[%c6, %c0_25, %c0_26] : memref<9x4x1xf32, #tpu.memory_space<vmem>>, vector<1x4x1xf32>
    %91 = vector.shape_cast %90 : vector<1x4x1xf32> to vector<4x1xf32>
    %92 = vector.broadcast %91 : vector<4x1xf32> to vector<4x512xf32>
    %93 = vector.broadcast %89 : vector<1x512xf32> to vector<4x512xf32>
    %94 = arith.mulf %92, %93 : vector<4x512xf32>
    %95 = arith.addf %80, %94 : vector<4x512xf32>
    %c496_i32 = arith.constant 496 : i32
    %96 = tpu.dynamic_rotate %0 by %c496_i32 dim 1 : vector<1x512xf32>, i32 -> vector<1x512xf32>
    %c15_i32_27 = arith.constant 15 : i32
    %97 = vector.broadcast %c15_i32_27 : i32 to vector<1x512xi32>
    %98 = arith.cmpi slt, %7, %97 : vector<1x512xi32>
    %99 = arith.extui %98 : vector<1x512xi1> to vector<1x512xi32>
    %100 = arith.sitofp %99 : vector<1x512xi32> to vector<1x512xf32>
    %101 = arith.mulf %96, %100 : vector<1x512xf32>
    %c7 = arith.constant 7 : index
    %c0_28 = arith.constant 0 : index
    %c0_29 = arith.constant 0 : index
    %102 = vector.load %arg1[%c7, %c0_28, %c0_29] : memref<9x4x1xf32, #tpu.memory_space<vmem>>, vector<1x4x1xf32>
    %103 = vector.shape_cast %102 : vector<1x4x1xf32> to vector<4x1xf32>
    %104 = vector.broadcast %103 : vector<4x1xf32> to vector<4x512xf32>
    %105 = vector.broadcast %101 : vector<1x512xf32> to vector<4x512xf32>
    %106 = arith.mulf %104, %105 : vector<4x512xf32>
    %107 = arith.addf %95, %106 : vector<4x512xf32>
    %c495_i32 = arith.constant 495 : i32
    %108 = tpu.dynamic_rotate %0 by %c495_i32 dim 1 : vector<1x512xf32>, i32 -> vector<1x512xf32>
    %c15_i32_30 = arith.constant 15 : i32
    %109 = vector.broadcast %c15_i32_30 : i32 to vector<1x512xi32>
    %110 = arith.cmpi slt, %7, %109 : vector<1x512xi32>
    %c15_i32_31 = arith.constant 15 : i32
    %111 = vector.broadcast %c15_i32_31 : i32 to vector<1x512xi32>
    %112 = arith.cmpi slt, %3, %111 : vector<1x512xi32>
    %113 = arith.andi %110, %112 : vector<1x512xi1>
    %114 = arith.extui %113 : vector<1x512xi1> to vector<1x512xi32>
    %115 = arith.sitofp %114 : vector<1x512xi32> to vector<1x512xf32>
    %116 = arith.mulf %108, %115 : vector<1x512xf32>
    %c8 = arith.constant 8 : index
    %c0_32 = arith.constant 0 : index
    %c0_33 = arith.constant 0 : index
    %117 = vector.load %arg1[%c8, %c0_32, %c0_33] : memref<9x4x1xf32, #tpu.memory_space<vmem>>, vector<1x4x1xf32>
    %118 = vector.shape_cast %117 : vector<1x4x1xf32> to vector<4x1xf32>
    %119 = vector.broadcast %118 : vector<4x1xf32> to vector<4x512xf32>
    %120 = vector.broadcast %116 : vector<1x512xf32> to vector<4x512xf32>
    %121 = arith.mulf %119, %120 : vector<4x512xf32>
    %122 = arith.addf %107, %121 : vector<4x512xf32>
    %c0_34 = arith.constant 0 : index
    %c0_35 = arith.constant 0 : index
    %123 = vector.load %arg2[%c0_34, %c0_35] : memref<4x1xf32, #tpu.memory_space<vmem>>, vector<4x1xf32>
    %124 = vector.broadcast %123 : vector<4x1xf32> to vector<4x512xf32>
    %125 = arith.addf %122, %124 : vector<4x512xf32>
    %cst_36 = arith.constant 0.000000e+00 : f32
    %126 = vector.broadcast %cst_36 : f32 to vector<4x512xf32>
    %127 = arith.maximumf %125, %126 : vector<4x512xf32>
    %c511_i32_37 = arith.constant 511 : i32
    %128 = tpu.dynamic_rotate %127 by %c511_i32_37 dim 1 : vector<4x512xf32>, i32 -> vector<4x512xf32>
    %129 = arith.maximumf %127, %128 : vector<4x512xf32>
    %c496_i32_38 = arith.constant 496 : i32
    %130 = tpu.dynamic_rotate %129 by %c496_i32_38 dim 1 : vector<4x512xf32>, i32 -> vector<4x512xf32>
    %131 = arith.maximumf %129, %130 : vector<4x512xf32>
    %c0_39 = arith.constant 0 : index
    %c0_40 = arith.constant 0 : index
    %132 = vector.load %arg3[%c0_39, %c0_40] : memref<512x128xf32, #tpu.memory_space<vmem>>, vector<512x128xf32>
    %cst_41 = arith.constant dense<0.000000e+00> : vector<4x128xf32>
    %133 = tpu.matmul %131, %132, %cst_41 {dimension_numbers = #tpu.dot_dimension_numbers<[1], [0], [0], [1], [0, 0, 1, 1], [], []>} : vector<4x512xf32>, vector<512x128xf32>, vector<4x128xf32> -> vector<4x128xf32>
    %134 = tpu.iota {dimensions = array<i32: 1>} : vector<1x128xi32>
    %c7_i32 = arith.constant 7 : i32
    %135 = vector.broadcast %c7_i32 : i32 to vector<1x128xi32>
    %136 = arith.andi %134, %135 : vector<1x128xi32>
    %c3_i32 = arith.constant 3 : i32
    %137 = vector.broadcast %c3_i32 : i32 to vector<1x128xi32>
    %138 = arith.shrsi %134, %137 : vector<1x128xi32>
    %c7_i32_42 = arith.constant 7 : i32
    %139 = vector.broadcast %c7_i32_42 : i32 to vector<1x128xi32>
    %140 = arith.andi %138, %139 : vector<1x128xi32>
    %cst_43 = arith.constant 0.000000e+00 : f32
    %141 = vector.broadcast %cst_43 : f32 to vector<8x128xf32>
    %c9_i32 = arith.constant 9 : i32
    %142 = tpu.dynamic_rotate %133 by %c9_i32 dim 1 : vector<4x128xf32>, i32 -> vector<4x128xf32>
    %c1_i32_44 = arith.constant 1 : i32
    %143 = vector.broadcast %c1_i32_44 : i32 to vector<1x128xi32>
    %144 = arith.cmpi sge, %140, %143 : vector<1x128xi32>
    %c1_i32_45 = arith.constant 1 : i32
    %145 = vector.broadcast %c1_i32_45 : i32 to vector<1x128xi32>
    %146 = arith.cmpi sge, %136, %145 : vector<1x128xi32>
    %147 = arith.andi %144, %146 : vector<1x128xi1>
    %148 = arith.extui %147 : vector<1x128xi1> to vector<1x128xi32>
    %149 = arith.sitofp %148 : vector<1x128xi32> to vector<1x128xf32>
    %150 = vector.broadcast %149 : vector<1x128xf32> to vector<4x128xf32>
    %151 = arith.mulf %142, %150 : vector<4x128xf32>
    %c0_46 = arith.constant 0 : index
    %c0_47 = arith.constant 0 : index
    %c0_48 = arith.constant 0 : index
    %152 = vector.load %arg4[%c0_46, %c0_47, %c0_48] : memref<9x8x4xf32, #tpu.memory_space<vmem>>, vector<1x8x4xf32>
    %153 = vector.shape_cast %152 : vector<1x8x4xf32> to vector<8x4xf32>
    %cst_49 = arith.constant dense<0.000000e+00> : vector<8x128xf32>
    %154 = tpu.matmul %153, %151, %cst_49 {dimension_numbers = #tpu.dot_dimension_numbers<[1], [0], [0], [1], [0, 0, 1, 1], [], []>} : vector<8x4xf32>, vector<4x128xf32>, vector<8x128xf32> -> vector<8x128xf32>
    %155 = arith.addf %141, %154 : vector<8x128xf32>
    %c8_i32 = arith.constant 8 : i32
    %156 = tpu.dynamic_rotate %133 by %c8_i32 dim 1 : vector<4x128xf32>, i32 -> vector<4x128xf32>
    %c1_i32_50 = arith.constant 1 : i32
    %157 = vector.broadcast %c1_i32_50 : i32 to vector<1x128xi32>
    %158 = arith.cmpi sge, %140, %157 : vector<1x128xi32>
    %159 = arith.extui %158 : vector<1x128xi1> to vector<1x128xi32>
    %160 = arith.sitofp %159 : vector<1x128xi32> to vector<1x128xf32>
    %161 = vector.broadcast %160 : vector<1x128xf32> to vector<4x128xf32>
    %162 = arith.mulf %156, %161 : vector<4x128xf32>
    %c1_51 = arith.constant 1 : index
    %c0_52 = arith.constant 0 : index
    %c0_53 = arith.constant 0 : index
    %163 = vector.load %arg4[%c1_51, %c0_52, %c0_53] : memref<9x8x4xf32, #tpu.memory_space<vmem>>, vector<1x8x4xf32>
    %164 = vector.shape_cast %163 : vector<1x8x4xf32> to vector<8x4xf32>
    %cst_54 = arith.constant dense<0.000000e+00> : vector<8x128xf32>
    %165 = tpu.matmul %164, %162, %cst_54 {dimension_numbers = #tpu.dot_dimension_numbers<[1], [0], [0], [1], [0, 0, 1, 1], [], []>} : vector<8x4xf32>, vector<4x128xf32>, vector<8x128xf32> -> vector<8x128xf32>
    %166 = arith.addf %155, %165 : vector<8x128xf32>
    %c7_i32_55 = arith.constant 7 : i32
    %167 = tpu.dynamic_rotate %133 by %c7_i32_55 dim 1 : vector<4x128xf32>, i32 -> vector<4x128xf32>
    %c1_i32_56 = arith.constant 1 : i32
    %168 = vector.broadcast %c1_i32_56 : i32 to vector<1x128xi32>
    %169 = arith.cmpi sge, %140, %168 : vector<1x128xi32>
    %c7_i32_57 = arith.constant 7 : i32
    %170 = vector.broadcast %c7_i32_57 : i32 to vector<1x128xi32>
    %171 = arith.cmpi slt, %136, %170 : vector<1x128xi32>
    %172 = arith.andi %169, %171 : vector<1x128xi1>
    %173 = arith.extui %172 : vector<1x128xi1> to vector<1x128xi32>
    %174 = arith.sitofp %173 : vector<1x128xi32> to vector<1x128xf32>
    %175 = vector.broadcast %174 : vector<1x128xf32> to vector<4x128xf32>
    %176 = arith.mulf %167, %175 : vector<4x128xf32>
    %c2_58 = arith.constant 2 : index
    %c0_59 = arith.constant 0 : index
    %c0_60 = arith.constant 0 : index
    %177 = vector.load %arg4[%c2_58, %c0_59, %c0_60] : memref<9x8x4xf32, #tpu.memory_space<vmem>>, vector<1x8x4xf32>
    %178 = vector.shape_cast %177 : vector<1x8x4xf32> to vector<8x4xf32>
    %cst_61 = arith.constant dense<0.000000e+00> : vector<8x128xf32>
    %179 = tpu.matmul %178, %176, %cst_61 {dimension_numbers = #tpu.dot_dimension_numbers<[1], [0], [0], [1], [0, 0, 1, 1], [], []>} : vector<8x4xf32>, vector<4x128xf32>, vector<8x128xf32> -> vector<8x128xf32>
    %180 = arith.addf %166, %179 : vector<8x128xf32>
    %c1_i32_62 = arith.constant 1 : i32
    %181 = tpu.dynamic_rotate %133 by %c1_i32_62 dim 1 : vector<4x128xf32>, i32 -> vector<4x128xf32>
    %c1_i32_63 = arith.constant 1 : i32
    %182 = vector.broadcast %c1_i32_63 : i32 to vector<1x128xi32>
    %183 = arith.cmpi sge, %136, %182 : vector<1x128xi32>
    %184 = arith.extui %183 : vector<1x128xi1> to vector<1x128xi32>
    %185 = arith.sitofp %184 : vector<1x128xi32> to vector<1x128xf32>
    %186 = vector.broadcast %185 : vector<1x128xf32> to vector<4x128xf32>
    %187 = arith.mulf %181, %186 : vector<4x128xf32>
    %c3_64 = arith.constant 3 : index
    %c0_65 = arith.constant 0 : index
    %c0_66 = arith.constant 0 : index
    %188 = vector.load %arg4[%c3_64, %c0_65, %c0_66] : memref<9x8x4xf32, #tpu.memory_space<vmem>>, vector<1x8x4xf32>
    %189 = vector.shape_cast %188 : vector<1x8x4xf32> to vector<8x4xf32>
    %cst_67 = arith.constant dense<0.000000e+00> : vector<8x128xf32>
    %190 = tpu.matmul %189, %187, %cst_67 {dimension_numbers = #tpu.dot_dimension_numbers<[1], [0], [0], [1], [0, 0, 1, 1], [], []>} : vector<8x4xf32>, vector<4x128xf32>, vector<8x128xf32> -> vector<8x128xf32>
    %191 = arith.addf %180, %190 : vector<8x128xf32>
    %c4_68 = arith.constant 4 : index
    %c0_69 = arith.constant 0 : index
    %c0_70 = arith.constant 0 : index
    %192 = vector.load %arg4[%c4_68, %c0_69, %c0_70] : memref<9x8x4xf32, #tpu.memory_space<vmem>>, vector<1x8x4xf32>
    %193 = vector.shape_cast %192 : vector<1x8x4xf32> to vector<8x4xf32>
    %cst_71 = arith.constant dense<0.000000e+00> : vector<8x128xf32>
    %194 = tpu.matmul %193, %133, %cst_71 {dimension_numbers = #tpu.dot_dimension_numbers<[1], [0], [0], [1], [0, 0, 1, 1], [], []>} : vector<8x4xf32>, vector<4x128xf32>, vector<8x128xf32> -> vector<8x128xf32>
    %195 = arith.addf %191, %194 : vector<8x128xf32>
    %c127_i32 = arith.constant 127 : i32
    %196 = tpu.dynamic_rotate %133 by %c127_i32 dim 1 : vector<4x128xf32>, i32 -> vector<4x128xf32>
    %c7_i32_72 = arith.constant 7 : i32
    %197 = vector.broadcast %c7_i32_72 : i32 to vector<1x128xi32>
    %198 = arith.cmpi slt, %136, %197 : vector<1x128xi32>
    %199 = arith.extui %198 : vector<1x128xi1> to vector<1x128xi32>
    %200 = arith.sitofp %199 : vector<1x128xi32> to vector<1x128xf32>
    %201 = vector.broadcast %200 : vector<1x128xf32> to vector<4x128xf32>
    %202 = arith.mulf %196, %201 : vector<4x128xf32>
    %c5_73 = arith.constant 5 : index
    %c0_74 = arith.constant 0 : index
    %c0_75 = arith.constant 0 : index
    %203 = vector.load %arg4[%c5_73, %c0_74, %c0_75] : memref<9x8x4xf32, #tpu.memory_space<vmem>>, vector<1x8x4xf32>
    %204 = vector.shape_cast %203 : vector<1x8x4xf32> to vector<8x4xf32>
    %cst_76 = arith.constant dense<0.000000e+00> : vector<8x128xf32>
    %205 = tpu.matmul %204, %202, %cst_76 {dimension_numbers = #tpu.dot_dimension_numbers<[1], [0], [0], [1], [0, 0, 1, 1], [], []>} : vector<8x4xf32>, vector<4x128xf32>, vector<8x128xf32> -> vector<8x128xf32>
    %206 = arith.addf %195, %205 : vector<8x128xf32>
    %c121_i32 = arith.constant 121 : i32
    %207 = tpu.dynamic_rotate %133 by %c121_i32 dim 1 : vector<4x128xf32>, i32 -> vector<4x128xf32>
    %c7_i32_77 = arith.constant 7 : i32
    %208 = vector.broadcast %c7_i32_77 : i32 to vector<1x128xi32>
    %209 = arith.cmpi slt, %140, %208 : vector<1x128xi32>
    %c1_i32_78 = arith.constant 1 : i32
    %210 = vector.broadcast %c1_i32_78 : i32 to vector<1x128xi32>
    %211 = arith.cmpi sge, %136, %210 : vector<1x128xi32>
    %212 = arith.andi %209, %211 : vector<1x128xi1>
    %213 = arith.extui %212 : vector<1x128xi1> to vector<1x128xi32>
    %214 = arith.sitofp %213 : vector<1x128xi32> to vector<1x128xf32>
    %215 = vector.broadcast %214 : vector<1x128xf32> to vector<4x128xf32>
    %216 = arith.mulf %207, %215 : vector<4x128xf32>
    %c6_79 = arith.constant 6 : index
    %c0_80 = arith.constant 0 : index
    %c0_81 = arith.constant 0 : index
    %217 = vector.load %arg4[%c6_79, %c0_80, %c0_81] : memref<9x8x4xf32, #tpu.memory_space<vmem>>, vector<1x8x4xf32>
    %218 = vector.shape_cast %217 : vector<1x8x4xf32> to vector<8x4xf32>
    %cst_82 = arith.constant dense<0.000000e+00> : vector<8x128xf32>
    %219 = tpu.matmul %218, %216, %cst_82 {dimension_numbers = #tpu.dot_dimension_numbers<[1], [0], [0], [1], [0, 0, 1, 1], [], []>} : vector<8x4xf32>, vector<4x128xf32>, vector<8x128xf32> -> vector<8x128xf32>
    %220 = arith.addf %206, %219 : vector<8x128xf32>
    %c120_i32 = arith.constant 120 : i32
    %221 = tpu.dynamic_rotate %133 by %c120_i32 dim 1 : vector<4x128xf32>, i32 -> vector<4x128xf32>
    %c7_i32_83 = arith.constant 7 : i32
    %222 = vector.broadcast %c7_i32_83 : i32 to vector<1x128xi32>
    %223 = arith.cmpi slt, %140, %222 : vector<1x128xi32>
    %224 = arith.extui %223 : vector<1x128xi1> to vector<1x128xi32>
    %225 = arith.sitofp %224 : vector<1x128xi32> to vector<1x128xf32>
    %226 = vector.broadcast %225 : vector<1x128xf32> to vector<4x128xf32>
    %227 = arith.mulf %221, %226 : vector<4x128xf32>
    %c7_84 = arith.constant 7 : index
    %c0_85 = arith.constant 0 : index
    %c0_86 = arith.constant 0 : index
    %228 = vector.load %arg4[%c7_84, %c0_85, %c0_86] : memref<9x8x4xf32, #tpu.memory_space<vmem>>, vector<1x8x4xf32>
    %229 = vector.shape_cast %228 : vector<1x8x4xf32> to vector<8x4xf32>
    %cst_87 = arith.constant dense<0.000000e+00> : vector<8x128xf32>
    %230 = tpu.matmul %229, %227, %cst_87 {dimension_numbers = #tpu.dot_dimension_numbers<[1], [0], [0], [1], [0, 0, 1, 1], [], []>} : vector<8x4xf32>, vector<4x128xf32>, vector<8x128xf32> -> vector<8x128xf32>
    %231 = arith.addf %220, %230 : vector<8x128xf32>
    %c119_i32 = arith.constant 119 : i32
    %232 = tpu.dynamic_rotate %133 by %c119_i32 dim 1 : vector<4x128xf32>, i32 -> vector<4x128xf32>
    %c7_i32_88 = arith.constant 7 : i32
    %233 = vector.broadcast %c7_i32_88 : i32 to vector<1x128xi32>
    %234 = arith.cmpi slt, %140, %233 : vector<1x128xi32>
    %c7_i32_89 = arith.constant 7 : i32
    %235 = vector.broadcast %c7_i32_89 : i32 to vector<1x128xi32>
    %236 = arith.cmpi slt, %136, %235 : vector<1x128xi32>
    %237 = arith.andi %234, %236 : vector<1x128xi1>
    %238 = arith.extui %237 : vector<1x128xi1> to vector<1x128xi32>
    %239 = arith.sitofp %238 : vector<1x128xi32> to vector<1x128xf32>
    %240 = vector.broadcast %239 : vector<1x128xf32> to vector<4x128xf32>
    %241 = arith.mulf %232, %240 : vector<4x128xf32>
    %c8_90 = arith.constant 8 : index
    %c0_91 = arith.constant 0 : index
    %c0_92 = arith.constant 0 : index
    %242 = vector.load %arg4[%c8_90, %c0_91, %c0_92] : memref<9x8x4xf32, #tpu.memory_space<vmem>>, vector<1x8x4xf32>
    %243 = vector.shape_cast %242 : vector<1x8x4xf32> to vector<8x4xf32>
    %cst_93 = arith.constant dense<0.000000e+00> : vector<8x128xf32>
    %244 = tpu.matmul %243, %241, %cst_93 {dimension_numbers = #tpu.dot_dimension_numbers<[1], [0], [0], [1], [0, 0, 1, 1], [], []>} : vector<8x4xf32>, vector<4x128xf32>, vector<8x128xf32> -> vector<8x128xf32>
    %245 = arith.addf %231, %244 : vector<8x128xf32>
    %c0_94 = arith.constant 0 : index
    %c0_95 = arith.constant 0 : index
    %246 = vector.load %arg5[%c0_94, %c0_95] : memref<8x1xf32, #tpu.memory_space<vmem>>, vector<8x1xf32>
    %247 = vector.broadcast %246 : vector<8x1xf32> to vector<8x128xf32>
    %248 = arith.addf %245, %247 : vector<8x128xf32>
    %cst_96 = arith.constant 0.000000e+00 : f32
    %249 = vector.broadcast %cst_96 : f32 to vector<8x128xf32>
    %250 = arith.maximumf %248, %249 : vector<8x128xf32>
    %c127_i32_97 = arith.constant 127 : i32
    %251 = tpu.dynamic_rotate %250 by %c127_i32_97 dim 1 : vector<8x128xf32>, i32 -> vector<8x128xf32>
    %252 = arith.maximumf %250, %251 : vector<8x128xf32>
    %c120_i32_98 = arith.constant 120 : i32
    %253 = tpu.dynamic_rotate %252 by %c120_i32_98 dim 1 : vector<8x128xf32>, i32 -> vector<8x128xf32>
    %254 = arith.maximumf %252, %253 : vector<8x128xf32>
    %c0_99 = arith.constant 0 : index
    %c0_100 = arith.constant 0 : index
    %255 = vector.load %arg6[%c0_99, %c0_100] : memref<128x32xf32, #tpu.memory_space<vmem>>, vector<128x32xf32>
    %cst_101 = arith.constant dense<0.000000e+00> : vector<8x32xf32>
    %256 = tpu.matmul %254, %255, %cst_101 {dimension_numbers = #tpu.dot_dimension_numbers<[1], [0], [0], [1], [0, 0, 1, 1], [], []>} : vector<8x128xf32>, vector<128x32xf32>, vector<8x32xf32> -> vector<8x32xf32>
    %c0_102 = arith.constant 0 : index
    %c0_103 = arith.constant 0 : index
    %257 = vector.load %arg7[%c0_102, %c0_103] : memref<32x128xf32, #tpu.memory_space<vmem>>, vector<32x128xf32>
    %cst_104 = arith.constant dense<0.000000e+00> : vector<8x128xf32>
    %258 = tpu.matmul %256, %257, %cst_104 {dimension_numbers = #tpu.dot_dimension_numbers<[1], [0], [0], [1], [0, 0, 1, 1], [], []>} : vector<8x32xf32>, vector<32x128xf32>, vector<8x128xf32> -> vector<8x128xf32>
    %259 = tpu.iota {dimensions = array<i32: 1>} : vector<1x128xi32>
    %c7_i32_105 = arith.constant 7 : i32
    %260 = vector.broadcast %c7_i32_105 : i32 to vector<1x128xi32>
    %261 = arith.andi %259, %260 : vector<1x128xi32>
    %c3_i32_106 = arith.constant 3 : i32
    %262 = vector.broadcast %c3_i32_106 : i32 to vector<1x128xi32>
    %263 = arith.shrsi %259, %262 : vector<1x128xi32>
    %c7_i32_107 = arith.constant 7 : i32
    %264 = vector.broadcast %c7_i32_107 : i32 to vector<1x128xi32>
    %265 = arith.andi %263, %264 : vector<1x128xi32>
    %cst_108 = arith.constant 0.000000e+00 : f32
    %266 = vector.broadcast %cst_108 : f32 to vector<8x128xf32>
    %c9_i32_109 = arith.constant 9 : i32
    %267 = tpu.dynamic_rotate %258 by %c9_i32_109 dim 1 : vector<8x128xf32>, i32 -> vector<8x128xf32>
    %c1_i32_110 = arith.constant 1 : i32
    %268 = vector.broadcast %c1_i32_110 : i32 to vector<1x128xi32>
    %269 = arith.cmpi sge, %265, %268 : vector<1x128xi32>
    %c1_i32_111 = arith.constant 1 : i32
    %270 = vector.broadcast %c1_i32_111 : i32 to vector<1x128xi32>
    %271 = arith.cmpi sge, %261, %270 : vector<1x128xi32>
    %272 = arith.andi %269, %271 : vector<1x128xi1>
    %273 = arith.extui %272 : vector<1x128xi1> to vector<1x128xi32>
    %274 = arith.sitofp %273 : vector<1x128xi32> to vector<1x128xf32>
    %275 = vector.broadcast %274 : vector<1x128xf32> to vector<8x128xf32>
    %276 = arith.mulf %267, %275 : vector<8x128xf32>
    %c0_112 = arith.constant 0 : index
    %c0_113 = arith.constant 0 : index
    %c0_114 = arith.constant 0 : index
    %277 = vector.load %arg8[%c0_112, %c0_113, %c0_114] : memref<9x8x8xf32, #tpu.memory_space<vmem>>, vector<1x8x8xf32>
    %278 = vector.shape_cast %277 : vector<1x8x8xf32> to vector<8x8xf32>
    %cst_115 = arith.constant dense<0.000000e+00> : vector<8x128xf32>
    %279 = tpu.matmul %278, %276, %cst_115 {dimension_numbers = #tpu.dot_dimension_numbers<[1], [0], [0], [1], [0, 0, 1, 1], [], []>} : vector<8x8xf32>, vector<8x128xf32>, vector<8x128xf32> -> vector<8x128xf32>
    %280 = arith.addf %266, %279 : vector<8x128xf32>
    %c8_i32_116 = arith.constant 8 : i32
    %281 = tpu.dynamic_rotate %258 by %c8_i32_116 dim 1 : vector<8x128xf32>, i32 -> vector<8x128xf32>
    %c1_i32_117 = arith.constant 1 : i32
    %282 = vector.broadcast %c1_i32_117 : i32 to vector<1x128xi32>
    %283 = arith.cmpi sge, %265, %282 : vector<1x128xi32>
    %284 = arith.extui %283 : vector<1x128xi1> to vector<1x128xi32>
    %285 = arith.sitofp %284 : vector<1x128xi32> to vector<1x128xf32>
    %286 = vector.broadcast %285 : vector<1x128xf32> to vector<8x128xf32>
    %287 = arith.mulf %281, %286 : vector<8x128xf32>
    %c1_118 = arith.constant 1 : index
    %c0_119 = arith.constant 0 : index
    %c0_120 = arith.constant 0 : index
    %288 = vector.load %arg8[%c1_118, %c0_119, %c0_120] : memref<9x8x8xf32, #tpu.memory_space<vmem>>, vector<1x8x8xf32>
    %289 = vector.shape_cast %288 : vector<1x8x8xf32> to vector<8x8xf32>
    %cst_121 = arith.constant dense<0.000000e+00> : vector<8x128xf32>
    %290 = tpu.matmul %289, %287, %cst_121 {dimension_numbers = #tpu.dot_dimension_numbers<[1], [0], [0], [1], [0, 0, 1, 1], [], []>} : vector<8x8xf32>, vector<8x128xf32>, vector<8x128xf32> -> vector<8x128xf32>
    %291 = arith.addf %280, %290 : vector<8x128xf32>
    %c7_i32_122 = arith.constant 7 : i32
    %292 = tpu.dynamic_rotate %258 by %c7_i32_122 dim 1 : vector<8x128xf32>, i32 -> vector<8x128xf32>
    %c1_i32_123 = arith.constant 1 : i32
    %293 = vector.broadcast %c1_i32_123 : i32 to vector<1x128xi32>
    %294 = arith.cmpi sge, %265, %293 : vector<1x128xi32>
    %c7_i32_124 = arith.constant 7 : i32
    %295 = vector.broadcast %c7_i32_124 : i32 to vector<1x128xi32>
    %296 = arith.cmpi slt, %261, %295 : vector<1x128xi32>
    %297 = arith.andi %294, %296 : vector<1x128xi1>
    %298 = arith.extui %297 : vector<1x128xi1> to vector<1x128xi32>
    %299 = arith.sitofp %298 : vector<1x128xi32> to vector<1x128xf32>
    %300 = vector.broadcast %299 : vector<1x128xf32> to vector<8x128xf32>
    %301 = arith.mulf %292, %300 : vector<8x128xf32>
    %c2_125 = arith.constant 2 : index
    %c0_126 = arith.constant 0 : index
    %c0_127 = arith.constant 0 : index
    %302 = vector.load %arg8[%c2_125, %c0_126, %c0_127] : memref<9x8x8xf32, #tpu.memory_space<vmem>>, vector<1x8x8xf32>
    %303 = vector.shape_cast %302 : vector<1x8x8xf32> to vector<8x8xf32>
    %cst_128 = arith.constant dense<0.000000e+00> : vector<8x128xf32>
    %304 = tpu.matmul %303, %301, %cst_128 {dimension_numbers = #tpu.dot_dimension_numbers<[1], [0], [0], [1], [0, 0, 1, 1], [], []>} : vector<8x8xf32>, vector<8x128xf32>, vector<8x128xf32> -> vector<8x128xf32>
    %305 = arith.addf %291, %304 : vector<8x128xf32>
    %c1_i32_129 = arith.constant 1 : i32
    %306 = tpu.dynamic_rotate %258 by %c1_i32_129 dim 1 : vector<8x128xf32>, i32 -> vector<8x128xf32>
    %c1_i32_130 = arith.constant 1 : i32
    %307 = vector.broadcast %c1_i32_130 : i32 to vector<1x128xi32>
    %308 = arith.cmpi sge, %261, %307 : vector<1x128xi32>
    %309 = arith.extui %308 : vector<1x128xi1> to vector<1x128xi32>
    %310 = arith.sitofp %309 : vector<1x128xi32> to vector<1x128xf32>
    %311 = vector.broadcast %310 : vector<1x128xf32> to vector<8x128xf32>
    %312 = arith.mulf %306, %311 : vector<8x128xf32>
    %c3_131 = arith.constant 3 : index
    %c0_132 = arith.constant 0 : index
    %c0_133 = arith.constant 0 : index
    %313 = vector.load %arg8[%c3_131, %c0_132, %c0_133] : memref<9x8x8xf32, #tpu.memory_space<vmem>>, vector<1x8x8xf32>
    %314 = vector.shape_cast %313 : vector<1x8x8xf32> to vector<8x8xf32>
    %cst_134 = arith.constant dense<0.000000e+00> : vector<8x128xf32>
    %315 = tpu.matmul %314, %312, %cst_134 {dimension_numbers = #tpu.dot_dimension_numbers<[1], [0], [0], [1], [0, 0, 1, 1], [], []>} : vector<8x8xf32>, vector<8x128xf32>, vector<8x128xf32> -> vector<8x128xf32>
    %316 = arith.addf %305, %315 : vector<8x128xf32>
    %c4_135 = arith.constant 4 : index
    %c0_136 = arith.constant 0 : index
    %c0_137 = arith.constant 0 : index
    %317 = vector.load %arg8[%c4_135, %c0_136, %c0_137] : memref<9x8x8xf32, #tpu.memory_space<vmem>>, vector<1x8x8xf32>
    %318 = vector.shape_cast %317 : vector<1x8x8xf32> to vector<8x8xf32>
    %cst_138 = arith.constant dense<0.000000e+00> : vector<8x128xf32>
    %319 = tpu.matmul %318, %258, %cst_138 {dimension_numbers = #tpu.dot_dimension_numbers<[1], [0], [0], [1], [0, 0, 1, 1], [], []>} : vector<8x8xf32>, vector<8x128xf32>, vector<8x128xf32> -> vector<8x128xf32>
    %320 = arith.addf %316, %319 : vector<8x128xf32>
    %c127_i32_139 = arith.constant 127 : i32
    %321 = tpu.dynamic_rotate %258 by %c127_i32_139 dim 1 : vector<8x128xf32>, i32 -> vector<8x128xf32>
    %c7_i32_140 = arith.constant 7 : i32
    %322 = vector.broadcast %c7_i32_140 : i32 to vector<1x128xi32>
    %323 = arith.cmpi slt, %261, %322 : vector<1x128xi32>
    %324 = arith.extui %323 : vector<1x128xi1> to vector<1x128xi32>
    %325 = arith.sitofp %324 : vector<1x128xi32> to vector<1x128xf32>
    %326 = vector.broadcast %325 : vector<1x128xf32> to vector<8x128xf32>
    %327 = arith.mulf %321, %326 : vector<8x128xf32>
    %c5_141 = arith.constant 5 : index
    %c0_142 = arith.constant 0 : index
    %c0_143 = arith.constant 0 : index
    %328 = vector.load %arg8[%c5_141, %c0_142, %c0_143] : memref<9x8x8xf32, #tpu.memory_space<vmem>>, vector<1x8x8xf32>
    %329 = vector.shape_cast %328 : vector<1x8x8xf32> to vector<8x8xf32>
    %cst_144 = arith.constant dense<0.000000e+00> : vector<8x128xf32>
    %330 = tpu.matmul %329, %327, %cst_144 {dimension_numbers = #tpu.dot_dimension_numbers<[1], [0], [0], [1], [0, 0, 1, 1], [], []>} : vector<8x8xf32>, vector<8x128xf32>, vector<8x128xf32> -> vector<8x128xf32>
    %331 = arith.addf %320, %330 : vector<8x128xf32>
    %c121_i32_145 = arith.constant 121 : i32
    %332 = tpu.dynamic_rotate %258 by %c121_i32_145 dim 1 : vector<8x128xf32>, i32 -> vector<8x128xf32>
    %c7_i32_146 = arith.constant 7 : i32
    %333 = vector.broadcast %c7_i32_146 : i32 to vector<1x128xi32>
    %334 = arith.cmpi slt, %265, %333 : vector<1x128xi32>
    %c1_i32_147 = arith.constant 1 : i32
    %335 = vector.broadcast %c1_i32_147 : i32 to vector<1x128xi32>
    %336 = arith.cmpi sge, %261, %335 : vector<1x128xi32>
    %337 = arith.andi %334, %336 : vector<1x128xi1>
    %338 = arith.extui %337 : vector<1x128xi1> to vector<1x128xi32>
    %339 = arith.sitofp %338 : vector<1x128xi32> to vector<1x128xf32>
    %340 = vector.broadcast %339 : vector<1x128xf32> to vector<8x128xf32>
    %341 = arith.mulf %332, %340 : vector<8x128xf32>
    %c6_148 = arith.constant 6 : index
    %c0_149 = arith.constant 0 : index
    %c0_150 = arith.constant 0 : index
    %342 = vector.load %arg8[%c6_148, %c0_149, %c0_150] : memref<9x8x8xf32, #tpu.memory_space<vmem>>, vector<1x8x8xf32>
    %343 = vector.shape_cast %342 : vector<1x8x8xf32> to vector<8x8xf32>
    %cst_151 = arith.constant dense<0.000000e+00> : vector<8x128xf32>
    %344 = tpu.matmul %343, %341, %cst_151 {dimension_numbers = #tpu.dot_dimension_numbers<[1], [0], [0], [1], [0, 0, 1, 1], [], []>} : vector<8x8xf32>, vector<8x128xf32>, vector<8x128xf32> -> vector<8x128xf32>
    %345 = arith.addf %331, %344 : vector<8x128xf32>
    %c120_i32_152 = arith.constant 120 : i32
    %346 = tpu.dynamic_rotate %258 by %c120_i32_152 dim 1 : vector<8x128xf32>, i32 -> vector<8x128xf32>
    %c7_i32_153 = arith.constant 7 : i32
    %347 = vector.broadcast %c7_i32_153 : i32 to vector<1x128xi32>
    %348 = arith.cmpi slt, %265, %347 : vector<1x128xi32>
    %349 = arith.extui %348 : vector<1x128xi1> to vector<1x128xi32>
    %350 = arith.sitofp %349 : vector<1x128xi32> to vector<1x128xf32>
    %351 = vector.broadcast %350 : vector<1x128xf32> to vector<8x128xf32>
    %352 = arith.mulf %346, %351 : vector<8x128xf32>
    %c7_154 = arith.constant 7 : index
    %c0_155 = arith.constant 0 : index
    %c0_156 = arith.constant 0 : index
    %353 = vector.load %arg8[%c7_154, %c0_155, %c0_156] : memref<9x8x8xf32, #tpu.memory_space<vmem>>, vector<1x8x8xf32>
    %354 = vector.shape_cast %353 : vector<1x8x8xf32> to vector<8x8xf32>
    %cst_157 = arith.constant dense<0.000000e+00> : vector<8x128xf32>
    %355 = tpu.matmul %354, %352, %cst_157 {dimension_numbers = #tpu.dot_dimension_numbers<[1], [0], [0], [1], [0, 0, 1, 1], [], []>} : vector<8x8xf32>, vector<8x128xf32>, vector<8x128xf32> -> vector<8x128xf32>
    %356 = arith.addf %345, %355 : vector<8x128xf32>
    %c119_i32_158 = arith.constant 119 : i32
    %357 = tpu.dynamic_rotate %258 by %c119_i32_158 dim 1 : vector<8x128xf32>, i32 -> vector<8x128xf32>
    %c7_i32_159 = arith.constant 7 : i32
    %358 = vector.broadcast %c7_i32_159 : i32 to vector<1x128xi32>
    %359 = arith.cmpi slt, %265, %358 : vector<1x128xi32>
    %c7_i32_160 = arith.constant 7 : i32
    %360 = vector.broadcast %c7_i32_160 : i32 to vector<1x128xi32>
    %361 = arith.cmpi slt, %261, %360 : vector<1x128xi32>
    %362 = arith.andi %359, %361 : vector<1x128xi1>
    %363 = arith.extui %362 : vector<1x128xi1> to vector<1x128xi32>
    %364 = arith.sitofp %363 : vector<1x128xi32> to vector<1x128xf32>
    %365 = vector.broadcast %364 : vector<1x128xf32> to vector<8x128xf32>
    %366 = arith.mulf %357, %365 : vector<8x128xf32>
    %c8_161 = arith.constant 8 : index
    %c0_162 = arith.constant 0 : index
    %c0_163 = arith.constant 0 : index
    %367 = vector.load %arg8[%c8_161, %c0_162, %c0_163] : memref<9x8x8xf32, #tpu.memory_space<vmem>>, vector<1x8x8xf32>
    %368 = vector.shape_cast %367 : vector<1x8x8xf32> to vector<8x8xf32>
    %cst_164 = arith.constant dense<0.000000e+00> : vector<8x128xf32>
    %369 = tpu.matmul %368, %366, %cst_164 {dimension_numbers = #tpu.dot_dimension_numbers<[1], [0], [0], [1], [0, 0, 1, 1], [], []>} : vector<8x8xf32>, vector<8x128xf32>, vector<8x128xf32> -> vector<8x128xf32>
    %370 = arith.addf %356, %369 : vector<8x128xf32>
    %c0_165 = arith.constant 0 : index
    %c0_166 = arith.constant 0 : index
    %371 = vector.load %arg9[%c0_165, %c0_166] : memref<8x1xf32, #tpu.memory_space<vmem>>, vector<8x1xf32>
    %372 = vector.broadcast %371 : vector<8x1xf32> to vector<8x128xf32>
    %373 = arith.addf %370, %372 : vector<8x128xf32>
    %cst_167 = arith.constant 0.000000e+00 : f32
    %374 = vector.broadcast %cst_167 : f32 to vector<8x128xf32>
    %375 = arith.maximumf %373, %374 : vector<8x128xf32>
    %376 = tpu.iota {dimensions = array<i32: 1>} : vector<1x128xi32>
    %c7_i32_168 = arith.constant 7 : i32
    %377 = vector.broadcast %c7_i32_168 : i32 to vector<1x128xi32>
    %378 = arith.andi %376, %377 : vector<1x128xi32>
    %c3_i32_169 = arith.constant 3 : i32
    %379 = vector.broadcast %c3_i32_169 : i32 to vector<1x128xi32>
    %380 = arith.shrsi %376, %379 : vector<1x128xi32>
    %c7_i32_170 = arith.constant 7 : i32
    %381 = vector.broadcast %c7_i32_170 : i32 to vector<1x128xi32>
    %382 = arith.andi %380, %381 : vector<1x128xi32>
    %cst_171 = arith.constant 0.000000e+00 : f32
    %383 = vector.broadcast %cst_171 : f32 to vector<4x128xf32>
    %c9_i32_172 = arith.constant 9 : i32
    %384 = tpu.dynamic_rotate %375 by %c9_i32_172 dim 1 : vector<8x128xf32>, i32 -> vector<8x128xf32>
    %c1_i32_173 = arith.constant 1 : i32
    %385 = vector.broadcast %c1_i32_173 : i32 to vector<1x128xi32>
    %386 = arith.cmpi sge, %382, %385 : vector<1x128xi32>
    %c1_i32_174 = arith.constant 1 : i32
    %387 = vector.broadcast %c1_i32_174 : i32 to vector<1x128xi32>
    %388 = arith.cmpi sge, %378, %387 : vector<1x128xi32>
    %389 = arith.andi %386, %388 : vector<1x128xi1>
    %390 = arith.extui %389 : vector<1x128xi1> to vector<1x128xi32>
    %391 = arith.sitofp %390 : vector<1x128xi32> to vector<1x128xf32>
    %392 = vector.broadcast %391 : vector<1x128xf32> to vector<8x128xf32>
    %393 = arith.mulf %384, %392 : vector<8x128xf32>
    %c0_175 = arith.constant 0 : index
    %c0_176 = arith.constant 0 : index
    %c0_177 = arith.constant 0 : index
    %394 = vector.load %arg10[%c0_175, %c0_176, %c0_177] : memref<9x4x8xf32, #tpu.memory_space<vmem>>, vector<1x4x8xf32>
    %395 = vector.shape_cast %394 : vector<1x4x8xf32> to vector<4x8xf32>
    %cst_178 = arith.constant dense<0.000000e+00> : vector<4x128xf32>
    %396 = tpu.matmul %395, %393, %cst_178 {dimension_numbers = #tpu.dot_dimension_numbers<[1], [0], [0], [1], [0, 0, 1, 1], [], []>} : vector<4x8xf32>, vector<8x128xf32>, vector<4x128xf32> -> vector<4x128xf32>
    %397 = arith.addf %383, %396 : vector<4x128xf32>
    %c8_i32_179 = arith.constant 8 : i32
    %398 = tpu.dynamic_rotate %375 by %c8_i32_179 dim 1 : vector<8x128xf32>, i32 -> vector<8x128xf32>
    %c1_i32_180 = arith.constant 1 : i32
    %399 = vector.broadcast %c1_i32_180 : i32 to vector<1x128xi32>
    %400 = arith.cmpi sge, %382, %399 : vector<1x128xi32>
    %401 = arith.extui %400 : vector<1x128xi1> to vector<1x128xi32>
    %402 = arith.sitofp %401 : vector<1x128xi32> to vector<1x128xf32>
    %403 = vector.broadcast %402 : vector<1x128xf32> to vector<8x128xf32>
    %404 = arith.mulf %398, %403 : vector<8x128xf32>
    %c1_181 = arith.constant 1 : index
    %c0_182 = arith.constant 0 : index
    %c0_183 = arith.constant 0 : index
    %405 = vector.load %arg10[%c1_181, %c0_182, %c0_183] : memref<9x4x8xf32, #tpu.memory_space<vmem>>, vector<1x4x8xf32>
    %406 = vector.shape_cast %405 : vector<1x4x8xf32> to vector<4x8xf32>
    %cst_184 = arith.constant dense<0.000000e+00> : vector<4x128xf32>
    %407 = tpu.matmul %406, %404, %cst_184 {dimension_numbers = #tpu.dot_dimension_numbers<[1], [0], [0], [1], [0, 0, 1, 1], [], []>} : vector<4x8xf32>, vector<8x128xf32>, vector<4x128xf32> -> vector<4x128xf32>
    %408 = arith.addf %397, %407 : vector<4x128xf32>
    %c7_i32_185 = arith.constant 7 : i32
    %409 = tpu.dynamic_rotate %375 by %c7_i32_185 dim 1 : vector<8x128xf32>, i32 -> vector<8x128xf32>
    %c1_i32_186 = arith.constant 1 : i32
    %410 = vector.broadcast %c1_i32_186 : i32 to vector<1x128xi32>
    %411 = arith.cmpi sge, %382, %410 : vector<1x128xi32>
    %c7_i32_187 = arith.constant 7 : i32
    %412 = vector.broadcast %c7_i32_187 : i32 to vector<1x128xi32>
    %413 = arith.cmpi slt, %378, %412 : vector<1x128xi32>
    %414 = arith.andi %411, %413 : vector<1x128xi1>
    %415 = arith.extui %414 : vector<1x128xi1> to vector<1x128xi32>
    %416 = arith.sitofp %415 : vector<1x128xi32> to vector<1x128xf32>
    %417 = vector.broadcast %416 : vector<1x128xf32> to vector<8x128xf32>
    %418 = arith.mulf %409, %417 : vector<8x128xf32>
    %c2_188 = arith.constant 2 : index
    %c0_189 = arith.constant 0 : index
    %c0_190 = arith.constant 0 : index
    %419 = vector.load %arg10[%c2_188, %c0_189, %c0_190] : memref<9x4x8xf32, #tpu.memory_space<vmem>>, vector<1x4x8xf32>
    %420 = vector.shape_cast %419 : vector<1x4x8xf32> to vector<4x8xf32>
    %cst_191 = arith.constant dense<0.000000e+00> : vector<4x128xf32>
    %421 = tpu.matmul %420, %418, %cst_191 {dimension_numbers = #tpu.dot_dimension_numbers<[1], [0], [0], [1], [0, 0, 1, 1], [], []>} : vector<4x8xf32>, vector<8x128xf32>, vector<4x128xf32> -> vector<4x128xf32>
    %422 = arith.addf %408, %421 : vector<4x128xf32>
    %c1_i32_192 = arith.constant 1 : i32
    %423 = tpu.dynamic_rotate %375 by %c1_i32_192 dim 1 : vector<8x128xf32>, i32 -> vector<8x128xf32>
    %c1_i32_193 = arith.constant 1 : i32
    %424 = vector.broadcast %c1_i32_193 : i32 to vector<1x128xi32>
    %425 = arith.cmpi sge, %378, %424 : vector<1x128xi32>
    %426 = arith.extui %425 : vector<1x128xi1> to vector<1x128xi32>
    %427 = arith.sitofp %426 : vector<1x128xi32> to vector<1x128xf32>
    %428 = vector.broadcast %427 : vector<1x128xf32> to vector<8x128xf32>
    %429 = arith.mulf %423, %428 : vector<8x128xf32>
    %c3_194 = arith.constant 3 : index
    %c0_195 = arith.constant 0 : index
    %c0_196 = arith.constant 0 : index
    %430 = vector.load %arg10[%c3_194, %c0_195, %c0_196] : memref<9x4x8xf32, #tpu.memory_space<vmem>>, vector<1x4x8xf32>
    %431 = vector.shape_cast %430 : vector<1x4x8xf32> to vector<4x8xf32>
    %cst_197 = arith.constant dense<0.000000e+00> : vector<4x128xf32>
    %432 = tpu.matmul %431, %429, %cst_197 {dimension_numbers = #tpu.dot_dimension_numbers<[1], [0], [0], [1], [0, 0, 1, 1], [], []>} : vector<4x8xf32>, vector<8x128xf32>, vector<4x128xf32> -> vector<4x128xf32>
    %433 = arith.addf %422, %432 : vector<4x128xf32>
    %c4_198 = arith.constant 4 : index
    %c0_199 = arith.constant 0 : index
    %c0_200 = arith.constant 0 : index
    %434 = vector.load %arg10[%c4_198, %c0_199, %c0_200] : memref<9x4x8xf32, #tpu.memory_space<vmem>>, vector<1x4x8xf32>
    %435 = vector.shape_cast %434 : vector<1x4x8xf32> to vector<4x8xf32>
    %cst_201 = arith.constant dense<0.000000e+00> : vector<4x128xf32>
    %436 = tpu.matmul %435, %375, %cst_201 {dimension_numbers = #tpu.dot_dimension_numbers<[1], [0], [0], [1], [0, 0, 1, 1], [], []>} : vector<4x8xf32>, vector<8x128xf32>, vector<4x128xf32> -> vector<4x128xf32>
    %437 = arith.addf %433, %436 : vector<4x128xf32>
    %c127_i32_202 = arith.constant 127 : i32
    %438 = tpu.dynamic_rotate %375 by %c127_i32_202 dim 1 : vector<8x128xf32>, i32 -> vector<8x128xf32>
    %c7_i32_203 = arith.constant 7 : i32
    %439 = vector.broadcast %c7_i32_203 : i32 to vector<1x128xi32>
    %440 = arith.cmpi slt, %378, %439 : vector<1x128xi32>
    %441 = arith.extui %440 : vector<1x128xi1> to vector<1x128xi32>
    %442 = arith.sitofp %441 : vector<1x128xi32> to vector<1x128xf32>
    %443 = vector.broadcast %442 : vector<1x128xf32> to vector<8x128xf32>
    %444 = arith.mulf %438, %443 : vector<8x128xf32>
    %c5_204 = arith.constant 5 : index
    %c0_205 = arith.constant 0 : index
    %c0_206 = arith.constant 0 : index
    %445 = vector.load %arg10[%c5_204, %c0_205, %c0_206] : memref<9x4x8xf32, #tpu.memory_space<vmem>>, vector<1x4x8xf32>
    %446 = vector.shape_cast %445 : vector<1x4x8xf32> to vector<4x8xf32>
    %cst_207 = arith.constant dense<0.000000e+00> : vector<4x128xf32>
    %447 = tpu.matmul %446, %444, %cst_207 {dimension_numbers = #tpu.dot_dimension_numbers<[1], [0], [0], [1], [0, 0, 1, 1], [], []>} : vector<4x8xf32>, vector<8x128xf32>, vector<4x128xf32> -> vector<4x128xf32>
    %448 = arith.addf %437, %447 : vector<4x128xf32>
    %c121_i32_208 = arith.constant 121 : i32
    %449 = tpu.dynamic_rotate %375 by %c121_i32_208 dim 1 : vector<8x128xf32>, i32 -> vector<8x128xf32>
    %c7_i32_209 = arith.constant 7 : i32
    %450 = vector.broadcast %c7_i32_209 : i32 to vector<1x128xi32>
    %451 = arith.cmpi slt, %382, %450 : vector<1x128xi32>
    %c1_i32_210 = arith.constant 1 : i32
    %452 = vector.broadcast %c1_i32_210 : i32 to vector<1x128xi32>
    %453 = arith.cmpi sge, %378, %452 : vector<1x128xi32>
    %454 = arith.andi %451, %453 : vector<1x128xi1>
    %455 = arith.extui %454 : vector<1x128xi1> to vector<1x128xi32>
    %456 = arith.sitofp %455 : vector<1x128xi32> to vector<1x128xf32>
    %457 = vector.broadcast %456 : vector<1x128xf32> to vector<8x128xf32>
    %458 = arith.mulf %449, %457 : vector<8x128xf32>
    %c6_211 = arith.constant 6 : index
    %c0_212 = arith.constant 0 : index
    %c0_213 = arith.constant 0 : index
    %459 = vector.load %arg10[%c6_211, %c0_212, %c0_213] : memref<9x4x8xf32, #tpu.memory_space<vmem>>, vector<1x4x8xf32>
    %460 = vector.shape_cast %459 : vector<1x4x8xf32> to vector<4x8xf32>
    %cst_214 = arith.constant dense<0.000000e+00> : vector<4x128xf32>
    %461 = tpu.matmul %460, %458, %cst_214 {dimension_numbers = #tpu.dot_dimension_numbers<[1], [0], [0], [1], [0, 0, 1, 1], [], []>} : vector<4x8xf32>, vector<8x128xf32>, vector<4x128xf32> -> vector<4x128xf32>
    %462 = arith.addf %448, %461 : vector<4x128xf32>
    %c120_i32_215 = arith.constant 120 : i32
    %463 = tpu.dynamic_rotate %375 by %c120_i32_215 dim 1 : vector<8x128xf32>, i32 -> vector<8x128xf32>
    %c7_i32_216 = arith.constant 7 : i32
    %464 = vector.broadcast %c7_i32_216 : i32 to vector<1x128xi32>
    %465 = arith.cmpi slt, %382, %464 : vector<1x128xi32>
    %466 = arith.extui %465 : vector<1x128xi1> to vector<1x128xi32>
    %467 = arith.sitofp %466 : vector<1x128xi32> to vector<1x128xf32>
    %468 = vector.broadcast %467 : vector<1x128xf32> to vector<8x128xf32>
    %469 = arith.mulf %463, %468 : vector<8x128xf32>
    %c7_217 = arith.constant 7 : index
    %c0_218 = arith.constant 0 : index
    %c0_219 = arith.constant 0 : index
    %470 = vector.load %arg10[%c7_217, %c0_218, %c0_219] : memref<9x4x8xf32, #tpu.memory_space<vmem>>, vector<1x4x8xf32>
    %471 = vector.shape_cast %470 : vector<1x4x8xf32> to vector<4x8xf32>
    %cst_220 = arith.constant dense<0.000000e+00> : vector<4x128xf32>
    %472 = tpu.matmul %471, %469, %cst_220 {dimension_numbers = #tpu.dot_dimension_numbers<[1], [0], [0], [1], [0, 0, 1, 1], [], []>} : vector<4x8xf32>, vector<8x128xf32>, vector<4x128xf32> -> vector<4x128xf32>
    %473 = arith.addf %462, %472 : vector<4x128xf32>
    %c119_i32_221 = arith.constant 119 : i32
    %474 = tpu.dynamic_rotate %375 by %c119_i32_221 dim 1 : vector<8x128xf32>, i32 -> vector<8x128xf32>
    %c7_i32_222 = arith.constant 7 : i32
    %475 = vector.broadcast %c7_i32_222 : i32 to vector<1x128xi32>
    %476 = arith.cmpi slt, %382, %475 : vector<1x128xi32>
    %c7_i32_223 = arith.constant 7 : i32
    %477 = vector.broadcast %c7_i32_223 : i32 to vector<1x128xi32>
    %478 = arith.cmpi slt, %378, %477 : vector<1x128xi32>
    %479 = arith.andi %476, %478 : vector<1x128xi1>
    %480 = arith.extui %479 : vector<1x128xi1> to vector<1x128xi32>
    %481 = arith.sitofp %480 : vector<1x128xi32> to vector<1x128xf32>
    %482 = vector.broadcast %481 : vector<1x128xf32> to vector<8x128xf32>
    %483 = arith.mulf %474, %482 : vector<8x128xf32>
    %c8_224 = arith.constant 8 : index
    %c0_225 = arith.constant 0 : index
    %c0_226 = arith.constant 0 : index
    %484 = vector.load %arg10[%c8_224, %c0_225, %c0_226] : memref<9x4x8xf32, #tpu.memory_space<vmem>>, vector<1x4x8xf32>
    %485 = vector.shape_cast %484 : vector<1x4x8xf32> to vector<4x8xf32>
    %cst_227 = arith.constant dense<0.000000e+00> : vector<4x128xf32>
    %486 = tpu.matmul %485, %483, %cst_227 {dimension_numbers = #tpu.dot_dimension_numbers<[1], [0], [0], [1], [0, 0, 1, 1], [], []>} : vector<4x8xf32>, vector<8x128xf32>, vector<4x128xf32> -> vector<4x128xf32>
    %487 = arith.addf %473, %486 : vector<4x128xf32>
    %c0_228 = arith.constant 0 : index
    %c0_229 = arith.constant 0 : index
    %488 = vector.load %arg11[%c0_228, %c0_229] : memref<4x1xf32, #tpu.memory_space<vmem>>, vector<4x1xf32>
    %489 = vector.broadcast %488 : vector<4x1xf32> to vector<4x128xf32>
    %490 = arith.addf %487, %489 : vector<4x128xf32>
    %cst_230 = arith.constant 0.000000e+00 : f32
    %491 = vector.broadcast %cst_230 : f32 to vector<4x128xf32>
    %492 = arith.maximumf %490, %491 : vector<4x128xf32>
    %c0_231 = arith.constant 0 : index
    %c0_232 = arith.constant 0 : index
    %493 = vector.load %arg12[%c0_231, %c0_232] : memref<128x512xf32, #tpu.memory_space<vmem>>, vector<128x512xf32>
    %cst_233 = arith.constant dense<0.000000e+00> : vector<4x512xf32>
    %494 = tpu.matmul %492, %493, %cst_233 {dimension_numbers = #tpu.dot_dimension_numbers<[1], [0], [0], [1], [0, 0, 1, 1], [], []>} : vector<4x128xf32>, vector<128x512xf32>, vector<4x512xf32> -> vector<4x512xf32>
    %495 = tpu.iota {dimensions = array<i32: 1>} : vector<1x512xi32>
    %c15_i32_234 = arith.constant 15 : i32
    %496 = vector.broadcast %c15_i32_234 : i32 to vector<1x512xi32>
    %497 = arith.andi %495, %496 : vector<1x512xi32>
    %c4_i32_235 = arith.constant 4 : i32
    %498 = vector.broadcast %c4_i32_235 : i32 to vector<1x512xi32>
    %499 = arith.shrsi %495, %498 : vector<1x512xi32>
    %c15_i32_236 = arith.constant 15 : i32
    %500 = vector.broadcast %c15_i32_236 : i32 to vector<1x512xi32>
    %501 = arith.andi %499, %500 : vector<1x512xi32>
    %cst_237 = arith.constant 0.000000e+00 : f32
    %502 = vector.broadcast %cst_237 : f32 to vector<4x512xf32>
    %c17_i32_238 = arith.constant 17 : i32
    %503 = tpu.dynamic_rotate %494 by %c17_i32_238 dim 1 : vector<4x512xf32>, i32 -> vector<4x512xf32>
    %c1_i32_239 = arith.constant 1 : i32
    %504 = vector.broadcast %c1_i32_239 : i32 to vector<1x512xi32>
    %505 = arith.cmpi sge, %501, %504 : vector<1x512xi32>
    %c1_i32_240 = arith.constant 1 : i32
    %506 = vector.broadcast %c1_i32_240 : i32 to vector<1x512xi32>
    %507 = arith.cmpi sge, %497, %506 : vector<1x512xi32>
    %508 = arith.andi %505, %507 : vector<1x512xi1>
    %509 = arith.extui %508 : vector<1x512xi1> to vector<1x512xi32>
    %510 = arith.sitofp %509 : vector<1x512xi32> to vector<1x512xf32>
    %511 = vector.broadcast %510 : vector<1x512xf32> to vector<4x512xf32>
    %512 = arith.mulf %503, %511 : vector<4x512xf32>
    %c0_241 = arith.constant 0 : index
    %c0_242 = arith.constant 0 : index
    %c0_243 = arith.constant 0 : index
    %513 = vector.load %arg13[%c0_241, %c0_242, %c0_243] : memref<9x4x4xf32, #tpu.memory_space<vmem>>, vector<1x4x4xf32>
    %514 = vector.shape_cast %513 : vector<1x4x4xf32> to vector<4x4xf32>
    %cst_244 = arith.constant dense<0.000000e+00> : vector<4x512xf32>
    %515 = tpu.matmul %514, %512, %cst_244 {dimension_numbers = #tpu.dot_dimension_numbers<[1], [0], [0], [1], [0, 0, 1, 1], [], []>} : vector<4x4xf32>, vector<4x512xf32>, vector<4x512xf32> -> vector<4x512xf32>
    %516 = arith.addf %502, %515 : vector<4x512xf32>
    %c16_i32_245 = arith.constant 16 : i32
    %517 = tpu.dynamic_rotate %494 by %c16_i32_245 dim 1 : vector<4x512xf32>, i32 -> vector<4x512xf32>
    %c1_i32_246 = arith.constant 1 : i32
    %518 = vector.broadcast %c1_i32_246 : i32 to vector<1x512xi32>
    %519 = arith.cmpi sge, %501, %518 : vector<1x512xi32>
    %520 = arith.extui %519 : vector<1x512xi1> to vector<1x512xi32>
    %521 = arith.sitofp %520 : vector<1x512xi32> to vector<1x512xf32>
    %522 = vector.broadcast %521 : vector<1x512xf32> to vector<4x512xf32>
    %523 = arith.mulf %517, %522 : vector<4x512xf32>
    %c1_247 = arith.constant 1 : index
    %c0_248 = arith.constant 0 : index
    %c0_249 = arith.constant 0 : index
    %524 = vector.load %arg13[%c1_247, %c0_248, %c0_249] : memref<9x4x4xf32, #tpu.memory_space<vmem>>, vector<1x4x4xf32>
    %525 = vector.shape_cast %524 : vector<1x4x4xf32> to vector<4x4xf32>
    %cst_250 = arith.constant dense<0.000000e+00> : vector<4x512xf32>
    %526 = tpu.matmul %525, %523, %cst_250 {dimension_numbers = #tpu.dot_dimension_numbers<[1], [0], [0], [1], [0, 0, 1, 1], [], []>} : vector<4x4xf32>, vector<4x512xf32>, vector<4x512xf32> -> vector<4x512xf32>
    %527 = arith.addf %516, %526 : vector<4x512xf32>
    %c15_i32_251 = arith.constant 15 : i32
    %528 = tpu.dynamic_rotate %494 by %c15_i32_251 dim 1 : vector<4x512xf32>, i32 -> vector<4x512xf32>
    %c1_i32_252 = arith.constant 1 : i32
    %529 = vector.broadcast %c1_i32_252 : i32 to vector<1x512xi32>
    %530 = arith.cmpi sge, %501, %529 : vector<1x512xi32>
    %c15_i32_253 = arith.constant 15 : i32
    %531 = vector.broadcast %c15_i32_253 : i32 to vector<1x512xi32>
    %532 = arith.cmpi slt, %497, %531 : vector<1x512xi32>
    %533 = arith.andi %530, %532 : vector<1x512xi1>
    %534 = arith.extui %533 : vector<1x512xi1> to vector<1x512xi32>
    %535 = arith.sitofp %534 : vector<1x512xi32> to vector<1x512xf32>
    %536 = vector.broadcast %535 : vector<1x512xf32> to vector<4x512xf32>
    %537 = arith.mulf %528, %536 : vector<4x512xf32>
    %c2_254 = arith.constant 2 : index
    %c0_255 = arith.constant 0 : index
    %c0_256 = arith.constant 0 : index
    %538 = vector.load %arg13[%c2_254, %c0_255, %c0_256] : memref<9x4x4xf32, #tpu.memory_space<vmem>>, vector<1x4x4xf32>
    %539 = vector.shape_cast %538 : vector<1x4x4xf32> to vector<4x4xf32>
    %cst_257 = arith.constant dense<0.000000e+00> : vector<4x512xf32>
    %540 = tpu.matmul %539, %537, %cst_257 {dimension_numbers = #tpu.dot_dimension_numbers<[1], [0], [0], [1], [0, 0, 1, 1], [], []>} : vector<4x4xf32>, vector<4x512xf32>, vector<4x512xf32> -> vector<4x512xf32>
    %541 = arith.addf %527, %540 : vector<4x512xf32>
    %c1_i32_258 = arith.constant 1 : i32
    %542 = tpu.dynamic_rotate %494 by %c1_i32_258 dim 1 : vector<4x512xf32>, i32 -> vector<4x512xf32>
    %c1_i32_259 = arith.constant 1 : i32
    %543 = vector.broadcast %c1_i32_259 : i32 to vector<1x512xi32>
    %544 = arith.cmpi sge, %497, %543 : vector<1x512xi32>
    %545 = arith.extui %544 : vector<1x512xi1> to vector<1x512xi32>
    %546 = arith.sitofp %545 : vector<1x512xi32> to vector<1x512xf32>
    %547 = vector.broadcast %546 : vector<1x512xf32> to vector<4x512xf32>
    %548 = arith.mulf %542, %547 : vector<4x512xf32>
    %c3_260 = arith.constant 3 : index
    %c0_261 = arith.constant 0 : index
    %c0_262 = arith.constant 0 : index
    %549 = vector.load %arg13[%c3_260, %c0_261, %c0_262] : memref<9x4x4xf32, #tpu.memory_space<vmem>>, vector<1x4x4xf32>
    %550 = vector.shape_cast %549 : vector<1x4x4xf32> to vector<4x4xf32>
    %cst_263 = arith.constant dense<0.000000e+00> : vector<4x512xf32>
    %551 = tpu.matmul %550, %548, %cst_263 {dimension_numbers = #tpu.dot_dimension_numbers<[1], [0], [0], [1], [0, 0, 1, 1], [], []>} : vector<4x4xf32>, vector<4x512xf32>, vector<4x512xf32> -> vector<4x512xf32>
    %552 = arith.addf %541, %551 : vector<4x512xf32>
    %c4_264 = arith.constant 4 : index
    %c0_265 = arith.constant 0 : index
    %c0_266 = arith.constant 0 : index
    %553 = vector.load %arg13[%c4_264, %c0_265, %c0_266] : memref<9x4x4xf32, #tpu.memory_space<vmem>>, vector<1x4x4xf32>
    %554 = vector.shape_cast %553 : vector<1x4x4xf32> to vector<4x4xf32>
    %cst_267 = arith.constant dense<0.000000e+00> : vector<4x512xf32>
    %555 = tpu.matmul %554, %494, %cst_267 {dimension_numbers = #tpu.dot_dimension_numbers<[1], [0], [0], [1], [0, 0, 1, 1], [], []>} : vector<4x4xf32>, vector<4x512xf32>, vector<4x512xf32> -> vector<4x512xf32>
    %556 = arith.addf %552, %555 : vector<4x512xf32>
    %c511_i32_268 = arith.constant 511 : i32
    %557 = tpu.dynamic_rotate %494 by %c511_i32_268 dim 1 : vector<4x512xf32>, i32 -> vector<4x512xf32>
    %c15_i32_269 = arith.constant 15 : i32
    %558 = vector.broadcast %c15_i32_269 : i32 to vector<1x512xi32>
    %559 = arith.cmpi slt, %497, %558 : vector<1x512xi32>
    %560 = arith.extui %559 : vector<1x512xi1> to vector<1x512xi32>
    %561 = arith.sitofp %560 : vector<1x512xi32> to vector<1x512xf32>
    %562 = vector.broadcast %561 : vector<1x512xf32> to vector<4x512xf32>
    %563 = arith.mulf %557, %562 : vector<4x512xf32>
    %c5_270 = arith.constant 5 : index
    %c0_271 = arith.constant 0 : index
    %c0_272 = arith.constant 0 : index
    %564 = vector.load %arg13[%c5_270, %c0_271, %c0_272] : memref<9x4x4xf32, #tpu.memory_space<vmem>>, vector<1x4x4xf32>
    %565 = vector.shape_cast %564 : vector<1x4x4xf32> to vector<4x4xf32>
    %cst_273 = arith.constant dense<0.000000e+00> : vector<4x512xf32>
    %566 = tpu.matmul %565, %563, %cst_273 {dimension_numbers = #tpu.dot_dimension_numbers<[1], [0], [0], [1], [0, 0, 1, 1], [], []>} : vector<4x4xf32>, vector<4x512xf32>, vector<4x512xf32> -> vector<4x512xf32>
    %567 = arith.addf %556, %566 : vector<4x512xf32>
    %c497_i32_274 = arith.constant 497 : i32
    %568 = tpu.dynamic_rotate %494 by %c497_i32_274 dim 1 : vector<4x512xf32>, i32 -> vector<4x512xf32>
    %c15_i32_275 = arith.constant 15 : i32
    %569 = vector.broadcast %c15_i32_275 : i32 to vector<1x512xi32>
    %570 = arith.cmpi slt, %501, %569 : vector<1x512xi32>
    %c1_i32_276 = arith.constant 1 : i32
    %571 = vector.broadcast %c1_i32_276 : i32 to vector<1x512xi32>
    %572 = arith.cmpi sge, %497, %571 : vector<1x512xi32>
    %573 = arith.andi %570, %572 : vector<1x512xi1>
    %574 = arith.extui %573 : vector<1x512xi1> to vector<1x512xi32>
    %575 = arith.sitofp %574 : vector<1x512xi32> to vector<1x512xf32>
    %576 = vector.broadcast %575 : vector<1x512xf32> to vector<4x512xf32>
    %577 = arith.mulf %568, %576 : vector<4x512xf32>
    %c6_277 = arith.constant 6 : index
    %c0_278 = arith.constant 0 : index
    %c0_279 = arith.constant 0 : index
    %578 = vector.load %arg13[%c6_277, %c0_278, %c0_279] : memref<9x4x4xf32, #tpu.memory_space<vmem>>, vector<1x4x4xf32>
    %579 = vector.shape_cast %578 : vector<1x4x4xf32> to vector<4x4xf32>
    %cst_280 = arith.constant dense<0.000000e+00> : vector<4x512xf32>
    %580 = tpu.matmul %579, %577, %cst_280 {dimension_numbers = #tpu.dot_dimension_numbers<[1], [0], [0], [1], [0, 0, 1, 1], [], []>} : vector<4x4xf32>, vector<4x512xf32>, vector<4x512xf32> -> vector<4x512xf32>
    %581 = arith.addf %567, %580 : vector<4x512xf32>
    %c496_i32_281 = arith.constant 496 : i32
    %582 = tpu.dynamic_rotate %494 by %c496_i32_281 dim 1 : vector<4x512xf32>, i32 -> vector<4x512xf32>
    %c15_i32_282 = arith.constant 15 : i32
    %583 = vector.broadcast %c15_i32_282 : i32 to vector<1x512xi32>
    %584 = arith.cmpi slt, %501, %583 : vector<1x512xi32>
    %585 = arith.extui %584 : vector<1x512xi1> to vector<1x512xi32>
    %586 = arith.sitofp %585 : vector<1x512xi32> to vector<1x512xf32>
    %587 = vector.broadcast %586 : vector<1x512xf32> to vector<4x512xf32>
    %588 = arith.mulf %582, %587 : vector<4x512xf32>
    %c7_283 = arith.constant 7 : index
    %c0_284 = arith.constant 0 : index
    %c0_285 = arith.constant 0 : index
    %589 = vector.load %arg13[%c7_283, %c0_284, %c0_285] : memref<9x4x4xf32, #tpu.memory_space<vmem>>, vector<1x4x4xf32>
    %590 = vector.shape_cast %589 : vector<1x4x4xf32> to vector<4x4xf32>
    %cst_286 = arith.constant dense<0.000000e+00> : vector<4x512xf32>
    %591 = tpu.matmul %590, %588, %cst_286 {dimension_numbers = #tpu.dot_dimension_numbers<[1], [0], [0], [1], [0, 0, 1, 1], [], []>} : vector<4x4xf32>, vector<4x512xf32>, vector<4x512xf32> -> vector<4x512xf32>
    %592 = arith.addf %581, %591 : vector<4x512xf32>
    %c495_i32_287 = arith.constant 495 : i32
    %593 = tpu.dynamic_rotate %494 by %c495_i32_287 dim 1 : vector<4x512xf32>, i32 -> vector<4x512xf32>
    %c15_i32_288 = arith.constant 15 : i32
    %594 = vector.broadcast %c15_i32_288 : i32 to vector<1x512xi32>
    %595 = arith.cmpi slt, %501, %594 : vector<1x512xi32>
    %c15_i32_289 = arith.constant 15 : i32
    %596 = vector.broadcast %c15_i32_289 : i32 to vector<1x512xi32>
    %597 = arith.cmpi slt, %497, %596 : vector<1x512xi32>
    %598 = arith.andi %595, %597 : vector<1x512xi1>
    %599 = arith.extui %598 : vector<1x512xi1> to vector<1x512xi32>
    %600 = arith.sitofp %599 : vector<1x512xi32> to vector<1x512xf32>
    %601 = vector.broadcast %600 : vector<1x512xf32> to vector<4x512xf32>
    %602 = arith.mulf %593, %601 : vector<4x512xf32>
    %c8_290 = arith.constant 8 : index
    %c0_291 = arith.constant 0 : index
    %c0_292 = arith.constant 0 : index
    %603 = vector.load %arg13[%c8_290, %c0_291, %c0_292] : memref<9x4x4xf32, #tpu.memory_space<vmem>>, vector<1x4x4xf32>
    %604 = vector.shape_cast %603 : vector<1x4x4xf32> to vector<4x4xf32>
    %cst_293 = arith.constant dense<0.000000e+00> : vector<4x512xf32>
    %605 = tpu.matmul %604, %602, %cst_293 {dimension_numbers = #tpu.dot_dimension_numbers<[1], [0], [0], [1], [0, 0, 1, 1], [], []>} : vector<4x4xf32>, vector<4x512xf32>, vector<4x512xf32> -> vector<4x512xf32>
    %606 = arith.addf %592, %605 : vector<4x512xf32>
    %c0_294 = arith.constant 0 : index
    %c0_295 = arith.constant 0 : index
    %607 = vector.load %arg14[%c0_294, %c0_295] : memref<4x1xf32, #tpu.memory_space<vmem>>, vector<4x1xf32>
    %608 = vector.broadcast %607 : vector<4x1xf32> to vector<4x512xf32>
    %609 = arith.addf %606, %608 : vector<4x512xf32>
    %cst_296 = arith.constant 0.000000e+00 : f32
    %610 = vector.broadcast %cst_296 : f32 to vector<4x512xf32>
    %611 = arith.maximumf %609, %610 : vector<4x512xf32>
    %612 = tpu.iota {dimensions = array<i32: 1>} : vector<1x512xi32>
    %c15_i32_297 = arith.constant 15 : i32
    %613 = vector.broadcast %c15_i32_297 : i32 to vector<1x512xi32>
    %614 = arith.andi %612, %613 : vector<1x512xi32>
    %c4_i32_298 = arith.constant 4 : i32
    %615 = vector.broadcast %c4_i32_298 : i32 to vector<1x512xi32>
    %616 = arith.shrsi %612, %615 : vector<1x512xi32>
    %c15_i32_299 = arith.constant 15 : i32
    %617 = vector.broadcast %c15_i32_299 : i32 to vector<1x512xi32>
    %618 = arith.andi %616, %617 : vector<1x512xi32>
    %cst_300 = arith.constant 0.000000e+00 : f32
    %619 = vector.broadcast %cst_300 : f32 to vector<1x512xf32>
    %c17_i32_301 = arith.constant 17 : i32
    %620 = tpu.dynamic_rotate %611 by %c17_i32_301 dim 1 : vector<4x512xf32>, i32 -> vector<4x512xf32>
    %c1_i32_302 = arith.constant 1 : i32
    %621 = vector.broadcast %c1_i32_302 : i32 to vector<1x512xi32>
    %622 = arith.cmpi sge, %618, %621 : vector<1x512xi32>
    %c1_i32_303 = arith.constant 1 : i32
    %623 = vector.broadcast %c1_i32_303 : i32 to vector<1x512xi32>
    %624 = arith.cmpi sge, %614, %623 : vector<1x512xi32>
    %625 = arith.andi %622, %624 : vector<1x512xi1>
    %626 = arith.extui %625 : vector<1x512xi1> to vector<1x512xi32>
    %627 = arith.sitofp %626 : vector<1x512xi32> to vector<1x512xf32>
    %628 = vector.broadcast %627 : vector<1x512xf32> to vector<4x512xf32>
    %629 = arith.mulf %620, %628 : vector<4x512xf32>
    %c0_304 = arith.constant 0 : index
    %c0_305 = arith.constant 0 : index
    %c0_306 = arith.constant 0 : index
    %630 = vector.load %arg15[%c0_304, %c0_305, %c0_306] : memref<9x1x4xf32, #tpu.memory_space<vmem>>, vector<1x1x4xf32>
    %631 = vector.shape_cast %630 : vector<1x1x4xf32> to vector<1x4xf32>
    %cst_307 = arith.constant dense<0.000000e+00> : vector<1x512xf32>
    %632 = tpu.matmul %631, %629, %cst_307 {dimension_numbers = #tpu.dot_dimension_numbers<[1], [0], [0], [1], [0, 0, 1, 1], [], []>} : vector<1x4xf32>, vector<4x512xf32>, vector<1x512xf32> -> vector<1x512xf32>
    %633 = arith.addf %619, %632 : vector<1x512xf32>
    %c16_i32_308 = arith.constant 16 : i32
    %634 = tpu.dynamic_rotate %611 by %c16_i32_308 dim 1 : vector<4x512xf32>, i32 -> vector<4x512xf32>
    %c1_i32_309 = arith.constant 1 : i32
    %635 = vector.broadcast %c1_i32_309 : i32 to vector<1x512xi32>
    %636 = arith.cmpi sge, %618, %635 : vector<1x512xi32>
    %637 = arith.extui %636 : vector<1x512xi1> to vector<1x512xi32>
    %638 = arith.sitofp %637 : vector<1x512xi32> to vector<1x512xf32>
    %639 = vector.broadcast %638 : vector<1x512xf32> to vector<4x512xf32>
    %640 = arith.mulf %634, %639 : vector<4x512xf32>
    %c1_310 = arith.constant 1 : index
    %c0_311 = arith.constant 0 : index
    %c0_312 = arith.constant 0 : index
    %641 = vector.load %arg15[%c1_310, %c0_311, %c0_312] : memref<9x1x4xf32, #tpu.memory_space<vmem>>, vector<1x1x4xf32>
    %642 = vector.shape_cast %641 : vector<1x1x4xf32> to vector<1x4xf32>
    %cst_313 = arith.constant dense<0.000000e+00> : vector<1x512xf32>
    %643 = tpu.matmul %642, %640, %cst_313 {dimension_numbers = #tpu.dot_dimension_numbers<[1], [0], [0], [1], [0, 0, 1, 1], [], []>} : vector<1x4xf32>, vector<4x512xf32>, vector<1x512xf32> -> vector<1x512xf32>
    %644 = arith.addf %633, %643 : vector<1x512xf32>
    %c15_i32_314 = arith.constant 15 : i32
    %645 = tpu.dynamic_rotate %611 by %c15_i32_314 dim 1 : vector<4x512xf32>, i32 -> vector<4x512xf32>
    %c1_i32_315 = arith.constant 1 : i32
    %646 = vector.broadcast %c1_i32_315 : i32 to vector<1x512xi32>
    %647 = arith.cmpi sge, %618, %646 : vector<1x512xi32>
    %c15_i32_316 = arith.constant 15 : i32
    %648 = vector.broadcast %c15_i32_316 : i32 to vector<1x512xi32>
    %649 = arith.cmpi slt, %614, %648 : vector<1x512xi32>
    %650 = arith.andi %647, %649 : vector<1x512xi1>
    %651 = arith.extui %650 : vector<1x512xi1> to vector<1x512xi32>
    %652 = arith.sitofp %651 : vector<1x512xi32> to vector<1x512xf32>
    %653 = vector.broadcast %652 : vector<1x512xf32> to vector<4x512xf32>
    %654 = arith.mulf %645, %653 : vector<4x512xf32>
    %c2_317 = arith.constant 2 : index
    %c0_318 = arith.constant 0 : index
    %c0_319 = arith.constant 0 : index
    %655 = vector.load %arg15[%c2_317, %c0_318, %c0_319] : memref<9x1x4xf32, #tpu.memory_space<vmem>>, vector<1x1x4xf32>
    %656 = vector.shape_cast %655 : vector<1x1x4xf32> to vector<1x4xf32>
    %cst_320 = arith.constant dense<0.000000e+00> : vector<1x512xf32>
    %657 = tpu.matmul %656, %654, %cst_320 {dimension_numbers = #tpu.dot_dimension_numbers<[1], [0], [0], [1], [0, 0, 1, 1], [], []>} : vector<1x4xf32>, vector<4x512xf32>, vector<1x512xf32> -> vector<1x512xf32>
    %658 = arith.addf %644, %657 : vector<1x512xf32>
    %c1_i32_321 = arith.constant 1 : i32
    %659 = tpu.dynamic_rotate %611 by %c1_i32_321 dim 1 : vector<4x512xf32>, i32 -> vector<4x512xf32>
    %c1_i32_322 = arith.constant 1 : i32
    %660 = vector.broadcast %c1_i32_322 : i32 to vector<1x512xi32>
    %661 = arith.cmpi sge, %614, %660 : vector<1x512xi32>
    %662 = arith.extui %661 : vector<1x512xi1> to vector<1x512xi32>
    %663 = arith.sitofp %662 : vector<1x512xi32> to vector<1x512xf32>
    %664 = vector.broadcast %663 : vector<1x512xf32> to vector<4x512xf32>
    %665 = arith.mulf %659, %664 : vector<4x512xf32>
    %c3_323 = arith.constant 3 : index
    %c0_324 = arith.constant 0 : index
    %c0_325 = arith.constant 0 : index
    %666 = vector.load %arg15[%c3_323, %c0_324, %c0_325] : memref<9x1x4xf32, #tpu.memory_space<vmem>>, vector<1x1x4xf32>
    %667 = vector.shape_cast %666 : vector<1x1x4xf32> to vector<1x4xf32>
    %cst_326 = arith.constant dense<0.000000e+00> : vector<1x512xf32>
    %668 = tpu.matmul %667, %665, %cst_326 {dimension_numbers = #tpu.dot_dimension_numbers<[1], [0], [0], [1], [0, 0, 1, 1], [], []>} : vector<1x4xf32>, vector<4x512xf32>, vector<1x512xf32> -> vector<1x512xf32>
    %669 = arith.addf %658, %668 : vector<1x512xf32>
    %c4_327 = arith.constant 4 : index
    %c0_328 = arith.constant 0 : index
    %c0_329 = arith.constant 0 : index
    %670 = vector.load %arg15[%c4_327, %c0_328, %c0_329] : memref<9x1x4xf32, #tpu.memory_space<vmem>>, vector<1x1x4xf32>
    %671 = vector.shape_cast %670 : vector<1x1x4xf32> to vector<1x4xf32>
    %cst_330 = arith.constant dense<0.000000e+00> : vector<1x512xf32>
    %672 = tpu.matmul %671, %611, %cst_330 {dimension_numbers = #tpu.dot_dimension_numbers<[1], [0], [0], [1], [0, 0, 1, 1], [], []>} : vector<1x4xf32>, vector<4x512xf32>, vector<1x512xf32> -> vector<1x512xf32>
    %673 = arith.addf %669, %672 : vector<1x512xf32>
    %c511_i32_331 = arith.constant 511 : i32
    %674 = tpu.dynamic_rotate %611 by %c511_i32_331 dim 1 : vector<4x512xf32>, i32 -> vector<4x512xf32>
    %c15_i32_332 = arith.constant 15 : i32
    %675 = vector.broadcast %c15_i32_332 : i32 to vector<1x512xi32>
    %676 = arith.cmpi slt, %614, %675 : vector<1x512xi32>
    %677 = arith.extui %676 : vector<1x512xi1> to vector<1x512xi32>
    %678 = arith.sitofp %677 : vector<1x512xi32> to vector<1x512xf32>
    %679 = vector.broadcast %678 : vector<1x512xf32> to vector<4x512xf32>
    %680 = arith.mulf %674, %679 : vector<4x512xf32>
    %c5_333 = arith.constant 5 : index
    %c0_334 = arith.constant 0 : index
    %c0_335 = arith.constant 0 : index
    %681 = vector.load %arg15[%c5_333, %c0_334, %c0_335] : memref<9x1x4xf32, #tpu.memory_space<vmem>>, vector<1x1x4xf32>
    %682 = vector.shape_cast %681 : vector<1x1x4xf32> to vector<1x4xf32>
    %cst_336 = arith.constant dense<0.000000e+00> : vector<1x512xf32>
    %683 = tpu.matmul %682, %680, %cst_336 {dimension_numbers = #tpu.dot_dimension_numbers<[1], [0], [0], [1], [0, 0, 1, 1], [], []>} : vector<1x4xf32>, vector<4x512xf32>, vector<1x512xf32> -> vector<1x512xf32>
    %684 = arith.addf %673, %683 : vector<1x512xf32>
    %c497_i32_337 = arith.constant 497 : i32
    %685 = tpu.dynamic_rotate %611 by %c497_i32_337 dim 1 : vector<4x512xf32>, i32 -> vector<4x512xf32>
    %c15_i32_338 = arith.constant 15 : i32
    %686 = vector.broadcast %c15_i32_338 : i32 to vector<1x512xi32>
    %687 = arith.cmpi slt, %618, %686 : vector<1x512xi32>
    %c1_i32_339 = arith.constant 1 : i32
    %688 = vector.broadcast %c1_i32_339 : i32 to vector<1x512xi32>
    %689 = arith.cmpi sge, %614, %688 : vector<1x512xi32>
    %690 = arith.andi %687, %689 : vector<1x512xi1>
    %691 = arith.extui %690 : vector<1x512xi1> to vector<1x512xi32>
    %692 = arith.sitofp %691 : vector<1x512xi32> to vector<1x512xf32>
    %693 = vector.broadcast %692 : vector<1x512xf32> to vector<4x512xf32>
    %694 = arith.mulf %685, %693 : vector<4x512xf32>
    %c6_340 = arith.constant 6 : index
    %c0_341 = arith.constant 0 : index
    %c0_342 = arith.constant 0 : index
    %695 = vector.load %arg15[%c6_340, %c0_341, %c0_342] : memref<9x1x4xf32, #tpu.memory_space<vmem>>, vector<1x1x4xf32>
    %696 = vector.shape_cast %695 : vector<1x1x4xf32> to vector<1x4xf32>
    %cst_343 = arith.constant dense<0.000000e+00> : vector<1x512xf32>
    %697 = tpu.matmul %696, %694, %cst_343 {dimension_numbers = #tpu.dot_dimension_numbers<[1], [0], [0], [1], [0, 0, 1, 1], [], []>} : vector<1x4xf32>, vector<4x512xf32>, vector<1x512xf32> -> vector<1x512xf32>
    %698 = arith.addf %684, %697 : vector<1x512xf32>
    %c496_i32_344 = arith.constant 496 : i32
    %699 = tpu.dynamic_rotate %611 by %c496_i32_344 dim 1 : vector<4x512xf32>, i32 -> vector<4x512xf32>
    %c15_i32_345 = arith.constant 15 : i32
    %700 = vector.broadcast %c15_i32_345 : i32 to vector<1x512xi32>
    %701 = arith.cmpi slt, %618, %700 : vector<1x512xi32>
    %702 = arith.extui %701 : vector<1x512xi1> to vector<1x512xi32>
    %703 = arith.sitofp %702 : vector<1x512xi32> to vector<1x512xf32>
    %704 = vector.broadcast %703 : vector<1x512xf32> to vector<4x512xf32>
    %705 = arith.mulf %699, %704 : vector<4x512xf32>
    %c7_346 = arith.constant 7 : index
    %c0_347 = arith.constant 0 : index
    %c0_348 = arith.constant 0 : index
    %706 = vector.load %arg15[%c7_346, %c0_347, %c0_348] : memref<9x1x4xf32, #tpu.memory_space<vmem>>, vector<1x1x4xf32>
    %707 = vector.shape_cast %706 : vector<1x1x4xf32> to vector<1x4xf32>
    %cst_349 = arith.constant dense<0.000000e+00> : vector<1x512xf32>
    %708 = tpu.matmul %707, %705, %cst_349 {dimension_numbers = #tpu.dot_dimension_numbers<[1], [0], [0], [1], [0, 0, 1, 1], [], []>} : vector<1x4xf32>, vector<4x512xf32>, vector<1x512xf32> -> vector<1x512xf32>
    %709 = arith.addf %698, %708 : vector<1x512xf32>
    %c495_i32_350 = arith.constant 495 : i32
    %710 = tpu.dynamic_rotate %611 by %c495_i32_350 dim 1 : vector<4x512xf32>, i32 -> vector<4x512xf32>
    %c15_i32_351 = arith.constant 15 : i32
    %711 = vector.broadcast %c15_i32_351 : i32 to vector<1x512xi32>
    %712 = arith.cmpi slt, %618, %711 : vector<1x512xi32>
    %c15_i32_352 = arith.constant 15 : i32
    %713 = vector.broadcast %c15_i32_352 : i32 to vector<1x512xi32>
    %714 = arith.cmpi slt, %614, %713 : vector<1x512xi32>
    %715 = arith.andi %712, %714 : vector<1x512xi1>
    %716 = arith.extui %715 : vector<1x512xi1> to vector<1x512xi32>
    %717 = arith.sitofp %716 : vector<1x512xi32> to vector<1x512xf32>
    %718 = vector.broadcast %717 : vector<1x512xf32> to vector<4x512xf32>
    %719 = arith.mulf %710, %718 : vector<4x512xf32>
    %c8_353 = arith.constant 8 : index
    %c0_354 = arith.constant 0 : index
    %c0_355 = arith.constant 0 : index
    %720 = vector.load %arg15[%c8_353, %c0_354, %c0_355] : memref<9x1x4xf32, #tpu.memory_space<vmem>>, vector<1x1x4xf32>
    %721 = vector.shape_cast %720 : vector<1x1x4xf32> to vector<1x4xf32>
    %cst_356 = arith.constant dense<0.000000e+00> : vector<1x512xf32>
    %722 = tpu.matmul %721, %719, %cst_356 {dimension_numbers = #tpu.dot_dimension_numbers<[1], [0], [0], [1], [0, 0, 1, 1], [], []>} : vector<1x4xf32>, vector<4x512xf32>, vector<1x512xf32> -> vector<1x512xf32>
    %723 = arith.addf %709, %722 : vector<1x512xf32>
    %c0_357 = arith.constant 0 : index
    %c0_358 = arith.constant 0 : index
    %724 = vector.load %arg16[%c0_357, %c0_358] : memref<1x1xf32, #tpu.memory_space<vmem>>, vector<1x1xf32>
    %725 = vector.broadcast %724 : vector<1x1xf32> to vector<1x512xf32>
    %726 = arith.addf %723, %725 : vector<1x512xf32>
    %c0_359 = arith.constant 0 : index
    %c0_360 = arith.constant 0 : index
    %727 = vector.load %arg17[%c0_359, %c0_360] : memref<1x512xf32, #tpu.memory_space<vmem>>, vector<1x512xf32>
    tpu.vector_store %arg17[%c0_359, %c0_360], %726 {strides = array<i32>} : memref<1x512xf32, #tpu.memory_space<vmem>>, vector<1x512xf32>,
    return
  }
}

</mosaic_0001>

<bundles_post_ra>
// kernel: _lambda_.1
= control target key start
LH: loop header
LB: loop body
LE: loop exit
PB: predicated region body
PF: predicated region fallthrough
CT: control target
= control target key end

     0   :  { %v9492_v0 = vlaneseq  ;;  %v7251_v1 = vmov 0   ;;  %s7252_s27 = smov 17   ;;  %s7253_s30 = smov 16   ;;  %v9539_v51 = vmov 0  ;;  %v9545_v56 = vmov 0  ;;  %s9459_s0 = inlined_call_operand.vmem [shape: f32[1,512], index: 0, kind: input, shape index: {}]   ;;  %s9460_s1 = inlined_call_operand.vmem [shape: f32[9,4,1], index: 1, kind: input, shape index: {}]   ;;  %s9461_s2 = inlined_call_operand.vmem [shape: f32[4,1], index: 2, kind: input, shape index: {}]   ;;  %s9462_s3 = inlined_call_operand.vmem [shape: f32[512,128], index: 3, kind: input, shape index: {}]   ;;  %s9463_s5 = inlined_call_operand.vmem [shape: f32[8,1], index: 5, kind: input, shape index: {}]   ;;  %s9464_s4 = inlined_call_operand.vmem [shape: f32[9,8,4], index: 4, kind: input, shape index: {}]   ;;  %s9465_s6 = inlined_call_operand.vmem [shape: f32[128,32], index: 6, kind: input, shape index: {}]   ;;  %s9466_s7 = inlined_call_operand.vmem [shape: f32[32,128], index: 7, kind: input, shape index: {}]   ;;  %s9467_s9 = inlined_call_operand.vmem [shape: f32[8,1], index: 9, kind: input, shape index: {}]   ;;  %s9468_s8 = inlined_call_operand.vmem [shape: f32[9,8,8], index: 8, kind: input, shape index: {}]   ;;  %s9469_s11 = inlined_call_operand.vmem [shape: f32[4,1], index: 11, kind: input, shape index: {}]   ;;  %s9470_s10 = inlined_call_operand.vmem [shape: f32[9,4,8], index: 10, kind: input, shape index: {}]   ;;  %s9471_s12 = inlined_call_operand.vmem [shape: f32[128,512], index: 12, kind: input, shape index: {}]   ;;  %s9472_s14 = inlined_call_operand.vmem [shape: f32[4,1], index: 14, kind: input, shape index: {}]   ;;  %s9473_s13 = inlined_call_operand.vmem [shape: f32[9,4,4], index: 13, kind: input, shape index: {}]   ;;  %s9474_s16 = inlined_call_operand.<no memory space> [shape: f32[1,1], index: 16, kind: input, shape index: {}]   ;;  %s9475_s15 = inlined_call_operand.vmem [shape: f32[9,1,4], index: 15, kind: input, shape index: {}]   ;;  %s9476_s17 = inlined_call_operand.vmem [shape: f32[1,512], index: 17, kind: output, shape index: {}]  }
   0x1   :  { %9531 = sst [smem:[#allocation21_spill]] %s9459_s0  ;;  %7229 = vset.pattern.permute.xlu0 %v7251_v1  ;;  %7230 = vset.pattern.permute.xlu1 %v7251_v1  ;;  %s7255_s22 = smov 1   ;;  %v591_v21 = vld [vmem:[%s9461_s2] sm:$0xf]  ;;  %v9549_v58 = vmov 0  ;;  %v9553_v60 = vmov 0 }
   0x2   :  { %9532 = sst [smem:[#allocation22_spill]] %s9460_s1  ;;  %v7360_v2 = vshrl.u32 %v9492_v0, 7  ;;  %s7254_s1 = smov 15   ;;  %v7487_v28 = vand.u32 127, %v9492_v0 }
   0x3   :  { %s9534_s26 = sld [smem:[#allocation21_spill]]  ;;  %s7256_s28 = smov 127  }
   0x4   :  { %9533 = vst [vmem:[#allocation3_spill] sm:$0xff] %v7360_v2  ;;  %v7366_v4 = vsub.s32 0, %v7360_v2  ;;  %v87_v5 = vsub.s32 2, %v7360_v2  ;;  %v91_v6 = vsub.s32 3, %v7360_v2  ;;  %v83_v7 = vsub.s32 1, %v7360_v2  ;;  %s9536_s0 = sld [smem:[#allocation22_spill]] }
   0x5   :  { %s9517_s19 = smov 113   ;;  %s9519_s23 = smov 112   ;;  %v63_v30 = vadd.s32 384, %v7487_v28  ;;  %v61_v33 = vadd.s32 128, %v7487_v28  ;;  %v62_v34 = vadd.s32 256, %v7487_v28  ;;  %v68_v35 = vshra.s32 %v7487_v28, 4 }
   0x6   :  { %9535 = vst [vmem:[#allocation4_spill] sm:$0xff] %v7366_v4  ;;  %v64_v41 = vand.u32 15, %v7487_v28  ;;  %s7263_s2 = smov 8   ;;  %s7267_s24 = smov 120  }
   0x7   :  { %v71_v36 = vshra.s32 %v63_v30, 4  ;;  %v69_v38 = vshra.s32 %v61_v33, 4  ;;  %v70_v39 = vshra.s32 %v62_v34, 4  ;;  %v7504_v42 = vand.u32 15, %v68_v35  ;;  %s9635_s18 = smov 112  }
   0x8   :  { %v67_v43 = vand.u32 15, %v63_v30  ;;  %v65_v46 = vand.u32 15, %v61_v33  ;;  %v66_v48 = vand.u32 15, %v62_v34  ;;  %vm7515_vm1 = vcmp.ge.s32.totalorder %v64_v41, 1 }
   0x9   :  { %v58_v3 = vld [vmem:[%s9534_s26] sm:$0xf]  ;;  %s9515_s26 = smov 111   ;;  %v7506_v44 = vand.u32 15, %v71_v36  ;;  %v7510_v47 = vand.u32 15, %v69_v38  ;;  %v7512_v49 = vand.u32 15, %v70_v39 }
   0xa   :  { %v7371_v8 = vrot.slane %v58_v3, %v87_v5  ;;  %v7374_v9 = vrot.slane %v58_v3, %v7366_v4  ;;  %v7380_v10 = vrot.slane %v58_v3, %v91_v6  ;;  %v7382_v11 = vrot.slane %v58_v3, %v83_v7  ;;  %v134_v12 = vld [vmem:[%s9536_s0] sm:$0xf]  ;;  %v6659_v13 = vld [vmem:[%s9536_s0 + $0x4] sm:$0xf]  ;;  %v6664_v14 = vld [vmem:[%s9536_s0 + $0x8] sm:$0xf] }
   0xb   :  { %v6669_v15 = vld [vmem:[%s9536_s0 + $0xc] sm:$0xf]  ;;  %v6670_v16 = vld [vmem:[%s9536_s0 + $0x10] sm:$0xf]  ;;  %v6675_v17 = vld [vmem:[%s9536_s0 + $0x14] sm:$0xf] }
   0xc   :  { %101 = vrot.lane.b32.xlu1 %v7371_v8, %s7252_s27  ;;  %97 = vrot.lane.b32.xlu0 %v7374_v9, %s7252_s27  ;;  %v6680_v18 = vld [vmem:[%s9536_s0 + $0x18] sm:$0xf]  ;;  %v6685_v19 = vld [vmem:[%s9536_s0 + $0x1c] sm:$0xf]  ;;  %vm9479_vm0 = vcmp.ge.s32.totalorder %v7504_v42, 1  ;;  %vm9478_vm2 = vcmp.ge.s32.totalorder %v7506_v44, 1 }
   0xd   :  { %v6690_v20 = vld [vmem:[%s9536_s0 + $0x20] sm:$0xf]  ;;  %vm7520_vm3 = vcmp.ge.s32.totalorder %v67_v43, 1  ;;  %vm9482_vm4 = vcmp.ge.s32.totalorder %v7510_v47, 1  ;;  %vm7529_vm5 = vcmp.ge.s32.totalorder %v65_v46, 1  ;;  %vm7537_vm6 = vmand %vm9479_vm0, %vm7515_vm1  ;;  %vm9487_vm7 = vcmp.ge.s32.totalorder %v7512_v49, 1 }
   0xe   :  { %v9540_v51 = vsel %vm7520_vm3, 4294967295, %v9539_v51  ;;  %vm7542_vm8 = vcmp.ge.s32.totalorder %v66_v48, 1  ;;  %vm7550_vm9 = vmand %vm9478_vm2, %vm7520_vm3  ;;  %vm7554_vm10 = vcmp.lt.s32.totalorder %v65_v46, 15  ;;  %vm7566_vm12 = vcmp.lt.s32.totalorder %v66_v48, 15  ;;  %s7264_s0 = smov 7  }
   0xf   :  { %v9546_v56 = vsel %vm7542_vm8, 4294967295, %v9545_v56  ;;  %v9550_v58 = vsel %vm7554_vm10, 4294967295, %v9549_v58  ;;  %vm7562_vm11 = vmand %vm9482_vm4, %vm7529_vm5  ;;  %v9554_v60 = vsel %vm7566_vm12, 4294967295, %v9553_v60  ;;  %vm7582_vm14 = vcmp.lt.s32.totalorder %v64_v41, 15 }
  0x10   :  { %103 = vrot.lane.b32.xlu1 %v7380_v10, %s7252_s27  ;;  %99 = vrot.lane.b32.xlu0 %v7382_v11, %s7252_s27  ;;  %vm7578_vm13 = vmand %vm9487_vm7, %vm7542_vm8  ;;  %vm7594_vm2 = vcmp.lt.s32.totalorder %v67_v43, 15  ;;  %v9561_v5 = vmov 0  ;;  %vm9568_vm3 = vcmp.ge.s32.totalorder %v7506_v44, 1 }
  0x11   :  { %vm7590_vm15 = vmand %vm9482_vm4, %vm7554_vm10  ;;  %v9562_v5 = vsel %vm7594_vm2, 4294967295, %v9561_v5  ;;  %vm9565_vm4 = vcmp.ge.s32.totalorder %v7504_v42, 1 }
  0x12   :  { %vm7602_vm0 = vmand %vm9487_vm7, %vm7566_vm12 }
  0x13   :  { %vm7611_vm10 = vmand %vm9565_vm4, %vm7582_vm14 }
  0x14   :  { %164 = vrot.lane.b32.xlu1 %v7374_v9, %s7253_s30  ;;  %137 = vperm.xlu0 %7229, %v134_v12   ;;  %vm7625_vm12 = vmand %vm9568_vm3, %vm7594_vm2  ;;  %vm9573_vm3 = vcmp.lt.s32.totalorder %v7504_v42, 15 }
  0x15   :  { %vm9572_vm7 = vmmov %vm9565_vm4  ;;  %vm427_vm4 = vcmp.lt.s32.totalorder %v7506_v44, 15 }
  0x16   :  { %vm7645_vm2 = vmand %vm9573_vm3, %vm7515_vm1  ;;  %vm9579_vm3 = vcmp.ge.s32.totalorder %v7506_v44, 1 }
  0x18   :  { %166 = vrot.lane.b32.xlu1 %v7382_v11, %s7253_s30  ;;  %168 = vrot.lane.b32.xlu0 %v7371_v8, %s7253_s30 }
  0x1c   :  { %170 = vrot.lane.b32.xlu1 %v7380_v10, %s7253_s30  ;;  %193 = vperm.xlu0 %7229, %v6659_v13  }
  0x20   :  { %220 = vrot.lane.b32.xlu1 %v7374_v9, %s7254_s1  ;;  %222 = vrot.lane.b32.xlu0 %v7382_v11, %s7254_s1 }
  0x24   :  { %224 = vrot.lane.b32.xlu1 %v7371_v8, %s7254_s1  ;;  %226 = vrot.lane.b32.xlu0 %v7380_v10, %s7254_s1 }
  0x28   :  { %257 = vperm.xlu1 %7230, %v6664_v14   ;;  %284 = vrot.lane.b32.xlu0 %v7374_v9, %s7255_s22 }
  0x2c   :  { %286 = vrot.lane.b32.xlu1 %v7382_v11, %s7255_s22  ;;  %288 = vrot.lane.b32.xlu0 %v7371_v8, %s7255_s22 }
  0x30   :  { %290 = vrot.lane.b32.xlu1 %v7380_v10, %s7255_s22  ;;  %313 = vperm.xlu0 %7229, %v6669_v15   ;;  %v9501_v15 = vmov 0.0  }
  0x31   :  { %v7668_v30 = vsel %vm9579_vm3, 1.0, %v9501_v15  ;;  %v7681_v34 = vsel %vm7562_vm11, 1.0, %v9501_v15  ;;  %v7686_v35 = vsel %vm7578_vm13, 1.0, %v9501_v15  ;;  %v7692_v36 = vsel %vm7590_vm15, 1.0, %v9501_v15 }
  0x32   :  { %9583 = vst [vmem:[#allocation7_spill] sm:$0xff] %v7681_v34  ;;  %9584 = vst [vmem:[#allocation8_spill] sm:$0xff] %v7686_v35  ;;  %vm9587_vm11 = vcmp.lt.s32.totalorder %v7512_v49, 15  ;;  %v7709_v43 = vsel %vm7602_vm0, 1.0, %v9501_v15  ;;  %v7714_v46 = vsel %vm7611_vm10, 1.0, %v9501_v15  ;;  %v7719_v48 = vsel %vm7625_vm12, 1.0, %v9501_v15 }
  0x33   :  { %9585 = vst [vmem:[#allocation9_spill] sm:$0xff] %v7692_v36  ;;  %9590 = vst [vmem:[#allocation10_spill] sm:$0xff] %v7714_v46  ;;  %vm292_vm13 = vcmp.lt.s32.totalorder %v7487_v28, 1  ;;  %vm9591_vm15 = vnez %v9540_v51  ;;  %v7729_v55 = vsel %vm7529_vm5, 1.0, %v9501_v15  ;;  %v7739_v59 = vsel %vm7515_vm1, 1.0, %v9501_v15 }
  0x34   :  { %344 = vperm.xlu1 %7230, %v6670_v16   ;;  %355 = vrot.lane.b32.xlu0 %v7374_v9, %s7256_s28  ;;  %v7633_v16 = vsel %vm7537_vm6, 1.0, %v9501_v15  ;;  %vm9577_vm6 = vcmp.ge.s32.totalorder %v7510_v47, 1  ;;  %v7744_v63 = vsel %vm9591_vm15, 1.0, %v9501_v15  ;;  %v7749_v54 = vsel %vm7582_vm14, 1.0, %v9501_v15 }
  0x35   :  { %9571 = vst [vmem:[#allocation5_spill] sm:$0xff] %v7633_v16  ;;  %vm9592_vm0 = vnez %v9550_v58  ;;  %vm9594_vm1 = vnez %v9562_v5  ;;  %vm9595_vm10 = vcmp.lt.s32.totalorder %v7504_v42, 15  ;;  %v7781_v14 = vsel %vm7645_vm2, 1.0, %v9501_v15 }
  0x36   :  { %v7764_v51 = vsel %vm9594_vm1, 1.0, %v9501_v15  ;;  %vm7770_vm12 = vmand %vm9595_vm10, %vm7582_vm14  ;;  %9598 = vst [vmem:[#allocation11_spill] sm:$0xff] %v7781_v14  ;;  %vm9600_vm14 = vcmp.lt.s32.totalorder %v7510_v47, 15  ;;  %vm9601_vm2 = vcmp.lt.s32.totalorder %v7487_v28, 17 }
  0x38   :  { %357 = vrot.lane.b32.xlu1 %v7382_v11, %s7256_s28  ;;  %359 = vrot.lane.b32.xlu0 %v7371_v8, %s7256_s28 }
  0x3c   :  { %361 = vrot.lane.b32.xlu1 %v7380_v10, %s7256_s28  ;;  %384 = vperm.xlu0 %7229, %v6675_v17   ;;  %v7639_v17 = vsel %vm9572_vm7, 1.0, %v9501_v15  ;;  %vm9578_vm7 = vcmp.ge.s32.totalorder %v7512_v49, 1 }
  0x40   :  { %411 = vrot.lane.b32.xlu1 %v7374_v9, %s9517_s19  ;;  %413 = vrot.lane.b32.xlu0 %v7382_v11, %s9517_s19 }
  0x44   :  { %415 = vrot.lane.b32.xlu1 %v7371_v8, %s9517_s19  ;;  %417 = vrot.lane.b32.xlu0 %v7380_v10, %s9517_s19  ;;  %s7265_s19 = smov 121  }
  0x48   :  { %448 = vperm.xlu1 %7230, %v6680_v18   ;;  %475 = vrot.lane.b32.xlu0 %v7374_v9, %s9519_s23 }
  0x4c   :  { %477 = vrot.lane.b32.xlu1 %v7382_v11, %s9519_s23  ;;  %479 = vrot.lane.b32.xlu0 %v7371_v8, %s9519_s23 }
  0x50   :  { %481 = vrot.lane.b32.xlu1 %v7380_v10, %s9519_s23  ;;  %504 = vperm.xlu0 %7229, %v6685_v19   ;;  %v7653_v19 = vsel %vm7550_vm9, 1.0, %v9501_v15  ;;  %vm9580_vm9 = vcmp.lt.s32.totalorder %v7510_v47, 15  ;;  %v7834_v47 = vsel %vm427_vm4, 1.0, %v9501_v15 }
  0x51   :  { %9576 = vst [vmem:[#allocation6_spill] sm:$0xff] %v7653_v19  ;;  %vm7674_vm8 = vmand %vm9580_vm9, %vm7529_vm5  ;;  %vm9593_vm5 = vnez %v9554_v60 }
  0x52   :  { %vm431_vm9 = vmand %vm427_vm4, %vm9591_vm15  ;;  %v7759_v50 = vsel %vm9593_vm5, 1.0, %v9501_v15  ;;  %v7786_v0 = vsel %vm7674_vm8, 1.0, %v9501_v15  ;;  %vm9607_vm15 = vcmp.lt.s32.totalorder %v7487_v28, 16  ;;  %9611 = vst [vmem:[#allocation16_spill] sm:$0xff] %v7834_v47 }
  0x53   :  { %v7794_v2 = vsel %vm431_vm9, 1.0, %v9501_v15  ;;  %vm9602_vm8 = vmmov %vm9601_vm2 }
  0x54   :  { %531 = vrot.lane.b32.xlu1 %v7374_v9, %s9515_s26  ;;  %533 = vrot.lane.b32.xlu0 %v7382_v11, %s9515_s26  ;;  %9599 = vst [vmem:[#allocation12_spill] sm:$0xff] %v7794_v2  ;;  %vm9608_vm9 = vmmov %vm9607_vm15 }
  0x58   :  { %535 = vrot.lane.b32.xlu1 %v7371_v8, %s9515_s26  ;;  %537 = vrot.lane.b32.xlu0 %v7380_v10, %s9515_s26  ;;  %s7266_s26 = smov 119  }
  0x5c   :  { %564 = vperm.xlu1 %7230, %v6690_v20   ;;  %594 = vperm.xlu0 %7229, %v591_v21   ;;  %v7658_v20 = vsel %vm9577_vm6, 1.0, %v9501_v15  ;;  %v7663_v21 = vsel %vm9578_vm7, 1.0, %v9501_v15  ;;  %vm228_vm6 = vcmp.lt.s32.totalorder %v7487_v28, 15  ;;  %vm9586_vm7 = vnez %v9546_v56 }
  0x5d   :  { %vm7702_vm3 = vmand %vm9587_vm11, %vm9586_vm7  ;;  %v7734_v57 = vsel %vm9586_vm7, 1.0, %v9501_v15  ;;  %v7754_v56 = vsel %vm9592_vm0, 1.0, %v9501_v15 }
  0x5e   :  { %v7791_v1 = vsel %vm7702_vm3, 1.0, %v9501_v15  ;;  %vm545_vm7 = vmand %vm9600_vm14, %vm9592_vm0  ;;  %vm9609_vm0 = vcmp.lt.s32.totalorder %v7512_v49, 15 }
  0x5f   :  { %vm9603_vm11 = vmmov %vm9595_vm10  ;;  %v7829_v42 = vsel %vm9609_vm0, 1.0, %v9501_v15 }
  0x60   :  { %v7811_v41 = vsel %vm9603_vm11, 1.0, %v9501_v15  ;;  %vm9605_vm3 = vmmov %vm9600_vm14  ;;  %9610 = vst [vmem:[#allocation15_spill] sm:$0xff] %v7829_v42  ;;  %v7850_v42 = vsel %vm545_vm7, 1.0, %v9501_v15  ;;  %vm483_vm7 = vcmp.lt.s32.totalorder %v7487_v28, 112  ;;  %vm419_vm11 = vcmp.lt.s32.totalorder %v7487_v28, 113 }
  0x61   :  { %9604 = vst [vmem:[#allocation13_spill] sm:$0xff] %v7811_v41  ;;  %v7816_v58 = vsel %vm9605_vm3, 1.0, %v9501_v15  ;;  %vm9612_vm10 = vmmov %vm9601_vm2  ;;  %v7847_v41 = vsel %vm7770_vm12, 1.0, %v9501_v15  ;;  %vm363_vm12 = vcmp.lt.s32.totalorder %v7487_v28, 127 }
  0x62   :  { %9606 = vst [vmem:[#allocation14_spill] sm:$0xff] %v7816_v58  ;;  %vm9613_vm14 = vmmov %vm9608_vm9 }
  0x63   :  { %9614 = vst [vmem:[#allocation17_spill] sm:$0xff] %v7847_v41  ;;  %9615 = vst [vmem:[#allocation18_spill] sm:$0xff] %v7850_v42 }
  0x64   :  { %vm9617_vm3 = vmmov %vm9609_vm0 }
  0x7e   :  { %v7474_v22 = vpop.permute.xlu1 %101  ;;  %v7478_v24 = vpop.permute.xlu0 %97 }
  0x82   :  { %v7476_v23 = vpop.permute.xlu1 %103  ;;  %v7482_v26 = vpop.permute.xlu0 %99 }
  0x83   :  { %v109_v18 = vsel %vm9601_vm2, %v7476_v23, %v7478_v24  ;;  %v108_v33 = vsel %vm9602_vm8, %v7478_v24, %v7482_v26  ;;  %v106_v58 = vsel %vm9612_vm10, %v7474_v22, %v7476_v23  ;;  %v107_v23 = vsel %vm9601_vm2, %v7482_v26, %v7474_v22  ;;  %vm9616_vm8 = vmmov %vm9608_vm9 }
  0x84   :  { %v130_v47 = vmul.f32 %v7633_v16, %v109_v18  ;;  %v131_v2 = vmul.f32 %v7681_v34, %v108_v33 }
  0x86   :  { %v7480_v25 = vpop.permute.xlu1 %164 }
  0x8a   :  { %v7484_v27 = vpop.permute.xlu1 %166 }
  0x8b   :  { %v175_v14 = vsel %vm9607_vm15, %v7480_v25, %v7484_v27  ;;  %vm7952_vm15 = vmand %vm9617_vm3, %vm9593_vm5  ;;  %vm7261_vm5 = vmmov 0  }
  0x8c   :  { %v186_v15 = vmul.f32 %v7658_v20, %v175_v14 }
  0x8e   :  { %v7492_v31 = vpop.permute.xlu1 %170 }
  0x8f   :  { %v7489_v29 = vpop.permute.xlu0 %137 }
  0x92   :  { %v7501_v40 = vpop.permute.xlu1 %220 }
  0x93   :  { %v7494_v32 = vpop.permute.xlu0 %168 }
  0x94   :  { %v174_v24 = vsel %vm9608_vm9, %v7484_v27, %v7494_v32  ;;  %v173_v27 = vsel %vm9613_vm14, %v7494_v32, %v7492_v31  ;;  %v176_v32 = vsel %vm9616_vm8, %v7492_v31, %v7480_v25  ;;  %v133_v25 = vmul.f32 %v7653_v19, %v106_v58  ;;  %vm547_vm9 = vmand %vm427_vm4, %vm9594_vm1 }
  0x95   :  { %v187_v18 = vmul.f32 %v7663_v21, %v174_v24  ;;  %v188_v31 = vmul.f32 %v7668_v30, %v173_v27  ;;  %v132_v24 = vmul.f32 %v7686_v35, %v107_v23  ;;  %v185_v16 = vmul.f32 %v7639_v17, %v176_v32 }
  0x96   :  { %v7524_v52 = vpop.permute.xlu1 %224  ;;  %v147_v27 = vrot.slane %v131_v2, %v7366_v4  ;;  %vm539_vm4 = vcmp.lt.s32.totalorder %v7487_v28, 111  ;;  %vm864_vm8 = vcmask 1043456  }
  0x97   :  { %v7499_v37 = vpop.permute.xlu0 %193  ;;  %v211_v2 = vrot.slane %v188_v31, %v7366_v4 }
  0x9b   :  { %v7508_v45 = vpop.permute.xlu0 %222 }
  0x9c   :  { %v231_v22 = vsel %vm228_vm6, %v7501_v40, %v7508_v45 }
  0x9d   :  { %v250_v23 = vmul.f32 %v7692_v36, %v231_v22  ;;  %v199_v36 = vrot.slane %v185_v16, %v7366_v4 }
  0x9f   :  { %v7526_v53 = vpop.permute.xlu0 %226 }
  0xa0   :  { %v232_v26 = vsel %vm228_vm6, %v7526_v53, %v7501_v40  ;;  %v229_v14 = vsel %vm228_vm6, %v7524_v52, %v7526_v53  ;;  %v230_v40 = vsel %vm228_vm6, %v7508_v45, %v7524_v52  ;;  %v143_v53 = vrot.slane %v130_v47, %v7366_v4 }
  0xa1   :  { %v249_v32 = vmul.f32 %v7714_v46, %v232_v26  ;;  %v203_v45 = vrot.slane %v186_v15, %v7366_v4  ;;  %v207_v52 = vrot.slane %v187_v18, %v7366_v4  ;;  %v155_v47 = vrot.slane %v133_v25, %v7366_v4 }
  0xa2   :  { %v251_v22 = vmul.f32 %v7709_v43, %v230_v40  ;;  %v151_v46 = vrot.slane %v132_v24, %v7366_v4  ;;  %v157_v15 = vmul.f32 %v147_v27, %v7489_v29  ;;  %v212_v40 = vmul.f32 %v199_v36, %v7499_v37 }
  0xa3   :  { %v7570_v61 = vpop.permute.xlu1 %257  ;;  %v7572_v62 = vpop.permute.xlu0 %284  ;;  %v213_v18 = vmul.f32 %v203_v45, %v7499_v37 }
  0xa4   :  { %v158_v36 = vmul.f32 %v151_v46, %v7489_v29 }
  0xa7   :  { %v7615_v12 = vpop.permute.xlu1 %286  ;;  %v7617_v13 = vpop.permute.xlu0 %288 }
  0xa8   :  { %v295_v33 = vsel %vm292_vm13, %v7572_v62, %v7615_v12  ;;  %v294_v58 = vsel %vm292_vm13, %v7615_v12, %v7617_v13  ;;  %v252_v12 = vmul.f32 %v7719_v48, %v229_v14  ;;  %v267_v14 = vrot.slane %v250_v23, %v7366_v4 }
  0xa9   :  { %v306_v34 = vmul.f32 %v7729_v55, %v295_v33  ;;  %v307_v26 = vmul.f32 %v7734_v57, %v294_v58  ;;  %v263_v33 = vrot.slane %v249_v32, %v7366_v4  ;;  %v214_v58 = vmul.f32 %v207_v52, %v7499_v37 }
  0xaa   :  { %v275_v27 = vrot.slane %v252_v12, %v7366_v4  ;;  %v215_v32 = vmul.f32 %v211_v2, %v7499_v37  ;;  %v277_v45 = vmul.f32 %v267_v14, %v7570_v61  ;;  %v159_v37 = vmul.f32 %v155_v47, %v7489_v29 }
  0xab   :  { %v7694_v38 = vpop.permute.xlu1 %290  ;;  %v7696_v39 = vpop.permute.xlu0 %313  ;;  %v323_v23 = vrot.slane %v306_v34, %v7366_v4  ;;  %v217_v34 = vadd.f32 %v213_v18, %v157_v15  ;;  %v276_v2 = vmul.f32 %v263_v33, %v7570_v61 }
  0xac   :  { %v293_v25 = vsel %vm292_vm13, %v7617_v13, %v7694_v38  ;;  %v296_v31 = vsel %vm292_vm13, %v7694_v38, %v7572_v62  ;;  %v271_v13 = vrot.slane %v251_v22, %v7366_v4  ;;  %v327_v62 = vrot.slane %v307_v26, %v7366_v4 }
  0xad   :  { %v156_v38 = vmul.f32 %v143_v53, %v7489_v29  ;;  %v305_v52 = vmul.f32 %v7739_v59, %v296_v31  ;;  %v308_v12 = vmul.f32 %v7744_v63, %v293_v25  ;;  %v218_v25 = vadd.f32 %v214_v58, %v158_v36 }
  0xae   :  { %v278_v22 = vmul.f32 %v271_v13, %v7570_v61  ;;  %v279_v31 = vmul.f32 %v275_v27, %v7570_v61  ;;  %v333_v29 = vmul.f32 %v323_v23, %v7696_v39  ;;  %v219_v47 = vadd.f32 %v215_v32, %v159_v37 }
  0xaf   :  { %v7774_v6 = vpop.permute.xlu1 %344  ;;  %v7776_v7 = vpop.permute.xlu0 %355  ;;  %v216_v53 = vadd.f32 %v212_v40, %v156_v38  ;;  %v281_v15 = vadd.f32 %v277_v45, %v217_v34  ;;  %v334_v60 = vmul.f32 %v327_v62, %v7696_v39  ;;  %v319_v18 = vrot.slane %v305_v52, %v7366_v4 }
  0xb0   :  { %v331_v61 = vrot.slane %v308_v12, %v7366_v4  ;;  %v282_v40 = vadd.f32 %v278_v22, %v218_v25  ;;  %v9620_v23 = vmov 0.0   ;;  %v283_v45 = vadd.f32 %v279_v31, %v219_v47 }
  0xb1   :  { %v280_v33 = vadd.f32 %v276_v2, %v216_v53  ;;  %v7982_v32 = vsel %vm7952_vm15, 1.0, %v9620_v23  ;;  %v7985_v13 = vsel %vm547_vm9, 1.0, %v9620_v23  ;;  %v348_v36 = vmul.f32 %v7774_v6, %v7382_v11 }
  0xb2   :  { %9621 = vst [vmem:[#allocation19_spill] sm:$0xff] %v7982_v32  ;;  %9622 = vst [vmem:[#allocation20_spill] sm:$0xff] %v7985_v13  ;;  %v338_v38 = vadd.f32 %v334_v60, %v282_v40  ;;  %v332_v37 = vmul.f32 %v319_v18, %v7696_v39  ;;  %v335_v34 = vmul.f32 %v331_v61, %v7696_v39  ;;  %v9623_v18 = vld [vmem:[#allocation12_spill] sm:$0xff]  ;;  %v9625_v40 = vld [vmem:[#allocation14_spill] sm:$0xff]  ;;  %vm860_vm15 = vcmask 31744  }
  0xb3   :  { %v7862_v3 = vpop.permute.xlu1 %357  ;;  %v7864_v41 = vpop.permute.xlu0 %359  ;;  %v347_v2 = vmul.f32 %v7774_v6, %v7374_v9 }
  0xb4   :  { %v366_v49 = vsel %vm363_vm12, %v7776_v7, %v7862_v3  ;;  %v365_v5 = vsel %vm363_vm12, %v7862_v3, %v7864_v41  ;;  %v337_v3 = vadd.f32 %v333_v29, %v281_v15  ;;  %v336_v47 = vadd.f32 %v332_v37, %v280_v33  ;;  %v9627_v37 = vld [vmem:[#allocation15_spill] sm:$0xff] }
  0xb5   :  { %v376_v62 = vmul.f32 %v7749_v54, %v366_v49  ;;  %v377_v52 = vmul.f32 %v7754_v56, %v365_v5  ;;  %v339_v15 = vadd.f32 %v335_v34, %v283_v45  ;;  %v9624_v5 = vld [vmem:[#allocation13_spill] sm:$0xff] }
  0xb7   :  { %v7901_v35 = vpop.permute.xlu1 %361  ;;  %v7903_v19 = vpop.permute.xlu0 %384  ;;  %v390_v25 = vrot.slane %v376_v62, %v7366_v4  ;;  %v394_v31 = vrot.slane %v377_v52, %v7366_v4  ;;  %v9626_v52 = vld [vmem:[#allocation11_spill] sm:$0xff] }
  0xb8   :  { %v364_v44 = vsel %vm363_vm12, %v7864_v41, %v7901_v35  ;;  %v367_v41 = vsel %vm363_vm12, %v7901_v35, %v7776_v7  ;;  %v349_v35 = vmul.f32 %v7774_v6, %v7371_v8  ;;  %v350_v7 = vmul.f32 %v7774_v6, %v7380_v10 }
  0xb9   :  { %v378_v12 = vmul.f32 %v7759_v50, %v364_v44  ;;  %v379_v11 = vmul.f32 %v7764_v51, %v367_v41  ;;  %v352_v6 = vadd.f32 %v348_v36, %v337_v3  ;;  %v403_v36 = vmul.f32 %v390_v25, %v7903_v19 }
  0xba   :  { %v404_v45 = vmul.f32 %v394_v31, %v7903_v19 }
  0xbb   :  { %v7927_v24 = vpop.permute.xlu1 %411  ;;  %v7929_v16 = vpop.permute.xlu0 %413  ;;  %v398_v29 = vrot.slane %v378_v12, %v7366_v4  ;;  %v402_v49 = vrot.slane %v379_v11, %v7366_v4  ;;  %v9628_v11 = vld [vmem:[#allocation16_spill] sm:$0xff] }
  0xbd   :  { %v405_v12 = vmul.f32 %v398_v29, %v7903_v19 }
  0xbf   :  { %v416_v26 = vpop.permute.xlu1 %415  ;;  %v418_v14 = vpop.permute.xlu0 %417 }
  0xc0   :  { %v421_v22 = vsel %vm419_vm11, %v7929_v16, %v416_v26  ;;  %v420_v46 = vsel %vm419_vm11, %v416_v26, %v418_v14  ;;  %v423_v8 = vsel %vm419_vm11, %v418_v14, %v7927_v24  ;;  %v422_v26 = vsel %vm419_vm11, %v7927_v24, %v7929_v16 }
  0xc1   :  { %v441_v14 = vmul.f32 %v7786_v0, %v421_v22  ;;  %v442_v60 = vmul.f32 %v7791_v1, %v420_v46  ;;  %v443_v61 = vmul.f32 %v9623_v18, %v423_v8  ;;  %v440_v24 = vmul.f32 %v9626_v52, %v422_v26 }
  0xc2   :  { %v351_v46 = vadd.f32 %v347_v2, %v336_v47  ;;  %v354_v26 = vadd.f32 %v350_v7, %v339_v15  ;;  %v408_v47 = vadd.f32 %v404_v45, %v352_v6 }
  0xc3   :  { %v7977_v58 = vpop.permute.xlu1 %448  ;;  %v476_v27 = vpop.permute.xlu0 %475  ;;  %v458_v25 = vrot.slane %v441_v14, %v7366_v4  ;;  %v462_v8 = vrot.slane %v442_v60, %v7366_v4 }
  0xc7   :  { %v478_v53 = vpop.permute.xlu1 %477  ;;  %v480_v39 = vpop.permute.xlu0 %479 }
  0xc8   :  { %v486_v9 = vsel %vm483_vm7, %v476_v27, %v478_v53  ;;  %v485_v10 = vsel %vm483_vm7, %v478_v53, %v480_v39  ;;  %v353_v53 = vadd.f32 %v349_v35, %v338_v38  ;;  %v407_v35 = vadd.f32 %v403_v36, %v351_v46 }
  0xc9   :  { %v496_v44 = vmul.f32 %v9624_v5, %v486_v9  ;;  %v497_v3 = vmul.f32 %v9625_v40, %v485_v10  ;;  %v406_v9 = vmul.f32 %v402_v49, %v7903_v19  ;;  %v468_v49 = vmul.f32 %v458_v25, %v7977_v58 }
  0xca   :  { %v409_v14 = vadd.f32 %v405_v12, %v353_v53 }
  0xcb   :  { %v482_v62 = vpop.permute.xlu1 %481  ;;  %v505_v41 = vpop.permute.xlu0 %504  ;;  %v514_v10 = vrot.slane %v497_v3, %v7366_v4  ;;  %v410_v15 = vadd.f32 %v406_v9, %v354_v26 }
  0xcc   :  { %v484_v16 = vsel %vm483_vm7, %v480_v39, %v482_v62  ;;  %v487_v33 = vsel %vm483_vm7, %v482_v62, %v476_v27  ;;  %v466_v39 = vrot.slane %v443_v61, %v7366_v4  ;;  %v510_v27 = vrot.slane %v496_v44, %v7366_v4  ;;  %v9629_v44 = vld [vmem:[#allocation17_spill] sm:$0xff] }
  0xcd   :  { %v498_v34 = vmul.f32 %v9627_v37, %v484_v16  ;;  %v499_v22 = vmul.f32 %v9628_v11, %v487_v33  ;;  %v454_v62 = vrot.slane %v440_v24, %v7366_v4  ;;  %v469_v61 = vmul.f32 %v462_v8, %v7977_v58 }
  0xce   :  { %v470_v3 = vmul.f32 %v466_v39, %v7977_v58  ;;  %v523_v24 = vmul.f32 %v510_v27, %v505_v41  ;;  %v524_v16 = vmul.f32 %v514_v10, %v505_v41  ;;  %v472_v8 = vadd.f32 %v468_v49, %v408_v47 }
  0xcf   :  { %v532_v31 = vpop.permute.xlu1 %531  ;;  %v534_v29 = vpop.permute.xlu0 %533  ;;  %v518_v2 = vrot.slane %v498_v34, %v7366_v4  ;;  %v522_v19 = vrot.slane %v499_v22, %v7366_v4  ;;  %v467_v60 = vmul.f32 %v454_v62, %v7977_v58  ;;  %v473_v9 = vadd.f32 %v469_v61, %v409_v14 }
  0xd0   :  { %v542_v38 = vsel %vm539_vm4, %v532_v31, %v534_v29  ;;  %v474_v27 = vadd.f32 %v470_v3, %v410_v15 }
  0xd1   :  { %v556_v7 = vmul.f32 %v9629_v44, %v542_v38  ;;  %v525_v36 = vmul.f32 %v518_v2, %v505_v41  ;;  %v526_v22 = vmul.f32 %v522_v19, %v505_v41  ;;  %v471_v25 = vadd.f32 %v467_v60, %v407_v35 }
  0xd2   :  { %v528_v38 = vadd.f32 %v524_v16, %v472_v8  ;;  %v668_v16 = vld [vmem:[%s9462_s3 + $0xf8] sm:$0xff]  ;;  %v651_v8 = vld [vmem:[%s9462_s3 + $0x70] sm:$0xff] }
  0xd3   :  { %v536_v33 = vpop.permute.xlu1 %535  ;;  %v538_v34 = vpop.permute.xlu0 %537  ;;  %v570_v39 = vrot.slane %v556_v7, %v7366_v4  ;;  %v529_v62 = vadd.f32 %v525_v36, %v473_v9  ;;  %v527_v2 = vadd.f32 %v523_v24, %v471_v25  ;;  %v530_v35 = vadd.f32 %v526_v22, %v474_v27  ;;  %v700_v36 = vld [vmem:[%s9462_s3 + $0x1f8] sm:$0xff]  ;;  %6884 = vmatprep.subr.mxu0 %v668_v16  ;;  %v699_v25 = vld [vmem:[%s9462_s3 + $0x1f0] sm:$0xff]  ;;  %v694_v16 = vld [vmem:[%s9462_s3 + $0x1c8] sm:$0xff] }
  0xd4   :  { %v541_v6 = vsel %vm539_vm4, %v534_v29, %v536_v33  ;;  %v540_v45 = vsel %vm539_vm4, %v536_v33, %v538_v34  ;;  %v543_v12 = vsel %vm539_vm4, %v538_v34, %v532_v31  ;;  %6919 = vmatprep.subr.mxu1 %v700_v36  ;;  %v683_v9 = vld [vmem:[%s9462_s3 + $0x170] sm:$0xff]  ;;  %v646_v36 = vld [vmem:[%s9462_s3 + $0x48] sm:$0xff] }
  0xd5   :  { %v557_v46 = vmul.f32 %v7850_v42, %v541_v6  ;;  %v558_v53 = vmul.f32 %v7982_v32, %v540_v45  ;;  %v559_v58 = vmul.f32 %v7985_v13, %v543_v12  ;;  %v652_v45 = vld [vmem:[%s9462_s3 + $0x78] sm:$0xff] }
  0xd6   :  { %6885 = vmatpush3.msra.mxu0 %v652_v45  ;;  %v678_v45 = vld [vmem:[%s9462_s3 + $0x148] sm:$0xff] }
  0xd7   :  { %v574_v10 = vrot.slane %v557_v46, %v7366_v4  ;;  %v578_v29 = vrot.slane %v558_v53, %v7366_v4  ;;  %v582_v26 = vrot.slane %v559_v58, %v7366_v4  ;;  %v565_v31 = vpop.permute.xlu1 %564  ;;  %v595_v14 = vpop.permute.xlu0 %594  ;;  %v684_v53 = vld [vmem:[%s9462_s3 + $0x178] sm:$0xff]  ;;  %v667_v58 = vld [vmem:[%s9462_s3 + $0xf0] sm:$0xff] }
  0xd8   :  { %v583_v41 = vmul.f32 %v570_v39, %v565_v31  ;;  %6920 = vmatpush3.msra.mxu1 %v684_v53  ;;  %6886 = vmatprep.subr.mxu0 %v667_v58  ;;  %v661_v53 = vld [vmem:[%s9462_s3 + $0xc0] sm:$0xff] }
  0xd9   :  { %v584_v19 = vmul.f32 %v574_v10, %v565_v31  ;;  %v585_v33 = vmul.f32 %v578_v29, %v565_v31  ;;  %v586_v34 = vmul.f32 %v582_v26, %v565_v31  ;;  %6921 = vmatprep.subr.mxu1 %v699_v25  ;;  %v666_v10 = vld [vmem:[%s9462_s3 + $0xe8] sm:$0xff]  ;;  %6887 = vmatpush3.msra.mxu0 %v651_v8  ;;  %v693_v58 = vld [vmem:[%s9462_s3 + $0x1c0] sm:$0xff] }
  0xda   :  { %v587_v47 = vadd.f32 %v583_v41, %v527_v2  ;;  %v698_v29 = vld [vmem:[%s9462_s3 + $0x1e8] sm:$0xff]  ;;  %6922 = vmatpush3.msra.mxu1 %v683_v9  ;;  %v665_v41 = vld [vmem:[%s9462_s3 + $0xe0] sm:$0xff]  ;;  %6888 = vmatprep.subr.mxu0 %v666_v10  ;;  %v660_v9 = vld [vmem:[%s9462_s3 + $0xb8] sm:$0xff] }
  0xdb   :  { %v589_v60 = vadd.f32 %v585_v33, %v529_v62  ;;  %v590_v49 = vadd.f32 %v586_v34, %v530_v35  ;;  %v588_v61 = vadd.f32 %v584_v19, %v528_v38  ;;  %v650_v26 = vld [vmem:[%s9462_s3 + $0x68] sm:$0xff]  ;;  %v697_v62 = vld [vmem:[%s9462_s3 + $0x1e0] sm:$0xff]  ;;  %6923 = vmatprep.subr.mxu1 %v698_v29  ;;  %v664_v19 = vld [vmem:[%s9462_s3 + $0xd8] sm:$0xff] }
  0xdc   :  { %v8070_v7 = vadd.f32 %v595_v14, %v587_v47  ;;  %v682_v31 = vld [vmem:[%s9462_s3 + $0x168] sm:$0xff]  ;;  %v649_v2 = vld [vmem:[%s9462_s3 + $0x60] sm:$0xff]  ;;  %6889 = vmatpush3.msra.mxu0 %v650_v26  ;;  %v696_v33 = vld [vmem:[%s9462_s3 + $0x1d8] sm:$0xff] }
  0xdd   :  { %v8072_v15 = vadd.f32 %v595_v14, %v589_v60  ;;  %v8074_v3 = vadd.f32 %v595_v14, %v590_v49  ;;  %v8076_v6 = vadd.f32 %v595_v14, %v588_v61  ;;  %v681_v38 = vld [vmem:[%s9462_s3 + $0x160] sm:$0xff]  ;;  %6924 = vmatpush3.msra.mxu1 %v682_v31  ;;  %6890 = vmatprep.subr.mxu0 %v665_v41  ;;  %v648_v34 = vld [vmem:[%s9462_s3 + $0x58] sm:$0xff]  ;;  %v663_v47 = vld [vmem:[%s9462_s3 + $0xd0] sm:$0xff] }
  0xde   :  { %v601_v24 = vmax.f32 %v8070_v7, 0.0  ;;  %6925 = vmatprep.subr.mxu1 %v697_v62  ;;  %v680_v35 = vld [vmem:[%s9462_s3 + $0x158] sm:$0xff]  ;;  %6891 = vmatpush3.msra.mxu0 %v649_v2  ;;  %v695_v14 = vld [vmem:[%s9462_s3 + $0x1d0] sm:$0xff]  ;;  %v662_v61 = vld [vmem:[%s9462_s3 + $0xc8] sm:$0xff] }
  0xdf   :  { %v603_v12 = vmax.f32 %v8072_v15, 0.0  ;;  %v604_v22 = vmax.f32 %v8074_v3, 0.0  ;;  %v602_v46 = vmax.f32 %v8076_v6, 0.0  ;;  %6926 = vmatpush3.msra.mxu1 %v681_v38  ;;  %6892 = vmatprep.subr.mxu0 %v664_v19  ;;  %v647_v60 = vld [vmem:[%s9462_s3 + $0x50] sm:$0xff]  ;;  %v645_v25 = vld [vmem:[%s9462_s3 + $0x40] sm:$0xff]  ;;  %v676_v10 = vld [vmem:[%s9462_s3 + $0x138] sm:$0xff] }
  0xe0   :  { %6927 = vmatprep.subr.mxu1 %v696_v33  ;;  %v679_v49 = vld [vmem:[%s9462_s3 + $0x150] sm:$0xff]  ;;  %6893 = vmatpush3.msra.mxu0 %v648_v34  ;;  %v677_v8 = vld [vmem:[%s9462_s3 + $0x140] sm:$0xff]  ;;  %v658_v62 = vld [vmem:[%s9462_s3 + $0xa8] sm:$0xff] }
  0xe1   :  { %v7236_v39 = vpack.i.bf16 %v604_v22, %v603_v12  ;;  %v7231_v27 = vpack.i.bf16 %v602_v46, %v601_v24  ;;  %6928 = vmatpush3.msra.mxu1 %v680_v35  ;;  %6894 = vmatprep.subr.mxu0 %v663_v47  ;;  %v659_v29 = vld [vmem:[%s9462_s3 + $0xb0] sm:$0xff]  ;;  %v690_v2 = vld [vmem:[%s9462_s3 + $0x1a8] sm:$0xff]  ;;  %v657_v33 = vld [vmem:[%s9462_s3 + $0xa0] sm:$0xff] }
  0xe2   :  { %6929 = vmatprep.subr.mxu1 %v695_v14  ;;  %6895 = vmatpush3.msra.mxu0 %v647_v60  ;;  %v691_v26 = vld [vmem:[%s9462_s3 + $0x1b0] sm:$0xff]  ;;  %v642_v38 = vld [vmem:[%s9462_s3 + $0x28] sm:$0xff]  ;;  %v689_v34 = vld [vmem:[%s9462_s3 + $0x1a0] sm:$0xff] }
  0xe3   :  { %7237 = vrot.lane.b32.xlu0 %v7236_v39, %s7256_s28  ;;  %7232 = vrot.lane.b32.xlu1 %v7231_v27, %s7256_s28  ;;  %v692_v39 = vld [vmem:[%s9462_s3 + $0x1b8] sm:$0xff]  ;;  %v643_v31 = vld [vmem:[%s9462_s3 + $0x30] sm:$0xff] }
  0xe4   :  { %6930 = vmatpush3.msra.mxu1 %v679_v49  ;;  %6896 = vmatprep.subr.mxu0 %v662_v61  ;;  %v644_v27 = vld [vmem:[%s9462_s3 + $0x38] sm:$0xff]  ;;  %v675_v41 = vld [vmem:[%s9462_s3 + $0x130] sm:$0xff]  ;;  %v674_v19 = vld [vmem:[%s9462_s3 + $0x128] sm:$0xff] }
  0xe5   :  { %6931 = vmatprep.subr.mxu1 %v694_v16  ;;  %6897 = vmatpush3.msra.mxu0 %v646_v36  ;;  %v641_v35 = vld [vmem:[%s9462_s3 + $0x20] sm:$0xff]  ;;  %v656_v14 = vld [vmem:[%s9462_s3 + $0x98] sm:$0xff]  ;;  %v655_v16 = vld [vmem:[%s9462_s3 + $0x90] sm:$0xff] }
  0xe6   :  { %6932 = vmatpush3.msra.mxu1 %v678_v45  ;;  %6898 = vmatprep.subr.mxu0 %v661_v53  ;;  %v673_v47 = vld [vmem:[%s9462_s3 + $0x120] sm:$0xff]  ;;  %v688_v60 = vld [vmem:[%s9462_s3 + $0x198] sm:$0xff]  ;;  %v687_v36 = vld [vmem:[%s9462_s3 + $0x190] sm:$0xff] }
  0xe7   :  { %6933 = vmatprep.subr.mxu1 %v693_v58  ;;  %6899 = vmatpush3.msra.mxu0 %v645_v25  ;;  %v640_v49 = vld [vmem:[%s9462_s3 + $0x18] sm:$0xff]  ;;  %v639_v45 = vld [vmem:[%s9462_s3 + $0x10] sm:$0xff]  ;;  %v654_v58 = vld [vmem:[%s9462_s3 + $0x88] sm:$0xff] }
  0xe8   :  { %6934 = vmatpush3.msra.mxu1 %v677_v8  ;;  %6900 = vmatprep.subr.mxu0 %v660_v9  ;;  %v672_v61 = vld [vmem:[%s9462_s3 + $0x118] sm:$0xff]  ;;  %v671_v53 = vld [vmem:[%s9462_s3 + $0x110] sm:$0xff]  ;;  %v686_v25 = vld [vmem:[%s9462_s3 + $0x188] sm:$0xff] }
  0xe9   :  { %6935 = vmatprep.subr.mxu1 %v692_v39  ;;  %6901 = vmatpush3.msra.mxu0 %v644_v27  ;;  %v638_v8 = vld [vmem:[%s9462_s3 + $0x8] sm:$0xff]  ;;  %v653_v39 = vld [vmem:[%s9462_s3 + $0x80] sm:$0xff] }
  0xea   :  { %6936 = vmatpush3.msra.mxu1 %v676_v10  ;;  %6902 = vmatprep.subr.mxu0 %v659_v29  ;;  %v670_v9 = vld [vmem:[%s9462_s3 + $0x108] sm:$0xff]  ;;  %v685_v27 = vld [vmem:[%s9462_s3 + $0x180] sm:$0xff] }
  0xeb   :  { %6937 = vmatprep.subr.mxu1 %v691_v26  ;;  %6903 = vmatpush3.msra.mxu0 %v643_v31  ;;  %v637_v10 = vld [vmem:[%s9462_s3] sm:$0xff] }
  0xec   :  { %6938 = vmatpush3.msra.mxu1 %v675_v41  ;;  %6904 = vmatprep.subr.mxu0 %v658_v62  ;;  %v669_v31 = vld [vmem:[%s9462_s3 + $0x100] sm:$0xff]  ;;  %s7262_s3 = smov 9  }
  0xed   :  { %6939 = vmatprep.subr.mxu1 %v690_v2  ;;  %6905 = vmatpush3.msra.mxu0 %v642_v38 }
  0xee   :  { %6940 = vmatpush3.msra.mxu1 %v674_v19  ;;  %6906 = vmatprep.subr.mxu0 %v657_v33 }
  0xef   :  { %6941 = vmatprep.subr.mxu1 %v689_v34  ;;  %6907 = vmatpush3.msra.mxu0 %v641_v35 }
  0xf0   :  { %6942 = vmatpush3.msra.mxu1 %v673_v47  ;;  %6908 = vmatprep.subr.mxu0 %v656_v14 }
  0xf1   :  { %6943 = vmatprep.subr.mxu1 %v688_v60  ;;  %6909 = vmatpush3.msra.mxu0 %v640_v49 }
  0xf2   :  { %6944 = vmatpush3.msra.mxu1 %v672_v61  ;;  %6910 = vmatprep.subr.mxu0 %v655_v16 }
  0xf3   :  { %6945 = vmatprep.subr.mxu1 %v687_v36  ;;  %6911 = vmatpush3.msra.mxu0 %v639_v45 }
  0xf4   :  { %6946 = vmatpush3.msra.mxu1 %v671_v53  ;;  %6912 = vmatprep.subr.mxu0 %v654_v58 }
  0xf5   :  { %6947 = vmatprep.subr.mxu1 %v686_v25  ;;  %6913 = vmatpush3.msra.mxu0 %v638_v8 }
  0xf6   :  { %6948 = vmatpush3.msra.mxu1 %v670_v9  ;;  %6914 = vmatprep.subr.mxu0 %v653_v39 }
  0xf7   :  { %6949 = vmatprep.subr.mxu1 %v685_v27  ;;  %6915 = vmatpush3.msra.mxu0 %v637_v10 }
  0xf8   :  { %6950 = vmatpush3.msra.mxu1 %v669_v31  ;;  %7030 = vmatprep.subr.mxu0 %v9620_v23 }
  0xf9   :  { %7035 = vmatprep.subr.mxu1 %v9620_v23 }
 0x155   :  { %v7238_v29 = vpop.permute.xlu0 %7237  ;;  %v7233_v26 = vpop.permute.xlu1 %7232 }
 0x156   :  { %v7240_v41 = vunpack.i.h.bf16 %v7238_v29  ;;  %v7239_v62 = vunpack.i.l.bf16 %v7238_v29  ;;  %v7235_v2 = vunpack.i.h.bf16 %v7233_v26  ;;  %v7234_v38 = vunpack.i.l.bf16 %v7233_v26 }
 0x158   :  { %v613_v19 = vsel %vm363_vm12, %v7239_v62, %v7240_v41  ;;  %v616_v33 = vsel %vm363_vm12, %v7240_v41, %v7234_v38  ;;  %v614_v34 = vsel %vm363_vm12, %v7235_v2, %v7239_v62  ;;  %v615_v35 = vsel %vm363_vm12, %v7234_v38, %v7235_v2  ;;  %v1602_v41 = vld [vmem:[%s9463_s5] sm:$0xff] }
 0x159   :  { %v619_v47 = vmax.f32 %v603_v12, %v613_v19  ;;  %v620_v14 = vmax.f32 %v604_v22, %v616_v33  ;;  %v617_v60 = vmax.f32 %v601_v24, %v615_v35  ;;  %v618_v49 = vmax.f32 %v602_v46, %v614_v34 }
 0x15a   :  { %v842_v62 = vshra.s32 %v7487_v28, 3  ;;  %v841_v2 = vand.u32 7, %v7487_v28 }
 0x15b   :  { %v7246_v61 = vpack.i.bf16 %v620_v14, %v619_v47  ;;  %v7241_v16 = vpack.i.bf16 %v618_v49, %v617_v60 }
 0x15c   :  { %v843_v38 = vand.u32 7, %v842_v62  ;;  %vm8339_vm0 = vcmp.ge.s32.totalorder %v841_v2, 1  ;;  %vm8345_vm14 = vcmp.lt.s32.totalorder %v841_v2, 7  ;;  %v6714_v62 = vld [vmem:[%s9464_s4 + $0x30] sm:$0xff]  ;;  %v6718_v2 = vld [vmem:[%s9464_s4 + $0x38] sm:$0xff] }
 0x15d   :  { %7247 = vrot.lane.b32.xlu0 %v7246_v61, %s9519_s23  ;;  %7242 = vrot.lane.b32.xlu1 %v7241_v16, %s9519_s23  ;;  %v852_v61 = vld [vmem:[%s9464_s4] sm:$0xff]  ;;  %v6693_v16 = vld [vmem:[%s9464_s4 + $0x8] sm:$0xff] }
 0x15e   :  { %vm846_vm1 = vcmp.ge.s32.totalorder %v843_v38, 1  ;;  %vm1349_vm3 = vcmp.lt.s32.totalorder %v843_v38, 7  ;;  %v6722_v38 = vld [vmem:[%s9464_s4 + $0x40] sm:$0xff] }
 0x15f   :  { %vm848_vm10 = vmand %vm846_vm1, %vm8339_vm0  ;;  %v8353_v35 = vsel %vm846_vm1, 1.0, %v9620_v23 }
 0x160   :  { %v8350_v34 = vsel %vm848_vm10, 1.0, %v9620_v23  ;;  %vm1017_vm2 = vmand %vm846_vm1, %vm8345_vm14  ;;  %vm1789_vm10 = vcmask 64512  }
 0x161   :  { %vm1350_vm9 = vmand %vm1349_vm3, %vm8339_vm0 }
 0x162   :  { %vm1519_vm1 = vmand %vm1349_vm3, %vm8345_vm14 }
 0x1cf   :  { %v7248_v36 = vpop.permute.xlu0 %7247  ;;  %v7243_v45 = vpop.permute.xlu1 %7242 }
 0x1d0   :  { %v7250_v53 = vunpack.i.h.bf16 %v7248_v36  ;;  %v7249_v15 = vunpack.i.l.bf16 %v7248_v36  ;;  %v7245_v12 = vunpack.i.h.bf16 %v7243_v45  ;;  %v7244_v58 = vunpack.i.l.bf16 %v7243_v45 }
 0x1d1   :  { %v8368_v36 = vsel %vm8339_vm0, 1.0, %v9620_v23  ;;  %v8371_v45 = vsel %vm1017_vm2, 1.0, %v9620_v23  ;;  %vm1706_vm0 = vcmask 261120  }
 0x1d2   :  { %v630_v3 = vsel %vm483_vm7, %v7245_v12, %v7249_v15  ;;  %v632_v7 = vsel %vm483_vm7, %v7250_v53, %v7244_v58  ;;  %v631_v6 = vsel %vm483_vm7, %v7244_v58, %v7245_v12  ;;  %v629_v24 = vsel %vm483_vm7, %v7249_v15, %v7250_v53 }
 0x1d3   :  { %v634_v22 = vmax.f32 %v618_v49, %v630_v3  ;;  %v636_v46 = vmax.f32 %v620_v14, %v632_v7  ;;  %v633_v25 = vmax.f32 %v617_v60, %v631_v6  ;;  %v635_v8 = vmax.f32 %v619_v47, %v629_v24  ;;  %v6703_v3 = vld [vmem:[%s9464_s4 + $0x18] sm:$0xff]  ;;  %v6699_v7 = vld [vmem:[%s9464_s4 + $0x10] sm:$0xff] }
 0x1d4   :  { %v8395_v6 = vsel %vm1350_vm9, 1.0, %v9620_v23  ;;  %v8400_v24 = vsel %vm8345_vm14, 1.0, %v9620_v23  ;;  %vm9641_vm9 = vcmp.lt.s32.totalorder %v7487_v28, 17 }
 0x1d5   :  { %765 = vmatprep.mubr.f32.mxu0 %v634_v22  ;;  %835 = vmatprep.mubr.f32.mxu1 %v636_v46 }
 0x1d6   :  { %766 = vmatmul.mubr.f32.vlgmr.msra.gmra.mxu0 %v633_v25  ;;  %836 = vmatmul.mubr.f32.vlgmr.msra.gmra.mxu1 %v635_v8 }
 0x1d7   :  { %7032 = vmatprep.mubr.msk.f32.mxu0 %vm7261_vm5, %v9620_v23  ;;  %7037 = vmatprep.mubr.msk.f32.mxu1 %vm7261_vm5, %v9620_v23 }
 0x296   :  { %v6916_v9 = vpop.f32.mrf.mxu0  ;;  %v6951_v39 = vpop.f32.mrf.mxu1 }
 0x298   :  { %v6917_v27 = vpop.f32.mrf.mxu0  ;;  %v6952_v10 = vpop.f32.mrf.mxu1 }
 0x299   :  { %v6918_v29 = vadd.f32 %v6917_v27, %v6916_v9  ;;  %v6953_v26 = vadd.f32 %v6952_v10, %v6951_v39  ;;  %v6706_v9 = vld [vmem:[%s9464_s4 + $0x20] sm:$0xff]  ;;  %v8421_v39 = vsel %vm1519_vm1, 1.0, %v9620_v23  ;;  %v6710_v27 = vld [vmem:[%s9464_s4 + $0x28] sm:$0xff]  ;;  %v8428_v10 = vsel %vm1349_vm3, 1.0, %v9620_v23  ;;  %vm9643_vm1 = vmmov %vm9641_vm9 }
 0x29b   :  { %v8316_v31 = vadd.f32 %v6953_v26, %v6918_v29 }
 0x29d   :  { %844 = vrot.lane.b32.xlu0 %v8316_v31, %s7262_s3  ;;  %853 = vrot.lane.b32.xlu1 %v8316_v31, %s7263_s2 }
 0x2a1   :  { %1100 = vrot.lane.b32.xlu0 %v8316_v31, %s7255_s22  ;;  %1014 = vrot.lane.b32.xlu1 %v8316_v31, %s7264_s0 }
 0x2a5   :  { %1347 = vrot.lane.b32.xlu0 %v8316_v31, %s7265_s19  ;;  %1263 = vrot.lane.b32.xlu1 %v8316_v31, %s7256_s28 }
 0x2a9   :  { %1517 = vrot.lane.b32.xlu0 %v8316_v31, %s7266_s26  ;;  %1433 = vrot.lane.b32.xlu1 %v8316_v31, %s7267_s24 }
 0x2ad   :  { %1605 = vperm.xlu1 %7230, %v1602_v41  }
 0x30f   :  { %v845_v47 = vpop.permute.xlu0 %844  ;;  %v854_v14 = vpop.permute.xlu1 %853 }
 0x310   :  { %v851_v60 = vmul.f32 %v8350_v34, %v845_v47  ;;  %v857_v49 = vmul.f32 %v8353_v35, %v854_v14 }
 0x312   :  { %7031 = vmatpush3.msk.msra.mxu0 %vm864_vm8, %v857_v49  ;;  %7036 = vmatpush3.msk.msra.mxu1 %vm864_vm8, %v851_v60 }
 0x313   :  { %7038 = vmatmul.mubr.msk.f32.vlgmr.msra.gmra.mxu1 %vm860_vm15, %v852_v61  ;;  %v1101_v53 = vpop.permute.xlu0 %1100  ;;  %7033 = vmatmul.mubr.msk.f32.vlgmr.msra.gmra.mxu0 %vm860_vm15, %v6693_v16  ;;  %v1015_v15 = vpop.permute.xlu1 %1014 }
 0x314   :  { %v1104_v12 = vmul.f32 %v8368_v36, %v1101_v53  ;;  %v1020_v58 = vmul.f32 %v8371_v45, %v1015_v15  ;;  %7040 = vmatprep.subr.mxu0 %v9620_v23  ;;  %7045 = vmatprep.subr.mxu1 %v9620_v23 }
 0x315   :  { %7042 = vmatprep.mubr.msk.f32.mxu0 %vm7261_vm5, %v9620_v23  ;;  %7047 = vmatprep.mubr.msk.f32.mxu1 %vm7261_vm5, %v9620_v23 }
 0x316   :  { %7041 = vmatpush3.msk.msra.mxu0 %vm864_vm8, %v1020_v58  ;;  %7046 = vmatpush3.msk.msra.mxu1 %vm864_vm8, %v1104_v12 }
 0x317   :  { %7048 = vmatmul.mubr.msk.f32.vlgmr.msra.gmra.mxu1 %vm860_vm15, %v6703_v3  ;;  %v1348_v22 = vpop.permute.xlu0 %1347  ;;  %7043 = vmatmul.mubr.msk.f32.vlgmr.msra.gmra.mxu0 %vm860_vm15, %v6699_v7  ;;  %v1264_v46 = vpop.permute.xlu1 %1263 }
 0x318   :  { %v1353_v25 = vmul.f32 %v8395_v6, %v1348_v22  ;;  %7050 = vmatprep.subr.mxu0 %v9620_v23  ;;  %v1267_v8 = vmul.f32 %v8400_v24, %v1264_v46  ;;  %7055 = vmatprep.subr.mxu1 %v9620_v23 }
 0x319   :  { %7051 = vmatpush3.msk.msra.mxu0 %vm864_vm8, %v8316_v31  ;;  %7052 = vmatprep.mubr.msk.f32.mxu0 %vm7261_vm5, %v9620_v23 }
 0x31a   :  { %7056 = vmatpush3.msk.msra.mxu1 %vm864_vm8, %v1267_v8  ;;  %7057 = vmatprep.mubr.msk.f32.mxu1 %vm7261_vm5, %v9620_v23 }
 0x31b   :  { %7060 = vmatprep.subr.mxu0 %v9620_v23  ;;  %v1518_v29 = vpop.permute.xlu0 %1517  ;;  %7053 = vmatmul.mubr.msk.f32.vlgmr.msra.gmra.mxu0 %vm860_vm15, %v6706_v9  ;;  %v1434_v26 = vpop.permute.xlu1 %1433 }
 0x31c   :  { %v1522_v31 = vmul.f32 %v8421_v39, %v1518_v29  ;;  %7058 = vmatmul.mubr.msk.f32.vlgmr.msra.gmra.mxu1 %vm860_vm15, %v6710_v27  ;;  %7061 = vmatpush3.msk.msra.mxu0 %vm864_vm8, %v1353_v25  ;;  %v1437_v41 = vmul.f32 %v8428_v10, %v1434_v26  ;;  %v1631_v29 = vld [vmem:[%s9465_s6 + $0x78] sm:$0xff]  ;;  %v1630_v26 = vld [vmem:[%s9465_s6 + $0x70] sm:$0xff] }
 0x31d   :  { %7065 = vmatprep.subr.mxu1 %v9620_v23  ;;  %7062 = vmatprep.mubr.msk.f32.mxu0 %vm7261_vm5, %v9620_v23 }
 0x31e   :  { %7066 = vmatpush3.msk.msra.mxu1 %vm864_vm8, %v1437_v41  ;;  %7067 = vmatprep.mubr.msk.f32.mxu1 %vm7261_vm5, %v9620_v23 }
 0x31f   :  { %7070 = vmatprep.subr.mxu0 %v9620_v23  ;;  %7063 = vmatmul.mubr.msk.f32.vlgmr.msra.gmra.mxu0 %vm860_vm15, %v6714_v62 }
 0x320   :  { %7068 = vmatmul.mubr.msk.f32.vlgmr.msra.gmra.mxu1 %vm860_vm15, %v6718_v2  ;;  %7071 = vmatpush3.msk.msra.mxu0 %vm864_vm8, %v1522_v31  ;;  %v1629_v2 = vld [vmem:[%s9465_s6 + $0x68] sm:$0xff] }
 0x321   :  { %7072 = vmatprep.mubr.msk.f32.mxu0 %vm7261_vm5, %v9620_v23  ;;  %7075 = vmatprep.subr.mxu1 %v9620_v23 }
 0x322   :  { %7107 = vmatprep.mubr.msk.f32.mxu1 %vm7261_vm5, %v9620_v23  ;;  %7110 = vmatprep.subr.mxu0 %v9620_v23 }
 0x323   :  { %7073 = vmatmul.mubr.msk.f32.vlgmr.msra.gmra.mxu0 %vm860_vm15, %v6722_v38  ;;  %7076 = vmatpush3.msra.mxu1 %v1631_v29  ;;  %v1703_v29 = vld [vmem:[%s9466_s7 + $0x8] sm:$0xff] }
 0x324   :  { %7118 = vmatprep.mubr.msk.f32.mxu0 %vm7261_vm5, %v9620_v23  ;;  %7077 = vmatprep.subr.mxu1 %v9620_v23 }
 0x325   :  { %7078 = vmatpush3.msra.mxu1 %v1630_v26 }
 0x326   :  { %7079 = vmatprep.subr.mxu1 %v9620_v23 }
 0x327   :  { %7080 = vmatpush3.msra.mxu1 %v1629_v2  ;;  %v1702_v2 = vld [vmem:[%s9466_s7] sm:$0xff] }
 0x328   :  { %7081 = vmatprep.subr.mxu1 %v9620_v23 }
 0x3d3   :  { %v934_v19 = vpop.f32.mrf.mxu0  ;;  %v1010_v33 = vpop.f32.mrf.mxu1 }
 0x3d4   :  { %v1011_v60 = vadd.f32 %v1010_v33, %v934_v19  ;;  %v1628_v33 = vld [vmem:[%s9465_s6 + $0x60] sm:$0xff] }
 0x3d5   :  { %v7034_v47 = vpop.f32.mrf.mxu0  ;;  %v7039_v14 = vpop.f32.mrf.mxu1  ;;  %7082 = vmatpush3.msra.mxu1 %v1628_v33 }
 0x3d6   :  { %v1606_v47 = vpop.permute.xlu1 %1605  ;;  %7083 = vmatprep.subr.mxu1 %v9620_v23 }
 0x3d7   :  { %v1095_v49 = vpop.f32.mrf.mxu0  ;;  %v1179_v61 = vpop.f32.mrf.mxu1 }
 0x3d8   :  { %v1099_v16 = vadd.f32 %v1095_v49, %v1011_v60  ;;  %v1627_v49 = vld [vmem:[%s9465_s6 + $0x58] sm:$0xff] }
 0x3d9   :  { %v7044_v53 = vpop.f32.mrf.mxu0  ;;  %v7049_v15 = vpop.f32.mrf.mxu1  ;;  %7084 = vmatpush3.msra.mxu1 %v1627_v49 }
 0x3da   :  { %v1183_v12 = vadd.f32 %v1179_v61, %v1099_v16  ;;  %v1626_v16 = vld [vmem:[%s9465_s6 + $0x50] sm:$0xff]  ;;  %7085 = vmatprep.subr.mxu1 %v9620_v23  ;;  %v1625_v53 = vld [vmem:[%s9465_s6 + $0x48] sm:$0xff]  ;;  %v1624_v15 = vld [vmem:[%s9465_s6 + $0x40] sm:$0xff] }
 0x3db   :  { %v1258_v58 = vpop.f32.mrf.mxu0  ;;  %7086 = vmatpush3.msra.mxu1 %v1626_v16  ;;  %v6726_v16 = vld [vmem:[%s9468_s8 + $0x8] sm:$0xff] }
 0x3dc   :  { %v1262_v3 = vadd.f32 %v1258_v58, %v1183_v12  ;;  %v1342_v7 = vpop.f32.mrf.mxu1  ;;  %7087 = vmatprep.subr.mxu1 %v9620_v23  ;;  %v1623_v12 = vld [vmem:[%s9465_s6 + $0x38] sm:$0xff]  ;;  %v1622_v58 = vld [vmem:[%s9465_s6 + $0x30] sm:$0xff] }
 0x3dd   :  { %v7054_v22 = vpop.f32.mrf.mxu0  ;;  %7088 = vmatpush3.msra.mxu1 %v1625_v53 }
 0x3de   :  { %v1346_v46 = vadd.f32 %v1342_v7, %v1262_v3  ;;  %v7059_v25 = vpop.f32.mrf.mxu1  ;;  %7089 = vmatprep.subr.mxu1 %v9620_v23  ;;  %v1621_v3 = vld [vmem:[%s9465_s6 + $0x28] sm:$0xff]  ;;  %v1620_v7 = vld [vmem:[%s9465_s6 + $0x20] sm:$0xff]  ;;  %v1619_v22 = vld [vmem:[%s9465_s6 + $0x18] sm:$0xff] }
 0x3df   :  { %v1428_v8 = vpop.f32.mrf.mxu0  ;;  %7090 = vmatpush3.msra.mxu1 %v1624_v15  ;;  %v1617_v25 = vld [vmem:[%s9465_s6 + $0x8] sm:$0xff] }
 0x3e0   :  { %v1432_v9 = vadd.f32 %v1428_v8, %v1346_v46  ;;  %v1512_v27 = vpop.f32.mrf.mxu1  ;;  %7091 = vmatprep.subr.mxu1 %v9620_v23  ;;  %v1618_v46 = vld [vmem:[%s9465_s6 + $0x10] sm:$0xff]  ;;  %v1616_v8 = vld [vmem:[%s9465_s6] sm:$0xff] }
 0x3e1   :  { %v7064_v31 = vpop.f32.mrf.mxu0  ;;  %7092 = vmatpush3.msra.mxu1 %v1623_v12 }
 0x3e2   :  { %v1516_v41 = vadd.f32 %v1512_v27, %v1432_v9  ;;  %v7069_v62 = vpop.f32.mrf.mxu1  ;;  %7093 = vmatprep.subr.mxu1 %v9620_v23  ;;  %v1705_v9 = vld [vmem:[%s9466_s7 + $0x18] sm:$0xff]  ;;  %v1704_v27 = vld [vmem:[%s9466_s7 + $0x10] sm:$0xff]  ;;  %s9636_s7 = smov 111  }
 0x3e3   :  { %v1597_v38 = vpop.f32.mrf.mxu0  ;;  %7094 = vmatpush3.msra.mxu1 %v1622_v58  ;;  %7111 = vmatpush3.msra.mxu0 %v1705_v9 }
 0x3e4   :  { %v1601_v19 = vadd.f32 %v1597_v38, %v1516_v41  ;;  %7095 = vmatprep.subr.mxu1 %v9620_v23  ;;  %7112 = vmatprep.subr.mxu0 %v9620_v23 }
 0x3e5   :  { %v7074_v14 = vpop.f32.mrf.mxu0  ;;  %7096 = vmatpush3.msra.mxu1 %v1621_v3  ;;  %7113 = vmatpush3.msra.mxu0 %v1704_v27  ;;  %v1783_v3 = vld [vmem:[%s9468_s8] sm:$0xff] }
 0x3e6   :  { %v1608_v60 = vadd.f32 %v1606_v47, %v1601_v19  ;;  %7097 = vmatprep.subr.mxu1 %v9620_v23  ;;  %7114 = vmatprep.subr.mxu0 %v9620_v23  ;;  %v2486_v14 = vld [vmem:[%s9467_s9] sm:$0xff] }
 0x3e7   :  { %7098 = vmatpush3.msra.mxu1 %v1620_v7  ;;  %7115 = vmatpush3.msra.mxu0 %v1703_v29  ;;  %v6731_v29 = vld [vmem:[%s9468_s8 + $0x18] sm:$0xff] }
 0x3e8   :  { %v1609_v61 = vmax.f32 %v1608_v60, 0.0  ;;  %7099 = vmatprep.subr.mxu1 %v9620_v23  ;;  %7116 = vmatprep.subr.mxu0 %v9620_v23 }
 0x3e9   :  { %7100 = vmatpush3.msra.mxu1 %v1619_v22  ;;  %7117 = vmatpush3.msra.mxu0 %v1702_v2 }
 0x3ea   :  { %1610 = vrot.lane.b32.xlu0 %v1609_v61, %s7256_s28  ;;  %7101 = vmatprep.subr.mxu1 %v9620_v23 }
 0x3eb   :  { %7102 = vmatpush3.msra.mxu1 %v1618_v46  ;;  %7121 = vmatprep.subr.mxu0 %v9620_v23  ;;  %v6729_v46 = vld [vmem:[%s9468_s8 + $0x10] sm:$0xff] }
 0x3ec   :  { %7103 = vmatprep.subr.mxu1 %v9620_v23 }
 0x3ed   :  { %7104 = vmatpush3.msra.mxu1 %v1617_v25 }
 0x3ee   :  { %7105 = vmatprep.subr.mxu1 %v9620_v23 }
 0x3ef   :  { %7106 = vmatpush3.msra.mxu1 %v1616_v8  ;;  %v6737_v8 = vld [vmem:[%s9468_s8 + $0x30] sm:$0xff] }
 0x3f0   :  { %7151 = vmatprep.subr.mxu1 %v9620_v23 }
 0x45c   :  { %v1611_v26 = vpop.permute.xlu0 %1610 }
 0x45d   :  { %v1612_v31 = vmax.f32 %v1609_v61, %v1611_v26 }
 0x45f   :  { %1613 = vrot.lane.b32.xlu1 %v1612_v31, %s7267_s24 }
 0x4d1   :  { %v1614_v41 = vpop.permute.xlu1 %1613 }
 0x4d2   :  { %v1615_v62 = vmax.f32 %v1612_v31, %v1614_v41  ;;  %v6741_v31 = vld [vmem:[%s9468_s8 + $0x40] sm:$0xff] }
 0x4d3   :  { %v6733_v41 = vld [vmem:[%s9468_s8 + $0x20] sm:$0xff] }
 0x4d4   :  { %7108 = vmatmul.mubr.f32.vlgmr.msra.gmra.mxu1 %v1615_v62 }
 0x4d5   :  { %7153 = vmatprep.mubr.msk.f32.mxu1 %vm7261_vm5, %v9620_v23 }
 0x594   :  { %v1698_v38 = vpop.f32.mrf.mxu1 }
 0x595   :  { %7119 = vmatmul.mubr.msk.f32.vlgmr.msra.gmra.mxu0 %vm1706_vm0, %v1698_v38  ;;  %v6735_v38 = vld [vmem:[%s9468_s8 + $0x28] sm:$0xff]  ;;  %vm9644_vm0 = vmmov %vm9643_vm1 }
 0x596   :  { %v7109_v19 = vpop.f32.mrf.mxu1  ;;  %7123 = vmatprep.mubr.msk.f32.mxu0 %vm7261_vm5, %v9620_v23 }
 0x655   :  { %v1776_v33 = vpop.f32.mrf.mxu0 }
 0x656   :  { %1780 = vrot.lane.b32.xlu1 %v1776_v33, %s7262_s3  ;;  %1784 = vrot.lane.b32.xlu0 %v1776_v33, %s7263_s2 }
 0x657   :  { %v7120_v47 = vpop.f32.mrf.mxu0 }
 0x65a   :  { %2015 = vrot.lane.b32.xlu1 %v1776_v33, %s7255_s22  ;;  %1936 = vrot.lane.b32.xlu0 %v1776_v33, %s7264_s0 }
 0x65e   :  { %2249 = vrot.lane.b32.xlu1 %v1776_v33, %s7265_s19  ;;  %2170 = vrot.lane.b32.xlu0 %v1776_v33, %s7256_s28 }
 0x662   :  { %2407 = vrot.lane.b32.xlu1 %v1776_v33, %s7266_s26  ;;  %2328 = vrot.lane.b32.xlu0 %v1776_v33, %s7267_s24 }
 0x666   :  { %2489 = vperm.xlu0 %7229, %v2486_v14  }
 0x6c8   :  { %v1781_v60 = vpop.permute.xlu1 %1780  ;;  %v1785_v49 = vpop.permute.xlu0 %1784 }
 0x6c9   :  { %v1786_v61 = vmul.f32 %v8353_v35, %v1785_v49  ;;  %v1782_v53 = vmul.f32 %v8350_v34, %v1781_v60 }
 0x6cb   :  { %7122 = vmatpush3.msra.mxu0 %v1786_v61 }
 0x6cc   :  { %v2016_v15 = vpop.permute.xlu1 %2015  ;;  %7124 = vmatmul.mubr.msk.f32.vlgmr.msra.gmra.mxu0 %vm1789_vm10, %v6726_v16  ;;  %7126 = vmatprep.subr.mxu0 %v9620_v23  ;;  %v1937_v12 = vpop.permute.xlu0 %1936 }
 0x6cd   :  { %v1938_v58 = vmul.f32 %v8371_v45, %v1937_v12  ;;  %7127 = vmatpush3.msra.mxu0 %v1782_v53  ;;  %7128 = vmatprep.mubr.msk.f32.mxu0 %vm7261_vm5, %v9620_v23  ;;  %v2017_v25 = vmul.f32 %v8368_v36, %v2016_v15 }
 0x6ce   :  { %7131 = vmatprep.subr.mxu0 %v9620_v23 }
 0x6d0   :  { %v2250_v7 = vpop.permute.xlu1 %2249  ;;  %7129 = vmatmul.mubr.msk.f32.vlgmr.msra.gmra.mxu0 %vm1789_vm10, %v1783_v3  ;;  %v2171_v26 = vpop.permute.xlu0 %2170 }
 0x6d1   :  { %v2251_v22 = vmul.f32 %v8395_v6, %v2250_v7  ;;  %7132 = vmatpush3.msra.mxu0 %v1938_v58  ;;  %7133 = vmatprep.mubr.msk.f32.mxu0 %vm7261_vm5, %v9620_v23  ;;  %v2172_v62 = vmul.f32 %v8400_v24, %v2171_v26 }
 0x6d2   :  { %7136 = vmatprep.subr.mxu0 %v9620_v23 }
 0x6d3   :  { %7152 = vmatpush3.msra.mxu1 %v2251_v22 }
 0x6d4   :  { %v2408_v9 = vpop.permute.xlu1 %2407  ;;  %7134 = vmatmul.mubr.msk.f32.vlgmr.msra.gmra.mxu0 %vm1789_vm10, %v6729_v46  ;;  %7161 = vmatprep.subr.mxu1 %v9620_v23  ;;  %v2329_v2 = vpop.permute.xlu0 %2328 }
 0x6d5   :  { %v2409_v27 = vmul.f32 %v8421_v39, %v2408_v9  ;;  %7137 = vmatpush3.msra.mxu0 %v2017_v25  ;;  %7138 = vmatprep.mubr.msk.f32.mxu0 %vm7261_vm5, %v9620_v23  ;;  %v2330_v19 = vmul.f32 %v8428_v10, %v2329_v2 }
 0x6d6   :  { %7141 = vmatprep.subr.mxu0 %v9620_v23  ;;  %7154 = vmatmul.mubr.msk.f32.vlgmr.msra.gmra.mxu1 %vm1789_vm10, %v6737_v8 }
 0x6d7   :  { %7162 = vmatpush3.msra.mxu1 %v2409_v27  ;;  %7163 = vmatprep.mubr.msk.f32.mxu1 %vm7261_vm5, %v9620_v23 }
 0x6d8   :  { %7139 = vmatmul.mubr.msk.f32.vlgmr.msra.gmra.mxu0 %vm1789_vm10, %v6731_v29  ;;  %7171 = vmatprep.subr.mxu1 %v9620_v23 }
 0x6d9   :  { %7142 = vmatpush3.msra.mxu0 %v1776_v33  ;;  %7143 = vmatprep.mubr.msk.f32.mxu0 %vm7261_vm5, %v9620_v23  ;;  %v6739_v33 = vld [vmem:[%s9468_s8 + $0x38] sm:$0xff] }
 0x6da   :  { %7146 = vmatprep.subr.mxu0 %v9620_v23  ;;  %7164 = vmatmul.mubr.msk.f32.vlgmr.msra.gmra.mxu1 %vm1789_vm10, %v6741_v31 }
 0x6db   :  { %7173 = vmatprep.mubr.msk.f32.mxu1 %vm7261_vm5, %v9620_v23 }
 0x6dc   :  { %7144 = vmatmul.mubr.msk.f32.vlgmr.msra.gmra.mxu0 %vm1789_vm10, %v6733_v41 }
 0x6dd   :  { %7147 = vmatpush3.msra.mxu0 %v2172_v62  ;;  %7148 = vmatprep.mubr.msk.f32.mxu0 %vm7261_vm5, %v9620_v23 }
 0x6de   :  { %7156 = vmatprep.subr.mxu0 %v9620_v23 }
 0x6e0   :  { %7149 = vmatmul.mubr.msk.f32.vlgmr.msra.gmra.mxu0 %vm1789_vm10, %v6735_v38 }
 0x6e1   :  { %7157 = vmatpush3.msra.mxu0 %v2330_v19  ;;  %7158 = vmatprep.mubr.msk.f32.mxu0 %vm7261_vm5, %v9620_v23 }
 0x6e2   :  { %7166 = vmatprep.subr.mxu0 %v9620_v23 }
 0x6e4   :  { %7159 = vmatmul.mubr.msk.f32.vlgmr.msra.gmra.mxu0 %vm1789_vm10, %v6739_v33  ;;  %v2490_v33 = vpop.permute.xlu0 %2489 }
 0x6e5   :  { %7168 = vmatprep.mubr.msk.f32.mxu0 %vm7261_vm5, %v9620_v23 }
 0x78c   :  { %v1859_v47 = vpop.f32.mrf.mxu0 }
 0x78e   :  { %v7125_v14 = vpop.f32.mrf.mxu0 }
 0x790   :  { %v1932_v60 = vpop.f32.mrf.mxu0 }
 0x791   :  { %v1933_v58 = vadd.f32 %v1932_v60, %v1859_v47  ;;  %v3199_v47 = vld [vmem:[%s9469_s11] sm:$0xf] }
 0x792   :  { %v7130_v49 = vpop.f32.mrf.mxu0 }
 0x794   :  { %v2010_v61 = vpop.f32.mrf.mxu0 }
 0x795   :  { %v2014_v22 = vadd.f32 %v2010_v61, %v1933_v58 }
 0x796   :  { %v7135_v16 = vpop.f32.mrf.mxu0  ;;  %v2323_v53 = vpop.f32.mrf.mxu1 }
 0x798   :  { %v2089_v15 = vpop.f32.mrf.mxu0  ;;  %v7155_v12 = vpop.f32.mrf.mxu1 }
 0x799   :  { %v2093_v8 = vadd.f32 %v2089_v15, %v2014_v22  ;;  %v2497_v15 = vld [vmem:[%s9470_s10] sm:$0xf]  ;;  %v6743_v12 = vld [vmem:[%s9470_s10 + $0x4] sm:$0xf]  ;;  %v6746_v22 = vld [vmem:[%s9470_s10 + $0x8] sm:$0xf] }
 0x79a   :  { %v7140_v3 = vpop.f32.mrf.mxu0  ;;  %v2481_v7 = vpop.f32.mrf.mxu1 }
 0x79c   :  { %v2165_v46 = vpop.f32.mrf.mxu0  ;;  %v7165_v25 = vpop.f32.mrf.mxu1 }
 0x79d   :  { %v2169_v27 = vadd.f32 %v2165_v46, %v2093_v8  ;;  %v6750_v8 = vld [vmem:[%s9470_s10 + $0x10] sm:$0xf] }
 0x79e   :  { %v7145_v9 = vpop.f32.mrf.mxu0 }
 0x79f   :  { %v6752_v9 = vld [vmem:[%s9470_s10 + $0x14] sm:$0xf] }
 0x7a0   :  { %v2244_v29 = vpop.f32.mrf.mxu0 }
 0x7a1   :  { %v2248_v26 = vadd.f32 %v2244_v29, %v2169_v27 }
 0x7a2   :  { %v7150_v31 = vpop.f32.mrf.mxu0 }
 0x7a3   :  { %v2327_v41 = vadd.f32 %v2323_v53, %v2248_v26  ;;  %v6754_v26 = vld [vmem:[%s9470_s10 + $0x18] sm:$0xf]  ;;  %v6756_v31 = vld [vmem:[%s9470_s10 + $0x1c] sm:$0xf] }
 0x7a4   :  { %v2402_v62 = vpop.f32.mrf.mxu0 }
 0x7a5   :  { %v2406_v2 = vadd.f32 %v2402_v62, %v2327_v41  ;;  %v3267_v41 = vld [vmem:[%s9471_s12 + $0x1e0] sm:$0xff] }
 0x7a6   :  { %v7160_v38 = vpop.f32.mrf.mxu0  ;;  %v6758_v62 = vld [vmem:[%s9470_s10 + $0x20] sm:$0xf] }
 0x7a7   :  { %v2485_v19 = vadd.f32 %v2481_v7, %v2406_v2  ;;  %v6748_v7 = vld [vmem:[%s9470_s10 + $0xc] sm:$0xf]  ;;  %v3269_v38 = vld [vmem:[%s9471_s12 + $0x1f0] sm:$0xff] }
 0x7a8   :  { %v3264_v2 = vld [vmem:[%s9471_s12 + $0x1c8] sm:$0xff] }
 0x7a9   :  { %v2492_v14 = vadd.f32 %v2490_v33, %v2485_v19  ;;  %v3263_v19 = vld [vmem:[%s9471_s12 + $0x1c0] sm:$0xff]  ;;  %v3266_v33 = vld [vmem:[%s9471_s12 + $0x1d8] sm:$0xff] }
 0x7ab   :  { %v2493_v49 = vmax.f32 %v2492_v14, 0.0  ;;  %v3260_v14 = vld [vmem:[%s9471_s12 + $0x1a8] sm:$0xff] }
 0x7ad   :  { %2494 = vrot.lane.b32.xlu0 %v2493_v49, %s7262_s3  ;;  %2498 = vrot.lane.b32.xlu1 %v2493_v49, %s7263_s2 }
 0x7b1   :  { %2728 = vrot.lane.b32.xlu0 %v2493_v49, %s7255_s22  ;;  %2649 = vrot.lane.b32.xlu1 %v2493_v49, %s7264_s0 }
 0x7b5   :  { %2962 = vrot.lane.b32.xlu0 %v2493_v49, %s7265_s19  ;;  %2883 = vrot.lane.b32.xlu1 %v2493_v49, %s7256_s28 }
 0x7b9   :  { %3120 = vrot.lane.b32.xlu0 %v2493_v49, %s7266_s26  ;;  %3041 = vrot.lane.b32.xlu1 %v2493_v49, %s7267_s24 }
 0x7bd   :  { %3202 = vperm.xlu1 %7230, %v3199_v47   ;;  %v3259_v47 = vld [vmem:[%s9471_s12 + $0x1a0] sm:$0xff] }
 0x81f   :  { %v2495_v60 = vpop.permute.xlu0 %2494  ;;  %v2499_v61 = vpop.permute.xlu1 %2498 }
 0x820   :  { %v2496_v16 = vmul.f32 %v8350_v34, %v2495_v60  ;;  %v2500_v53 = vmul.f32 %v8353_v35, %v2499_v61  ;;  %v3262_v60 = vld [vmem:[%s9471_s12 + $0x1b8] sm:$0xff]  ;;  %v3256_v61 = vld [vmem:[%s9471_s12 + $0x188] sm:$0xff] }
 0x822   :  { %7167 = vmatpush3.msra.mxu0 %v2500_v53  ;;  %7172 = vmatpush3.msra.mxu1 %v2496_v16  ;;  %v3261_v16 = vld [vmem:[%s9471_s12 + $0x1b0] sm:$0xff]  ;;  %v3255_v53 = vld [vmem:[%s9471_s12 + $0x180] sm:$0xff] }
 0x823   :  { %7174 = vmatmul.mubr.msk.f32.vlgmr.msra.gmra.mxu1 %vm1789_vm10, %v2497_v15  ;;  %v2729_v58 = vpop.permute.xlu0 %2728  ;;  %7169 = vmatmul.mubr.msk.f32.vlgmr.msra.gmra.mxu0 %vm1789_vm10, %v6743_v12  ;;  %v2650_v3 = vpop.permute.xlu1 %2649  ;;  %v3258_v15 = vld [vmem:[%s9471_s12 + $0x198] sm:$0xff]  ;;  %v3252_v12 = vld [vmem:[%s9471_s12 + $0x168] sm:$0xff] }
 0x824   :  { %v2730_v34 = vmul.f32 %v8368_v36, %v2729_v58  ;;  %v2651_v35 = vmul.f32 %v8371_v45, %v2650_v3  ;;  %7176 = vmatprep.subr.mxu0 %v9620_v23  ;;  %7181 = vmatprep.subr.mxu1 %v9620_v23  ;;  %v3257_v58 = vld [vmem:[%s9471_s12 + $0x190] sm:$0xff]  ;;  %v3254_v3 = vld [vmem:[%s9471_s12 + $0x178] sm:$0xff] }
 0x825   :  { %7178 = vmatprep.mubr.msk.f32.mxu0 %vm7261_vm5, %v9620_v23  ;;  %7183 = vmatprep.mubr.msk.f32.mxu1 %vm7261_vm5, %v9620_v23 }
 0x826   :  { %7177 = vmatpush3.msra.mxu0 %v2651_v35  ;;  %7182 = vmatpush3.msra.mxu1 %v2730_v34  ;;  %v3251_v34 = vld [vmem:[%s9471_s12 + $0x160] sm:$0xff]  ;;  %v3253_v35 = vld [vmem:[%s9471_s12 + $0x170] sm:$0xff] }
 0x827   :  { %7184 = vmatmul.mubr.msk.f32.vlgmr.msra.gmra.mxu1 %vm1789_vm10, %v6748_v7  ;;  %v2963_v36 = vpop.permute.xlu0 %2962  ;;  %7179 = vmatmul.mubr.msk.f32.vlgmr.msra.gmra.mxu0 %vm1789_vm10, %v6746_v22  ;;  %v2884_v45 = vpop.permute.xlu1 %2883  ;;  %v3248_v7 = vld [vmem:[%s9471_s12 + $0x148] sm:$0xff]  ;;  %v3250_v22 = vld [vmem:[%s9471_s12 + $0x158] sm:$0xff] }
 0x828   :  { %v2964_v46 = vmul.f32 %v8395_v6, %v2963_v36  ;;  %7186 = vmatprep.subr.mxu0 %v9620_v23  ;;  %v2885_v25 = vmul.f32 %v8400_v24, %v2884_v45  ;;  %7191 = vmatprep.subr.mxu1 %v9620_v23  ;;  %v3247_v36 = vld [vmem:[%s9471_s12 + $0x140] sm:$0xff]  ;;  %v3249_v45 = vld [vmem:[%s9471_s12 + $0x150] sm:$0xff] }
 0x829   :  { %7187 = vmatpush3.msra.mxu0 %v2493_v49  ;;  %7188 = vmatprep.mubr.msk.f32.mxu0 %vm7261_vm5, %v9620_v23  ;;  %v3265_v49 = vld [vmem:[%s9471_s12 + $0x1d0] sm:$0xff] }
 0x82a   :  { %7192 = vmatpush3.msra.mxu1 %v2885_v25  ;;  %7193 = vmatprep.mubr.msk.f32.mxu1 %vm7261_vm5, %v9620_v23  ;;  %v3246_v25 = vld [vmem:[%s9471_s12 + $0x138] sm:$0xff] }
 0x82b   :  { %7196 = vmatprep.subr.mxu0 %v9620_v23  ;;  %v3121_v6 = vpop.permute.xlu0 %3120  ;;  %7189 = vmatmul.mubr.msk.f32.vlgmr.msra.gmra.mxu0 %vm1789_vm10, %v6750_v8  ;;  %v3042_v24 = vpop.permute.xlu1 %3041  ;;  %v3243_v8 = vld [vmem:[%s9471_s12 + $0x120] sm:$0xff] }
 0x82c   :  { %v3122_v27 = vmul.f32 %v8421_v39, %v3121_v6  ;;  %7194 = vmatmul.mubr.msk.f32.vlgmr.msra.gmra.mxu1 %vm1789_vm10, %v6752_v9  ;;  %7197 = vmatpush3.msra.mxu0 %v2964_v46  ;;  %v3043_v29 = vmul.f32 %v8428_v10, %v3042_v24  ;;  %v3268_v39 = vld [vmem:[%s9471_s12 + $0x1e8] sm:$0xff]  ;;  %v3270_v10 = vld [vmem:[%s9471_s12 + $0x1f8] sm:$0xff]  ;;  %v3245_v9 = vld [vmem:[%s9471_s12 + $0x130] sm:$0xff] }
 0x82d   :  { %7201 = vmatprep.subr.mxu1 %v9620_v23  ;;  %7198 = vmatprep.mubr.msk.f32.mxu0 %vm7261_vm5, %v9620_v23  ;;  %v3244_v46 = vld [vmem:[%s9471_s12 + $0x128] sm:$0xff]  ;;  %v3242_v24 = vld [vmem:[%s9471_s12 + $0x118] sm:$0xff] }
 0x82e   :  { %7202 = vmatpush3.msra.mxu1 %v3043_v29  ;;  %7203 = vmatprep.mubr.msk.f32.mxu1 %vm7261_vm5, %v9620_v23  ;;  %v3240_v6 = vld [vmem:[%s9471_s12 + $0x108] sm:$0xff]  ;;  %v3241_v29 = vld [vmem:[%s9471_s12 + $0x110] sm:$0xff] }
 0x82f   :  { %7206 = vmatprep.subr.mxu0 %v9620_v23  ;;  %7199 = vmatmul.mubr.msk.f32.vlgmr.msra.gmra.mxu0 %vm1789_vm10, %v6754_v26  ;;  %v3236_v26 = vld [vmem:[%s9471_s12 + $0xe8] sm:$0xff] }
 0x830   :  { %7204 = vmatmul.mubr.msk.f32.vlgmr.msra.gmra.mxu1 %vm1789_vm10, %v6756_v31  ;;  %7207 = vmatpush3.msra.mxu0 %v3122_v27  ;;  %v3239_v27 = vld [vmem:[%s9471_s12 + $0x100] sm:$0xff]  ;;  %v3238_v31 = vld [vmem:[%s9471_s12 + $0xf8] sm:$0xff] }
 0x831   :  { %7208 = vmatprep.mubr.msk.f32.mxu0 %vm7261_vm5, %v9620_v23  ;;  %3271 = vmatprep.subr.mxu1 %v3268_v39  ;;  %v3235_v39 = vld [vmem:[%s9471_s12 + $0xe0] sm:$0xff]  ;;  %vm9637_vm5 = vcmp.lt.s32.totalorder %v7487_v28, 16 }
 0x832   :  { %3342 = vmatprep.subr.mxu0 %v3270_v10  ;;  %3272 = vmatpush1.msra.mxu1 %v3267_v41  ;;  %v3237_v10 = vld [vmem:[%s9471_s12 + $0xf0] sm:$0xff]  ;;  %v3232_v41 = vld [vmem:[%s9471_s12 + $0xc8] sm:$0xff]  ;;  %vm9638_vm14 = vmmov %vm9637_vm5 }
 0x833   :  { %7209 = vmatmul.mubr.msk.f32.vlgmr.msra.gmra.mxu0 %vm1789_vm10, %v6758_v62  ;;  %3273 = vmatprep.subr.mxu1 %v3264_v2  ;;  %v3234_v62 = vld [vmem:[%s9471_s12 + $0xd8] sm:$0xff]  ;;  %v3231_v2 = vld [vmem:[%s9471_s12 + $0xc0] sm:$0xff]  ;;  %vm9639_vm2 = vmmov %vm9637_vm5 }
 0x834   :  { %3343 = vmatpush1.msra.mxu0 %v3269_v38  ;;  %3274 = vmatpush1.msra.mxu1 %v3263_v19  ;;  %v3233_v38 = vld [vmem:[%s9471_s12 + $0xd0] sm:$0xff]  ;;  %v3228_v19 = vld [vmem:[%s9471_s12 + $0xa8] sm:$0xff]  ;;  %vm9640_vm3 = vmmov %vm9639_vm2 }
 0x835   :  { %3344 = vmatprep.subr.mxu0 %v3266_v33  ;;  %3275 = vmatprep.subr.mxu1 %v3260_v14  ;;  %v3230_v33 = vld [vmem:[%s9471_s12 + $0xb8] sm:$0xff]  ;;  %v3227_v14 = vld [vmem:[%s9471_s12 + $0xa0] sm:$0xff]  ;;  %vm9645_vm10 = vmmov %vm9644_vm0 }
 0x836   :  { %3345 = vmatpush1.msra.mxu0 %v3265_v49  ;;  %3276 = vmatpush1.msra.mxu1 %v3259_v47  ;;  %v3229_v49 = vld [vmem:[%s9471_s12 + $0xb0] sm:$0xff]  ;;  %v3224_v47 = vld [vmem:[%s9471_s12 + $0x88] sm:$0xff] }
 0x837   :  { %3346 = vmatprep.subr.mxu0 %v3262_v60  ;;  %3277 = vmatprep.subr.mxu1 %v3256_v61  ;;  %v3226_v60 = vld [vmem:[%s9471_s12 + $0x98] sm:$0xff]  ;;  %v3223_v61 = vld [vmem:[%s9471_s12 + $0x80] sm:$0xff] }
 0x838   :  { %3347 = vmatpush1.msra.mxu0 %v3261_v16  ;;  %3278 = vmatpush1.msra.mxu1 %v3255_v53  ;;  %v3225_v16 = vld [vmem:[%s9471_s12 + $0x90] sm:$0xff]  ;;  %v3220_v53 = vld [vmem:[%s9471_s12 + $0x68] sm:$0xff] }
 0x839   :  { %3348 = vmatprep.subr.mxu0 %v3258_v15  ;;  %3279 = vmatprep.subr.mxu1 %v3252_v12  ;;  %v3222_v15 = vld [vmem:[%s9471_s12 + $0x78] sm:$0xff]  ;;  %v3219_v12 = vld [vmem:[%s9471_s12 + $0x60] sm:$0xff] }
 0x83a   :  { %3349 = vmatpush1.msra.mxu0 %v3257_v58  ;;  %3335 = vmatprep.mubr.f32.mxu1 %v9620_v23  ;;  %v3221_v58 = vld [vmem:[%s9471_s12 + $0x70] sm:$0xff] }
 0x83b   :  { %3350 = vmatprep.subr.mxu0 %v3254_v3  ;;  %3406 = vmatprep.mubr.f32.mxu0 %v9620_v23  ;;  %v3216_v3 = vld [vmem:[%s9471_s12 + $0x48] sm:$0xff] }
 0x83c   :  { %3280 = vmatpush1.msra.mxu1 %v3251_v34  ;;  %3351 = vmatpush1.msra.mxu0 %v3253_v35  ;;  %v3218_v34 = vld [vmem:[%s9471_s12 + $0x58] sm:$0xff]  ;;  %v3215_v35 = vld [vmem:[%s9471_s12 + $0x40] sm:$0xff] }
 0x83d   :  { %3281 = vmatprep.subr.mxu1 %v3248_v7  ;;  %3352 = vmatprep.subr.mxu0 %v3250_v22  ;;  %v3217_v7 = vld [vmem:[%s9471_s12 + $0x50] sm:$0xff]  ;;  %v3212_v22 = vld [vmem:[%s9471_s12 + $0x28] sm:$0xff] }
 0x83e   :  { %3282 = vmatpush1.msra.mxu1 %v3247_v36  ;;  %3353 = vmatpush1.msra.mxu0 %v3249_v45  ;;  %v3214_v36 = vld [vmem:[%s9471_s12 + $0x38] sm:$0xff]  ;;  %v3211_v45 = vld [vmem:[%s9471_s12 + $0x20] sm:$0xff] }
 0x83f   :  { %3283 = vmatprep.subr.mxu1 %v3244_v46  ;;  %3354 = vmatprep.subr.mxu0 %v3246_v25  ;;  %v3213_v46 = vld [vmem:[%s9471_s12 + $0x30] sm:$0xff]  ;;  %v3208_v25 = vld [vmem:[%s9471_s12 + $0x8] sm:$0xff] }
 0x840   :  { %3284 = vmatpush1.msra.mxu1 %v3243_v8  ;;  %3355 = vmatpush1.msra.mxu0 %v3245_v9  ;;  %v3210_v8 = vld [vmem:[%s9471_s12 + $0x18] sm:$0xff]  ;;  %v3207_v9 = vld [vmem:[%s9471_s12] sm:$0xff] }
 0x841   :  { %3285 = vmatprep.subr.mxu1 %v3240_v6  ;;  %3356 = vmatprep.subr.mxu0 %v3242_v24  ;;  %v3209_v6 = vld [vmem:[%s9471_s12 + $0x10] sm:$0xff]  ;;  %s9634_s12 = smov 113  }
 0x842   :  { %3286 = vmatpush1.msra.mxu1 %v3239_v27  ;;  %3357 = vmatpush1.msra.mxu0 %v3241_v29 }
 0x843   :  { %3287 = vmatprep.subr.mxu1 %v3236_v26  ;;  %3358 = vmatprep.subr.mxu0 %v3238_v31 }
 0x844   :  { %3288 = vmatpush1.msra.mxu1 %v3235_v39  ;;  %3359 = vmatpush1.msra.mxu0 %v3237_v10 }
 0x845   :  { %3289 = vmatprep.subr.mxu1 %v3232_v41  ;;  %3360 = vmatprep.subr.mxu0 %v3234_v62 }
 0x846   :  { %3290 = vmatpush1.msra.mxu1 %v3231_v2  ;;  %3361 = vmatpush1.msra.mxu0 %v3233_v38 }
 0x847   :  { %3291 = vmatprep.subr.mxu1 %v3228_v19  ;;  %3362 = vmatprep.subr.mxu0 %v3230_v33 }
 0x848   :  { %3292 = vmatpush1.msra.mxu1 %v3227_v14  ;;  %3363 = vmatpush1.msra.mxu0 %v3229_v49 }
 0x849   :  { %3293 = vmatprep.subr.mxu1 %v3224_v47  ;;  %3364 = vmatprep.subr.mxu0 %v3226_v60 }
 0x84a   :  { %3294 = vmatpush1.msra.mxu1 %v3223_v61  ;;  %3365 = vmatpush1.msra.mxu0 %v3225_v16 }
 0x84b   :  { %3295 = vmatprep.subr.mxu1 %v3220_v53  ;;  %3366 = vmatprep.subr.mxu0 %v3222_v15 }
 0x84c   :  { %3296 = vmatpush1.msra.mxu1 %v3219_v12  ;;  %3367 = vmatpush1.msra.mxu0 %v3221_v58 }
 0x84d   :  { %3297 = vmatprep.subr.mxu1 %v3216_v3  ;;  %3368 = vmatprep.subr.mxu0 %v3218_v34 }
 0x84e   :  { %3298 = vmatpush1.msra.mxu1 %v3215_v35  ;;  %3369 = vmatpush1.msra.mxu0 %v3217_v7  ;;  %v3203_v35 = vpop.permute.xlu1 %3202 }
 0x84f   :  { %3299 = vmatprep.subr.mxu1 %v3212_v22  ;;  %3370 = vmatprep.subr.mxu0 %v3214_v36 }
 0x850   :  { %3300 = vmatpush1.msra.mxu1 %v3211_v45  ;;  %3371 = vmatpush1.msra.mxu0 %v3213_v46 }
 0x851   :  { %3301 = vmatprep.subr.mxu1 %v3208_v25  ;;  %3372 = vmatprep.subr.mxu0 %v3210_v8 }
 0x852   :  { %3302 = vmatpush1.msra.mxu1 %v3207_v9  ;;  %3373 = vmatpush1.msra.mxu0 %v3209_v6  ;;  %v4999_v9 = vld [vmem:[%s9472_s14] sm:$0xf] }
 0x8e3   :  { %v2572_v24 = vpop.f32.mrf.mxu0  ;;  %v2645_v27 = vpop.f32.mrf.mxu1 }
 0x8e4   :  { %v2646_v31 = vadd.f32 %v2645_v27, %v2572_v24 }
 0x8e5   :  { %v7170_v29 = vpop.f32.mrf.mxu0  ;;  %v7175_v26 = vpop.f32.mrf.mxu1 }
 0x8e7   :  { %v2723_v39 = vpop.f32.mrf.mxu0  ;;  %v2802_v10 = vpop.f32.mrf.mxu1 }
 0x8e8   :  { %v2727_v41 = vadd.f32 %v2723_v39, %v2646_v31 }
 0x8e9   :  { %v7180_v62 = vpop.f32.mrf.mxu0  ;;  %v7185_v2 = vpop.f32.mrf.mxu1 }
 0x8ea   :  { %v2806_v38 = vadd.f32 %v2802_v10, %v2727_v41 }
 0x8eb   :  { %v2878_v19 = vpop.f32.mrf.mxu0 }
 0x8ec   :  { %v2882_v33 = vadd.f32 %v2878_v19, %v2806_v38  ;;  %v2957_v14 = vpop.f32.mrf.mxu1  ;;  %v6760_v19 = vld [vmem:[%s9473_s13 + $0x4] sm:$0xf] }
 0x8ed   :  { %v7190_v49 = vpop.f32.mrf.mxu0 }
 0x8ee   :  { %v2961_v47 = vadd.f32 %v2957_v14, %v2882_v33  ;;  %v7195_v60 = vpop.f32.mrf.mxu1 }
 0x8ef   :  { %v3036_v61 = vpop.f32.mrf.mxu0 }
 0x8f0   :  { %v3040_v16 = vadd.f32 %v3036_v61, %v2961_v47  ;;  %v3115_v53 = vpop.f32.mrf.mxu1  ;;  %v9642_v47 = vld [vmem:[#allocation7_spill] sm:$0xff] }
 0x8f1   :  { %v7200_v15 = vpop.f32.mrf.mxu0 }
 0x8f2   :  { %v3119_v12 = vadd.f32 %v3115_v53, %v3040_v16  ;;  %v7205_v58 = vpop.f32.mrf.mxu1 }
 0x8f3   :  { %v3194_v3 = vpop.f32.mrf.mxu0  ;;  %v9646_v58 = vld [vmem:[#allocation5_spill] sm:$0xff] }
 0x8f4   :  { %v3198_v34 = vadd.f32 %v3194_v3, %v3119_v12 }
 0x8f5   :  { %v7210_v7 = vpop.f32.mrf.mxu0 }
 0x8f6   :  { %v3205_v22 = vadd.f32 %v3203_v35, %v3198_v34  ;;  %v9647_v34 = vld [vmem:[#allocation6_spill] sm:$0xff] }
 0x8f8   :  { %v3206_v36 = vmax.f32 %v3205_v22, 0.0  ;;  %v3429_v22 = vld [vmem:[%s9473_s13] sm:$0xf] }
 0x8fa   :  { %3336 = vmatmul.mubr.f32.vlgmr.msra.gmra.mxu1 %v3206_v36  ;;  %3407 = vmatmul.mubr.f32.vlgmr.msra.gmra.mxu0 %v3206_v36  ;;  %v9648_v36 = vld [vmem:[#allocation8_spill] sm:$0xff] }
 0x8fb   :  { %3527 = vmatprep.mubr.f32.mxu1 %v9620_v23  ;;  %3598 = vmatprep.mubr.f32.mxu0 %v9620_v23 }
 0x9ba   :  { %v8907_v45 = vpop.f32.mrf.mxu1  ;;  %v8911_v46 = vpop.f32.mrf.mxu0 }
 0x9bb   :  { %3430 = vrot.lane.b32.xlu0 %v8907_v45, %s7253_s30 }
 0x9bc   :  { %v8913_v25 = vpop.f32.mrf.mxu1  ;;  %v8919_v8 = vpop.f32.mrf.mxu0 }
 0x9bd   :  { %3432 = vrot.lane.b32.xlu1 %v8913_v25, %s7253_s30 }
 0x9bf   :  { %3434 = vrot.lane.b32.xlu0 %v8911_v46, %s7253_s30 }
 0x9c1   :  { %3436 = vrot.lane.b32.xlu1 %v8919_v8, %s7253_s30 }
 0x9c3   :  { %3413 = vrot.lane.b32.xlu0 %v8907_v45, %s7252_s27 }
 0x9c5   :  { %3415 = vrot.lane.b32.xlu1 %v8913_v25, %s7252_s27 }
 0x9c7   :  { %3417 = vrot.lane.b32.xlu0 %v8911_v46, %s7252_s27 }
 0x9c9   :  { %3419 = vrot.lane.b32.xlu1 %v8919_v8, %s7252_s27 }
 0x9cb   :  { %3762 = vrot.lane.b32.xlu0 %v8907_v45, %s7254_s1 }
 0x9cd   :  { %3764 = vrot.lane.b32.xlu1 %v8913_v25, %s7254_s1 }
 0x9cf   :  { %3766 = vrot.lane.b32.xlu0 %v8911_v46, %s7254_s1 }
 0x9d1   :  { %3768 = vrot.lane.b32.xlu1 %v8919_v8, %s7254_s1 }
 0x9d3   :  { %3941 = vrot.lane.b32.xlu0 %v8907_v45, %s7255_s22 }
 0x9d5   :  { %3943 = vrot.lane.b32.xlu1 %v8913_v25, %s7255_s22 }
 0x9d7   :  { %3945 = vrot.lane.b32.xlu0 %v8911_v46, %s7255_s22 }
 0x9d9   :  { %3947 = vrot.lane.b32.xlu1 %v8919_v8, %s7255_s22 }
 0x9db   :  { %4283 = vrot.lane.b32.xlu0 %v8907_v45, %s7256_s28 }
 0x9dd   :  { %4285 = vrot.lane.b32.xlu1 %v8913_v25, %s7256_s28 }
 0x9df   :  { %4287 = vrot.lane.b32.xlu0 %v8911_v46, %s7256_s28 }
 0x9e1   :  { %4289 = vrot.lane.b32.xlu1 %v8919_v8, %s7256_s28 }
 0x9e3   :  { %4462 = vrot.lane.b32.xlu0 %v8907_v45, %s9634_s12 }
 0x9e5   :  { %4464 = vrot.lane.b32.xlu1 %v8913_v25, %s9634_s12 }
 0x9e7   :  { %4466 = vrot.lane.b32.xlu0 %v8911_v46, %s9634_s12 }
 0x9e9   :  { %4468 = vrot.lane.b32.xlu1 %v8919_v8, %s9634_s12 }
 0x9eb   :  { %4641 = vrot.lane.b32.xlu0 %v8907_v45, %s9635_s18 }
 0x9ed   :  { %4643 = vrot.lane.b32.xlu1 %v8913_v25, %s9635_s18 }
 0x9ef   :  { %4645 = vrot.lane.b32.xlu0 %v8911_v46, %s9635_s18 }
 0x9f1   :  { %4647 = vrot.lane.b32.xlu1 %v8919_v8, %s9635_s18 }
 0x9f3   :  { %4820 = vrot.lane.b32.xlu0 %v8907_v45, %s9636_s7 }
 0x9f5   :  { %4822 = vrot.lane.b32.xlu1 %v8913_v25, %s9636_s7 }
 0x9f7   :  { %4824 = vrot.lane.b32.xlu0 %v8911_v46, %s9636_s7 }
 0x9f9   :  { %4826 = vrot.lane.b32.xlu1 %v8919_v8, %s9636_s7 }
 0x9fb   :  { %5002 = vperm.xlu0 %7229, %v4999_v9  }
 0xa2d   :  { %v3431_v6 = vpop.permute.xlu0 %3430 }
 0xa2f   :  { %v3433_v24 = vpop.permute.xlu1 %3432 }
 0xa30   :  { %v3440_v27 = vsel %vm9637_vm5, %v3431_v6, %v3433_v24  ;;  %vm9651_vm5 = vmmov %vm9639_vm2 }
 0xa31   :  { %v3443_v29 = vmul.f32 %v7658_v20, %v3440_v27  ;;  %v3435_v26 = vpop.permute.xlu0 %3434  ;;  %v9649_v27 = vld [vmem:[#allocation9_spill] sm:$0xff] }
 0xa32   :  { %v3439_v31 = vsel %vm9638_vm14, %v3433_v24, %v3435_v26  ;;  %vm9652_vm14 = vmmov %vm9639_vm2 }
 0xa33   :  { %6761 = vmatprep.subr.msk.mxu1 %vm864_vm8, %v3443_v29  ;;  %v3437_v39 = vpop.permute.xlu1 %3436  ;;  %v3444_v33 = vmul.f32 %v7663_v21, %v3439_v31 }
 0xa34   :  { %v3438_v10 = vsel %vm9639_vm2, %v3435_v26, %v3437_v39  ;;  %v3441_v41 = vsel %vm9640_vm3, %v3437_v39, %v3431_v6  ;;  %vm9653_vm3 = vmmov %vm9639_vm2 }
 0xa35   :  { %v3442_v62 = vmul.f32 %v7639_v17, %v3441_v41  ;;  %v3445_v2 = vmul.f32 %v7668_v30, %v3438_v10  ;;  %v3414_v38 = vpop.permute.xlu0 %3413 }
 0xa37   :  { %6762 = vmatpush1.msk.msra.mxu1 %vm864_vm8, %v3442_v62  ;;  %6764 = vmatprep.subr.msk.mxu0 %vm864_vm8, %v3445_v2  ;;  %v3416_v14 = vpop.permute.xlu1 %3415  ;;  %v9650_v62 = vld [vmem:[#allocation10_spill] sm:$0xff] }
 0xa38   :  { %v3423_v49 = vsel %vm9641_vm9, %v3414_v38, %v3416_v14  ;;  %6765 = vmatpush1.msk.msra.mxu0 %vm864_vm8, %v3444_v33  ;;  %6763 = vmatmul.mubr.msk.f32.vlgmr.msra.gmra.mxu1 %vm860_vm15, %v6760_v19  ;;  %v6773_v33 = vld [vmem:[%s9473_s13 + $0x8] sm:$0xf]  ;;  %vm9654_vm9 = vmmov %vm9644_vm0 }
 0xa39   :  { %v3426_v60 = vmul.f32 %v9642_v47, %v3423_v49  ;;  %v3418_v61 = vpop.permute.xlu0 %3417  ;;  %6766 = vmatmul.mubr.msk.f32.vlgmr.msra.gmra.mxu0 %vm860_vm15, %v6760_v19  ;;  %3684 = vmatprep.mubr.f32.mxu1 %v9620_v23 }
 0xa3a   :  { %3755 = vmatprep.mubr.f32.mxu0 %v9620_v23  ;;  %v3422_v16 = vsel %vm9643_vm1, %v3416_v14, %v3418_v61  ;;  %vm9655_vm1 = vmmov %vm9644_vm0 }
 0xa3b   :  { %6767 = vmatprep.subr.msk.mxu1 %vm864_vm8, %v3426_v60  ;;  %v3420_v53 = vpop.permute.xlu1 %3419  ;;  %v3427_v9 = vmul.f32 %v9648_v36, %v3422_v16 }
 0xa3c   :  { %v3421_v15 = vsel %vm9644_vm0, %v3418_v61, %v3420_v53  ;;  %v3424_v12 = vsel %vm9645_vm10, %v3420_v53, %v3414_v38  ;;  %vm9656_vm10 = vmmov %vm9644_vm0 }
 0xa3d   :  { %v3425_v3 = vmul.f32 %v9646_v58, %v3424_v12  ;;  %v3428_v35 = vmul.f32 %v9647_v34, %v3421_v15  ;;  %v3763_v7 = vpop.permute.xlu0 %3762 }
 0xa3f   :  { %6768 = vmatpush1.msk.msra.mxu1 %vm864_vm8, %v3425_v3  ;;  %6770 = vmatprep.subr.msk.mxu0 %vm864_vm8, %v3428_v35  ;;  %v3765_v6 = vpop.permute.xlu1 %3764 }
 0xa40   :  { %v3772_v24 = vsel %vm228_vm6, %v3763_v7, %v3765_v6  ;;  %6771 = vmatpush1.msk.msra.mxu0 %vm864_vm8, %v3427_v9  ;;  %6769 = vmatmul.mubr.msk.f32.vlgmr.msra.gmra.mxu1 %vm860_vm15, %v3429_v22  ;;  %v6780_v9 = vld [vmem:[%s9473_s13 + $0xc] sm:$0xf] }
 0xa41   :  { %v3775_v29 = vmul.f32 %v9649_v27, %v3772_v24  ;;  %v3767_v26 = vpop.permute.xlu0 %3766  ;;  %6772 = vmatmul.mubr.msk.f32.vlgmr.msra.gmra.mxu0 %vm860_vm15, %v3429_v22  ;;  %3859 = vmatprep.mubr.f32.mxu1 %v9620_v23 }
 0xa42   :  { %3930 = vmatprep.mubr.f32.mxu0 %v9620_v23  ;;  %v3771_v31 = vsel %vm228_vm6, %v3765_v6, %v3767_v26 }
 0xa43   :  { %6774 = vmatprep.subr.msk.mxu1 %vm864_vm8, %v3775_v29  ;;  %v3769_v39 = vpop.permute.xlu1 %3768  ;;  %v3776_v14 = vmul.f32 %v7709_v43, %v3771_v31  ;;  %v6787_v31 = vld [vmem:[%s9473_s13 + $0x10] sm:$0xf] }
 0xa44   :  { %v3770_v10 = vsel %vm228_vm6, %v3767_v26, %v3769_v39  ;;  %v3773_v41 = vsel %vm228_vm6, %v3769_v39, %v3763_v7 }
 0xa45   :  { %v3774_v2 = vmul.f32 %v9650_v62, %v3773_v41  ;;  %v3777_v38 = vmul.f32 %v7719_v48, %v3770_v10  ;;  %v3942_v19 = vpop.permute.xlu0 %3941 }
 0xa47   :  { %6775 = vmatpush1.msk.msra.mxu1 %vm864_vm8, %v3774_v2  ;;  %6777 = vmatprep.subr.msk.mxu0 %vm864_vm8, %v3777_v38  ;;  %v3944_v49 = vpop.permute.xlu1 %3943 }
 0xa48   :  { %v3951_v60 = vsel %vm292_vm13, %v3942_v19, %v3944_v49  ;;  %6778 = vmatpush1.msk.msra.mxu0 %vm864_vm8, %v3776_v14  ;;  %6776 = vmatmul.mubr.msk.f32.vlgmr.msra.gmra.mxu1 %vm860_vm15, %v6773_v33 }
 0xa49   :  { %v3954_v61 = vmul.f32 %v7729_v55, %v3951_v60  ;;  %v3946_v16 = vpop.permute.xlu0 %3945  ;;  %6779 = vmatmul.mubr.msk.f32.vlgmr.msra.gmra.mxu0 %vm860_vm15, %v6773_v33  ;;  %4038 = vmatprep.mubr.f32.mxu1 %v9620_v23 }
 0xa4a   :  { %4109 = vmatprep.mubr.f32.mxu0 %v9620_v23  ;;  %v3950_v53 = vsel %vm292_vm13, %v3944_v49, %v3946_v16 }
 0xa4b   :  { %6781 = vmatprep.subr.msk.mxu1 %vm864_vm8, %v3954_v61  ;;  %v3948_v15 = vpop.permute.xlu1 %3947  ;;  %v3955_v6 = vmul.f32 %v7734_v57, %v3950_v53 }
 0xa4c   :  { %v3949_v12 = vsel %vm292_vm13, %v3946_v16, %v3948_v15  ;;  %v3952_v3 = vsel %vm292_vm13, %v3948_v15, %v3942_v19  ;;  %v6794_v19 = vld [vmem:[%s9473_s13 + $0x14] sm:$0xf] }
 0xa4d   :  { %v3953_v35 = vmul.f32 %v7739_v59, %v3952_v3  ;;  %v3956_v7 = vmul.f32 %v7744_v63, %v3949_v12  ;;  %v4284_v22 = vpop.permute.xlu0 %4283  ;;  %v6801_v3 = vld [vmem:[%s9473_s13 + $0x18] sm:$0xf] }
 0xa4f   :  { %6782 = vmatpush1.msk.msra.mxu1 %vm864_vm8, %v3953_v35  ;;  %6784 = vmatprep.subr.msk.mxu0 %vm864_vm8, %v3956_v7  ;;  %v4286_v24 = vpop.permute.xlu1 %4285 }
 0xa50   :  { %6783 = vmatmul.mubr.msk.f32.vlgmr.msra.gmra.mxu1 %vm860_vm15, %v6780_v9  ;;  %6785 = vmatpush1.msk.msra.mxu0 %vm864_vm8, %v3955_v6  ;;  %v4293_v29 = vsel %vm363_vm12, %v4284_v22, %v4286_v24 }
 0xa51   :  { %6788 = vmatprep.subr.msk.mxu1 %vm864_vm8, %v8913_v25  ;;  %v4288_v26 = vpop.permute.xlu0 %4287  ;;  %6786 = vmatmul.mubr.msk.f32.vlgmr.msra.gmra.mxu0 %vm860_vm15, %v6780_v9  ;;  %v4295_v41 = vmul.f32 %v7749_v54, %v4293_v29 }
 0xa52   :  { %v4292_v39 = vsel %vm363_vm12, %v4286_v24, %v4288_v26  ;;  %6789 = vmatpush1.msk.msra.mxu1 %vm864_vm8, %v8907_v45  ;;  %6791 = vmatprep.subr.msk.mxu0 %vm864_vm8, %v8919_v8 }
 0xa53   :  { %v4296_v10 = vmul.f32 %v7754_v56, %v4292_v39  ;;  %6792 = vmatpush1.msk.msra.mxu0 %vm864_vm8, %v8911_v46  ;;  %4201 = vmatprep.mubr.f32.mxu1 %v9620_v23  ;;  %v4290_v25 = vpop.permute.xlu1 %4289 }
 0xa54   :  { %v4291_v2 = vsel %vm363_vm12, %v4288_v26, %v4290_v25  ;;  %v4294_v38 = vsel %vm363_vm12, %v4290_v25, %v4284_v22  ;;  %6790 = vmatmul.mubr.msk.f32.vlgmr.msra.gmra.mxu1 %vm860_vm15, %v6787_v31  ;;  %4272 = vmatprep.mubr.f32.mxu0 %v9620_v23 }
 0xa55   :  { %v4297_v45 = vmul.f32 %v7759_v50, %v4291_v2  ;;  %v4298_v8 = vmul.f32 %v7764_v51, %v4294_v38  ;;  %v4463_v46 = vpop.permute.xlu0 %4462  ;;  %6793 = vmatmul.mubr.msk.f32.vlgmr.msra.gmra.mxu0 %vm860_vm15, %v6787_v31  ;;  %6795 = vmatprep.subr.msk.mxu1 %vm864_vm8, %v4296_v10 }
 0xa56   :  { %6796 = vmatpush1.msk.msra.mxu1 %vm864_vm8, %v4295_v41  ;;  %4380 = vmatprep.mubr.f32.mxu1 %v9620_v23  ;;  %v6808_v41 = vld [vmem:[%s9473_s13 + $0x1c] sm:$0xf] }
 0xa57   :  { %6798 = vmatprep.subr.msk.mxu0 %vm864_vm8, %v4298_v8  ;;  %v4465_v33 = vpop.permute.xlu1 %4464  ;;  %4451 = vmatprep.mubr.f32.mxu0 %v9620_v23 }
 0xa58   :  { %6797 = vmatmul.mubr.msk.f32.vlgmr.msra.gmra.mxu1 %vm860_vm15, %v6794_v19  ;;  %6799 = vmatpush1.msk.msra.mxu0 %vm864_vm8, %v4297_v45  ;;  %v4472_v14 = vsel %vm419_vm11, %v4463_v46, %v4465_v33 }
 0xa59   :  { %v4467_v49 = vpop.permute.xlu0 %4466  ;;  %6800 = vmatmul.mubr.msk.f32.vlgmr.msra.gmra.mxu0 %vm860_vm15, %v6794_v19  ;;  %4559 = vmatprep.mubr.f32.mxu1 %v9620_v23  ;;  %v4474_v53 = vmul.f32 %v9626_v52, %v4472_v14 }
 0xa5a   :  { %v4471_v60 = vsel %vm419_vm11, %v4465_v33, %v4467_v49  ;;  %4630 = vmatprep.mubr.f32.mxu0 %v9620_v23 }
 0xa5b   :  { %v4475_v61 = vmul.f32 %v7786_v0, %v4471_v60  ;;  %v4469_v16 = vpop.permute.xlu1 %4468 }
 0xa5c   :  { %v4470_v15 = vsel %vm419_vm11, %v4467_v49, %v4469_v16  ;;  %v4473_v12 = vsel %vm419_vm11, %v4469_v16, %v4463_v46 }
 0xa5d   :  { %v4476_v35 = vmul.f32 %v7791_v1, %v4470_v15  ;;  %v4477_v7 = vmul.f32 %v9623_v18, %v4473_v12  ;;  %v4642_v22 = vpop.permute.xlu0 %4641  ;;  %6802 = vmatprep.subr.msk.mxu1 %vm864_vm8, %v4475_v61 }
 0xa5e   :  { %6803 = vmatpush1.msk.msra.mxu1 %vm864_vm8, %v4474_v53  ;;  %v6815_v53 = vld [vmem:[%s9473_s13 + $0x20] sm:$0xf] }
 0xa5f   :  { %6804 = vmatmul.mubr.msk.f32.vlgmr.msra.gmra.mxu1 %vm860_vm15, %v6801_v3  ;;  %6805 = vmatprep.subr.msk.mxu0 %vm864_vm8, %v4477_v7  ;;  %v4644_v9 = vpop.permute.xlu1 %4643 }
 0xa60   :  { %6806 = vmatpush1.msk.msra.mxu0 %vm864_vm8, %v4476_v35  ;;  %4738 = vmatprep.mubr.f32.mxu1 %v9620_v23  ;;  %v4651_v6 = vsel %vm483_vm7, %v4642_v22, %v4644_v9 }
 0xa61   :  { %v4646_v24 = vpop.permute.xlu0 %4645  ;;  %6807 = vmatmul.mubr.msk.f32.vlgmr.msra.gmra.mxu0 %vm860_vm15, %v6801_v3  ;;  %v4653_v39 = vmul.f32 %v9624_v5, %v4651_v6  ;;  %v22_v3 = vstv %s9474_s16 }
 0xa62   :  { %v4650_v29 = vsel %vm483_vm7, %v4644_v9, %v4646_v24  ;;  %4809 = vmatprep.mubr.f32.mxu0 %v9620_v23  ;;  %23 = vst [vmem:[#allocation2] sm:$0x1] %v22_v3 }
 0xa63   :  { %v4654_v26 = vmul.f32 %v9625_v40, %v4650_v29  ;;  %v4648_v31 = vpop.permute.xlu1 %4647 }
 0xa64   :  { %v4649_v10 = vsel %vm483_vm7, %v4646_v24, %v4648_v31  ;;  %v4652_v25 = vsel %vm483_vm7, %v4648_v31, %v4642_v22 }
 0xa65   :  { %v4655_v2 = vmul.f32 %v9627_v37, %v4649_v10  ;;  %v4656_v38 = vmul.f32 %v9628_v11, %v4652_v25  ;;  %v4821_v45 = vpop.permute.xlu0 %4820  ;;  %6809 = vmatprep.subr.msk.mxu1 %vm864_vm8, %v4654_v26 }
 0xa66   :  { %6810 = vmatpush1.msk.msra.mxu1 %vm864_vm8, %v4653_v39 }
 0xa67   :  { %6811 = vmatmul.mubr.msk.f32.vlgmr.msra.gmra.mxu1 %vm860_vm15, %v6808_v41  ;;  %6812 = vmatprep.subr.msk.mxu0 %vm864_vm8, %v4656_v38  ;;  %v4823_v8 = vpop.permute.xlu1 %4822 }
 0xa68   :  { %6813 = vmatpush1.msk.msra.mxu0 %vm864_vm8, %v4655_v2  ;;  %4917 = vmatprep.mubr.f32.mxu1 %v9620_v23  ;;  %v4830_v46 = vsel %vm539_vm4, %v4821_v45, %v4823_v8 }
 0xa69   :  { %v4825_v19 = vpop.permute.xlu0 %4824  ;;  %6814 = vmatmul.mubr.msk.f32.vlgmr.msra.gmra.mxu0 %vm860_vm15, %v6808_v41  ;;  %v4832_v60 = vmul.f32 %v9629_v44, %v4830_v46 }
 0xa6a   :  { %v4829_v33 = vsel %vm539_vm4, %v4823_v8, %v4825_v19  ;;  %4988 = vmatprep.mubr.f32.mxu0 %v9620_v23 }
 0xa6b   :  { %v4833_v14 = vmul.f32 %v7850_v42, %v4829_v33  ;;  %v4827_v49 = vpop.permute.xlu1 %4826 }
 0xa6c   :  { %v4828_v61 = vsel %vm539_vm4, %v4825_v19, %v4827_v49  ;;  %v4831_v16 = vsel %vm539_vm4, %v4827_v49, %v4821_v45 }
 0xa6d   :  { %v4834_v15 = vmul.f32 %v7982_v32, %v4828_v61  ;;  %v4835_v12 = vmul.f32 %v7985_v13, %v4831_v16  ;;  %6816 = vmatprep.subr.msk.mxu1 %vm864_vm8, %v4833_v14 }
 0xa6e   :  { %6817 = vmatpush1.msk.msra.mxu1 %vm864_vm8, %v4832_v60 }
 0xa6f   :  { %6818 = vmatmul.mubr.msk.f32.vlgmr.msra.gmra.mxu1 %vm860_vm15, %v6815_v53  ;;  %6819 = vmatprep.subr.msk.mxu0 %vm864_vm8, %v4835_v12 }
 0xa70   :  { %6820 = vmatpush1.msk.msra.mxu0 %vm864_vm8, %v4834_v15  ;;  %5127 = vmatprep.mubr.f32.mxu1 %v9620_v23 }
 0xa71   :  { %6821 = vmatmul.mubr.msk.f32.vlgmr.msra.gmra.mxu0 %vm860_vm15, %v6815_v53 }
 0xa72   :  { %5198 = vmatprep.mubr.f32.mxu0 %v9620_v23 }
 0xaf8   :  { %v3529_v35 = vpop.f32.mrf.mxu1 }
 0xaf9   :  { %v3600_v7 = vpop.f32.mrf.mxu0 }
 0xafa   :  { %v3531_v22 = vpop.f32.mrf.mxu1 }
 0xafb   :  { %v3602_v9 = vpop.f32.mrf.mxu0 }
 0xb00   :  { %v3686_v6 = vpop.f32.mrf.mxu1 }
 0xb01   :  { %v3757_v24 = vpop.f32.mrf.mxu0  ;;  %v3687_v33 = vadd.f32 %v3686_v6, %v3529_v35 }
 0xb02   :  { %v3688_v29 = vpop.f32.mrf.mxu1  ;;  %v3758_v49 = vadd.f32 %v3757_v24, %v3600_v7 }
 0xb03   :  { %v3759_v26 = vpop.f32.mrf.mxu0  ;;  %v3689_v61 = vadd.f32 %v3688_v29, %v3531_v22 }
 0xb04   :  { %v3760_v16 = vadd.f32 %v3759_v26, %v3602_v9 }
 0xb08   :  { %v3861_v31 = vpop.f32.mrf.mxu1 }
 0xb09   :  { %v3932_v39 = vpop.f32.mrf.mxu0  ;;  %v3937_v53 = vadd.f32 %v3861_v31, %v3687_v33 }
 0xb0a   :  { %v3863_v10 = vpop.f32.mrf.mxu1  ;;  %v3939_v12 = vadd.f32 %v3932_v39, %v3758_v49 }
 0xb0b   :  { %v3934_v25 = vpop.f32.mrf.mxu0  ;;  %v3938_v4 = vadd.f32 %v3863_v10, %v3689_v61 }
 0xb0c   :  { %v3940_v13 = vadd.f32 %v3934_v25, %v3760_v16 }
 0xb10   :  { %v4040_v41 = vpop.f32.mrf.mxu1 }
 0xb11   :  { %v4111_v2 = vpop.f32.mrf.mxu0  ;;  %v4116_v32 = vadd.f32 %v4040_v41, %v3937_v53 }
 0xb12   :  { %v4042_v38 = vpop.f32.mrf.mxu1  ;;  %v4118_v11 = vadd.f32 %v4111_v2, %v3939_v12 }
 0xb13   :  { %v4113_v45 = vpop.f32.mrf.mxu0  ;;  %v4117_v5 = vadd.f32 %v4042_v38, %v3938_v4 }
 0xb14   :  { %v4203_v8 = vpop.f32.mrf.mxu1  ;;  %v4119_v40 = vadd.f32 %v4113_v45, %v3940_v13  ;;  %v5003_v13 = vpop.permute.xlu0 %5002 }
 0xb15   :  { %v4274_v46 = vpop.f32.mrf.mxu0  ;;  %v4279_v18 = vadd.f32 %v4203_v8, %v4116_v32 }
 0xb16   :  { %v4205_v19 = vpop.f32.mrf.mxu1  ;;  %v4281_v6 = vadd.f32 %v4274_v46, %v4118_v11 }
 0xb17   :  { %v4276_v14 = vpop.f32.mrf.mxu0  ;;  %v4280_v22 = vadd.f32 %v4205_v19, %v4117_v5 }
 0xb18   :  { %v4382_v60 = vpop.f32.mrf.mxu1  ;;  %v4282_v9 = vadd.f32 %v4276_v14, %v4119_v40 }
 0xb19   :  { %v4453_v15 = vpop.f32.mrf.mxu0  ;;  %v4458_v29 = vadd.f32 %v4382_v60, %v4279_v18 }
 0xb1a   :  { %v4384_v3 = vpop.f32.mrf.mxu1  ;;  %v4460_v31 = vadd.f32 %v4453_v15, %v4281_v6 }
 0xb1b   :  { %v4455_v44 = vpop.f32.mrf.mxu0  ;;  %v4459_v39 = vadd.f32 %v4384_v3, %v4280_v22  ;;  %v6599_v3 = vld [vmem:[#allocation2] sm:$0x1] }
 0xb1c   :  { %v4461_v41 = vadd.f32 %v4455_v44, %v4282_v9 }
 0xb1f   :  { %v4561_v42 = vpop.f32.mrf.mxu1 }
 0xb20   :  { %v4637_v10 = vadd.f32 %v4561_v42, %v4458_v29 }
 0xb21   :  { %v4632_v37 = vpop.f32.mrf.mxu0  ;;  %v4563_v35 = vpop.f32.mrf.mxu1 }
 0xb22   :  { %v4638_v33 = vadd.f32 %v4563_v35, %v4459_v39  ;;  %v4639_v49 = vadd.f32 %v4632_v37, %v4460_v31 }
 0xb23   :  { %v4634_v7 = vpop.f32.mrf.mxu0 }
 0xb24   :  { %v4640_v32 = vadd.f32 %v4634_v7, %v4461_v41 }
 0xb27   :  { %v4740_v24 = vpop.f32.mrf.mxu1 }
 0xb28   :  { %v4816_v2 = vadd.f32 %v4740_v24, %v4637_v10 }
 0xb29   :  { %v4811_v26 = vpop.f32.mrf.mxu0  ;;  %v4742_v25 = vpop.f32.mrf.mxu1 }
 0xb2a   :  { %v4817_v38 = vadd.f32 %v4742_v25, %v4638_v33  ;;  %v4818_v11 = vadd.f32 %v4811_v26, %v4639_v49 }
 0xb2b   :  { %v4813_v61 = vpop.f32.mrf.mxu0 }
 0xb2c   :  { %v4819_v40 = vadd.f32 %v4813_v61, %v4640_v32 }
 0xb2f   :  { %v4919_v4 = vpop.f32.mrf.mxu1 }
 0xb30   :  { %v4995_v45 = vadd.f32 %v4919_v4, %v4816_v2 }
 0xb31   :  { %v4921_v8 = vpop.f32.mrf.mxu1  ;;  %v4990_v5 = vpop.f32.mrf.mxu0 }
 0xb32   :  { %v5005_v18 = vadd.f32 %v5003_v13, %v4995_v45  ;;  %v4996_v46 = vadd.f32 %v4921_v8, %v4817_v38  ;;  %v4997_v19 = vadd.f32 %v4990_v5, %v4818_v11  ;;  %v5029_v38 = vld [vmem:[%s9475_s15] sm:$0x1] }
 0xb33   :  { %v4992_v14 = vpop.f32.mrf.mxu0 }
 0xb34   :  { %v9184_v42 = vmax.f32 %v5005_v18, 0.0  ;;  %v5006_v44 = vadd.f32 %v5003_v13, %v4996_v46  ;;  %v5007_v60 = vadd.f32 %v5003_v13, %v4997_v19  ;;  %v4998_v37 = vadd.f32 %v4992_v14, %v4819_v40  ;;  %v6835_v14 = vld [vmem:[%s9475_s15 + $0x2] sm:$0x1] }
 0xb36   :  { %v9186_v16 = vmax.f32 %v5006_v44, 0.0  ;;  %v5008_v53 = vadd.f32 %v5003_v13, %v4998_v37  ;;  %5030 = vrot.lane.b32.xlu1 %v9184_v42, %s7253_s30  ;;  %v9190_v15 = vmax.f32 %v5007_v60, 0.0 }
 0xb38   :  { %5032 = vrot.lane.b32.xlu0 %v9186_v16, %s7253_s30  ;;  %v9194_v12 = vmax.f32 %v5008_v53, 0.0 }
 0xb3a   :  { %5034 = vrot.lane.b32.xlu1 %v9190_v15, %s7253_s30 }
 0xb3c   :  { %5036 = vrot.lane.b32.xlu0 %v9194_v12, %s7253_s30 }
 0xb3e   :  { %5013 = vrot.lane.b32.xlu1 %v9184_v42, %s7252_s27 }
 0xb40   :  { %5015 = vrot.lane.b32.xlu0 %v9186_v16, %s7252_s27 }
 0xb42   :  { %5017 = vrot.lane.b32.xlu1 %v9190_v15, %s7252_s27 }
 0xb44   :  { %5019 = vrot.lane.b32.xlu0 %v9194_v12, %s7252_s27 }
 0xb46   :  { %5362 = vrot.lane.b32.xlu1 %v9184_v42, %s7254_s1 }
 0xb48   :  { %5364 = vrot.lane.b32.xlu0 %v9186_v16, %s7254_s1 }
 0xb4a   :  { %5366 = vrot.lane.b32.xlu1 %v9190_v15, %s7254_s1 }
 0xb4c   :  { %5368 = vrot.lane.b32.xlu0 %v9194_v12, %s7254_s1 }
 0xb4e   :  { %5541 = vrot.lane.b32.xlu1 %v9184_v42, %s7255_s22 }
 0xb50   :  { %5543 = vrot.lane.b32.xlu0 %v9186_v16, %s7255_s22 }
 0xb52   :  { %5545 = vrot.lane.b32.xlu1 %v9190_v15, %s7255_s22 }
 0xb54   :  { %5547 = vrot.lane.b32.xlu0 %v9194_v12, %s7255_s22 }
 0xb56   :  { %5883 = vrot.lane.b32.xlu1 %v9184_v42, %s7256_s28 }
 0xb58   :  { %5885 = vrot.lane.b32.xlu0 %v9186_v16, %s7256_s28 }
 0xb5a   :  { %5887 = vrot.lane.b32.xlu1 %v9190_v15, %s7256_s28 }
 0xb5c   :  { %5889 = vrot.lane.b32.xlu0 %v9194_v12, %s7256_s28 }
 0xb5e   :  { %6062 = vrot.lane.b32.xlu1 %v9184_v42, %s9634_s12 }
 0xb60   :  { %6064 = vrot.lane.b32.xlu0 %v9186_v16, %s9634_s12 }
 0xb62   :  { %6066 = vrot.lane.b32.xlu1 %v9190_v15, %s9634_s12 }
 0xb64   :  { %6068 = vrot.lane.b32.xlu0 %v9194_v12, %s9634_s12 }
 0xb66   :  { %6241 = vrot.lane.b32.xlu1 %v9184_v42, %s9635_s18 }
 0xb68   :  { %6243 = vrot.lane.b32.xlu0 %v9186_v16, %s9635_s18 }
 0xb6a   :  { %6245 = vrot.lane.b32.xlu1 %v9190_v15, %s9635_s18 }
 0xb6c   :  { %6247 = vrot.lane.b32.xlu0 %v9194_v12, %s9635_s18 }
 0xb6e   :  { %6420 = vrot.lane.b32.xlu1 %v9184_v42, %s9636_s7 }
 0xb70   :  { %6422 = vrot.lane.b32.xlu0 %v9186_v16, %s9636_s7 }
 0xb72   :  { %6424 = vrot.lane.b32.xlu1 %v9190_v15, %s9636_s7 }
 0xb74   :  { %6426 = vrot.lane.b32.xlu0 %v9194_v12, %s9636_s7 }
 0xb76   :  { %6602 = vperm.xlu1 %7230, %v6599_v3  }
 0xba8   :  { %v5031_v35 = vpop.permute.xlu1 %5030 }
 0xbaa   :  { %v5033_v6 = vpop.permute.xlu0 %5032 }
 0xbab   :  { %v5040_v7 = vsel %vm9651_vm5, %v5031_v35, %v5033_v6 }
 0xbac   :  { %v5043_v24 = vmul.f32 %v7658_v20, %v5040_v7  ;;  %v5035_v22 = vpop.permute.xlu1 %5034  ;;  %v6822_v20 = vld [vmem:[%s9475_s15 + $0x1] sm:$0x1] }
 0xbad   :  { %v5039_v9 = vsel %vm9652_vm14, %v5033_v6, %v5035_v22 }
 0xbae   :  { %v5037_v29 = vpop.permute.xlu0 %5036  ;;  %6823 = vmatprep.subr.msk.mxu1 %vm864_vm8, %v5043_v24  ;;  %v5044_v41 = vmul.f32 %v7663_v21, %v5039_v9 }
 0xbaf   :  { %v5038_v26 = vsel %vm9639_vm2, %v5035_v22, %v5037_v29  ;;  %v5041_v31 = vsel %vm9653_vm3, %v5037_v29, %v5031_v35  ;;  %v6842_v22 = vld [vmem:[%s9475_s15 + $0x3] sm:$0x1] }
 0xbb0   :  { %v5042_v39 = vmul.f32 %v7639_v17, %v5041_v31  ;;  %v5045_v10 = vmul.f32 %v7668_v30, %v5038_v26  ;;  %v5014_v25 = vpop.permute.xlu1 %5013 }
 0xbb2   :  { %v5016_v33 = vpop.permute.xlu0 %5015  ;;  %6824 = vmatpush1.msk.msra.mxu1 %vm864_vm8, %v5042_v39  ;;  %6826 = vmatprep.subr.msk.mxu0 %vm864_vm8, %v5045_v10 }
 0xbb3   :  { %v5023_v49 = vsel %vm9654_vm9, %v5014_v25, %v5016_v33  ;;  %6827 = vmatpush1.msk.msra.mxu0 %vm864_vm8, %v5044_v41  ;;  %6825 = vmatmul.mubr.msk.f32.vlgmr.msra.gmra.mxu1 %vm860_vm15, %v6822_v20 }
 0xbb4   :  { %v5026_v17 = vmul.f32 %v9642_v47, %v5023_v49  ;;  %v5018_v30 = vpop.permute.xlu1 %5017  ;;  %6828 = vmatmul.mubr.msk.f32.vlgmr.msra.gmra.mxu0 %vm860_vm15, %v6822_v20  ;;  %5284 = vmatprep.mubr.f32.mxu1 %v9620_v23 }
 0xbb5   :  { %5355 = vmatprep.mubr.f32.mxu0 %v9620_v23  ;;  %v5022_v21 = vsel %vm9655_vm1, %v5016_v33, %v5018_v30 }
 0xbb6   :  { %v5020_v2 = vpop.permute.xlu0 %5019  ;;  %6829 = vmatprep.subr.msk.mxu1 %vm864_vm8, %v5026_v17  ;;  %v5027_v11 = vmul.f32 %v9648_v36, %v5022_v21 }
 0xbb7   :  { %v5021_v61 = vsel %vm9644_vm0, %v5018_v30, %v5020_v2  ;;  %v5024_v4 = vsel %vm9656_vm10, %v5020_v2, %v5014_v25  ;;  %v6863_v30 = vld [vmem:[%s9475_s15 + $0x6] sm:$0x1]  ;;  %v9657_v2 = vld [vmem:[#allocation12_spill] sm:$0xff] }
 0xbb8   :  { %v5025_v47 = vmul.f32 %v9646_v58, %v5024_v4  ;;  %v5028_v13 = vmul.f32 %v9647_v34, %v5021_v61  ;;  %v5363_v32 = vpop.permute.xlu1 %5362 }
 0xbba   :  { %v5365_v45 = vpop.permute.xlu0 %5364  ;;  %6830 = vmatpush1.msk.msra.mxu1 %vm864_vm8, %v5025_v47  ;;  %6832 = vmatprep.subr.msk.mxu0 %vm864_vm8, %v5028_v13  ;;  %v9658_v13 = vld [vmem:[#allocation14_spill] sm:$0xff] }
 0xbbb   :  { %v5372_v8 = vsel %vm228_vm6, %v5363_v32, %v5365_v45  ;;  %6833 = vmatpush1.msk.msra.mxu0 %vm864_vm8, %v5027_v11  ;;  %6831 = vmatmul.mubr.msk.f32.vlgmr.msra.gmra.mxu1 %vm860_vm15, %v5029_v38  ;;  %v9659_v11 = vld [vmem:[#allocation13_spill] sm:$0xff] }
 0xbbc   :  { %v5375_v58 = vmul.f32 %v9649_v27, %v5372_v8  ;;  %v5367_v34 = vpop.permute.xlu1 %5366  ;;  %6834 = vmatmul.mubr.msk.f32.vlgmr.msra.gmra.mxu0 %vm860_vm15, %v5029_v38  ;;  %5459 = vmatprep.mubr.f32.mxu1 %v9620_v23 }
 0xbbd   :  { %5530 = vmatprep.mubr.f32.mxu0 %v9620_v23  ;;  %v5371_v36 = vsel %vm228_vm6, %v5365_v45, %v5367_v34 }
 0xbbe   :  { %v5369_v5 = vpop.permute.xlu0 %5368  ;;  %6836 = vmatprep.subr.msk.mxu1 %vm864_vm8, %v5375_v58  ;;  %v5376_v44 = vmul.f32 %v7709_v43, %v5371_v36  ;;  %v9660_v36 = vld [vmem:[#allocation15_spill] sm:$0xff] }
 0xbbf   :  { %v5370_v40 = vsel %vm228_vm6, %v5367_v34, %v5369_v5  ;;  %v5373_v18 = vsel %vm228_vm6, %v5369_v5, %v5363_v32  ;;  %v6870_v34 = vld [vmem:[%s9475_s15 + $0x7] sm:$0x1] }
 0xbc0   :  { %v5374_v27 = vmul.f32 %v9650_v62, %v5373_v18  ;;  %v5377_v46 = vmul.f32 %v7719_v48, %v5370_v40  ;;  %v5542_v19 = vpop.permute.xlu1 %5541  ;;  %v9661_v40 = vld [vmem:[#allocation16_spill] sm:$0xff] }
 0xbc2   :  { %v5544_v60 = vpop.permute.xlu0 %5543  ;;  %6837 = vmatpush1.msk.msra.mxu1 %vm864_vm8, %v5374_v27  ;;  %6839 = vmatprep.subr.msk.mxu0 %vm864_vm8, %v5377_v46 }
 0xbc3   :  { %v5551_v37 = vsel %vm292_vm13, %v5542_v19, %v5544_v60  ;;  %6840 = vmatpush1.msk.msra.mxu0 %vm864_vm8, %v5376_v44  ;;  %6838 = vmatmul.mubr.msk.f32.vlgmr.msra.gmra.mxu1 %vm860_vm15, %v6835_v14 }
 0xbc4   :  { %v5554_v48 = vmul.f32 %v7729_v55, %v5551_v37  ;;  %v5546_v62 = vpop.permute.xlu1 %5545  ;;  %6841 = vmatmul.mubr.msk.f32.vlgmr.msra.gmra.mxu0 %vm860_vm15, %v6835_v14  ;;  %5638 = vmatprep.mubr.f32.mxu1 %v9620_v23 }
 0xbc5   :  { %5709 = vmatprep.mubr.f32.mxu0 %v9620_v23  ;;  %v5550_v43 = vsel %vm292_vm13, %v5544_v60, %v5546_v62  ;;  %v9662_v60 = vld [vmem:[#allocation18_spill] sm:$0xff] }
 0xbc6   :  { %v5548_v53 = vpop.permute.xlu0 %5547  ;;  %6843 = vmatprep.subr.msk.mxu1 %vm864_vm8, %v5554_v48  ;;  %v5555_v24 = vmul.f32 %v7734_v57, %v5550_v43 }
 0xbc7   :  { %v5549_v3 = vsel %vm292_vm13, %v5546_v62, %v5548_v53  ;;  %v5552_v35 = vsel %vm292_vm13, %v5548_v53, %v5542_v19  ;;  %v9663_v62 = vld [vmem:[#allocation17_spill] sm:$0xff] }
 0xbc8   :  { %v5553_v55 = vmul.f32 %v7739_v59, %v5552_v35  ;;  %v5556_v6 = vmul.f32 %v7744_v63, %v5549_v3  ;;  %v5884_v7 = vpop.permute.xlu1 %5883  ;;  %v6877_v35 = vld [vmem:[%s9475_s15 + $0x8] sm:$0x1] }
 0xbca   :  { %v5886_v9 = vpop.permute.xlu0 %5885  ;;  %6844 = vmatpush1.msk.msra.mxu1 %vm864_vm8, %v5553_v55  ;;  %6846 = vmatprep.subr.msk.mxu0 %vm864_vm8, %v5556_v6  ;;  %v9664_v55 = vld [vmem:[#allocation19_spill] sm:$0xff] }
 0xbcb   :  { %6847 = vmatpush1.msk.msra.mxu0 %vm864_vm8, %v5555_v24  ;;  %6850 = vmatprep.subr.msk.mxu1 %vm864_vm8, %v9186_v16  ;;  %v5893_v59 = vsel %vm363_vm12, %v5884_v7, %v5886_v9  ;;  %v6849_v16 = vld [vmem:[%s9475_s15 + $0x4] sm:$0x1] }
 0xbcc   :  { %6845 = vmatmul.mubr.msk.f32.vlgmr.msra.gmra.mxu1 %vm860_vm15, %v6842_v22  ;;  %6853 = vmatprep.subr.msk.mxu0 %vm864_vm8, %v9194_v12  ;;  %v5888_v57 = vpop.permute.xlu1 %5887  ;;  %v5895_v12 = vmul.f32 %v7749_v54, %v5893_v59  ;;  %v6856_v54 = vld [vmem:[%s9475_s15 + $0x5] sm:$0x1] }
 0xbcd   :  { %6851 = vmatpush1.msk.msra.mxu1 %vm864_vm8, %v9184_v42  ;;  %v5892_v63 = vsel %vm363_vm12, %v5886_v9, %v5888_v57  ;;  %6848 = vmatmul.mubr.msk.f32.vlgmr.msra.gmra.mxu0 %vm860_vm15, %v6842_v22 }
 0xbce   :  { %v5896_v29 = vmul.f32 %v7754_v56, %v5892_v63  ;;  %6854 = vmatpush1.msk.msra.mxu0 %vm864_vm8, %v9190_v15  ;;  %v5890_v26 = vpop.permute.xlu0 %5889  ;;  %5801 = vmatprep.mubr.f32.mxu1 %v9620_v23 }
 0xbcf   :  { %v5891_v42 = vsel %vm363_vm12, %v5888_v57, %v5890_v26  ;;  %v5894_v31 = vsel %vm363_vm12, %v5890_v26, %v5884_v7  ;;  %5872 = vmatprep.mubr.f32.mxu0 %v9620_v23  ;;  %v9665_v7 = vld [vmem:[#allocation20_spill] sm:$0xff] }
 0xbd0   :  { %v5897_v39 = vmul.f32 %v7759_v50, %v5891_v42  ;;  %v5898_v56 = vmul.f32 %v7764_v51, %v5894_v31  ;;  %6857 = vmatprep.subr.msk.mxu1 %vm864_vm8, %v5896_v29  ;;  %v6063_v15 = vpop.permute.xlu1 %6062  ;;  %6852 = vmatmul.mubr.msk.f32.vlgmr.msra.gmra.mxu1 %vm860_vm15, %v6849_v16 }
 0xbd1   :  { %6855 = vmatmul.mubr.msk.f32.vlgmr.msra.gmra.mxu0 %vm860_vm15, %v6849_v16  ;;  %6858 = vmatpush1.msk.msra.mxu1 %vm864_vm8, %v5895_v12 }
 0xbd2   :  { %v6065_v10 = vpop.permute.xlu0 %6064  ;;  %6860 = vmatprep.subr.msk.mxu0 %vm864_vm8, %v5898_v56  ;;  %5980 = vmatprep.mubr.f32.mxu1 %v9620_v23 }
 0xbd3   :  { %6861 = vmatpush1.msk.msra.mxu0 %vm864_vm8, %v5897_v39  ;;  %6051 = vmatprep.mubr.f32.mxu0 %v9620_v23  ;;  %v6072_v50 = vsel %vm419_vm11, %v6063_v15, %v6065_v10 }
 0xbd4   :  { %v6067_v51 = vpop.permute.xlu1 %6066  ;;  %6859 = vmatmul.mubr.msk.f32.vlgmr.msra.gmra.mxu1 %vm860_vm15, %v6856_v54  ;;  %v6074_v33 = vmul.f32 %v9626_v52, %v6072_v50 }
 0xbd5   :  { %v6071_v25 = vsel %vm419_vm11, %v6065_v10, %v6067_v51  ;;  %6862 = vmatmul.mubr.msk.f32.vlgmr.msra.gmra.mxu0 %vm860_vm15, %v6856_v54  ;;  %6159 = vmatprep.mubr.f32.mxu1 %v9620_v23 }
 0xbd6   :  { %v6075_v20 = vmul.f32 %v7786_v0, %v6071_v25  ;;  %v6069_v41 = vpop.permute.xlu0 %6068  ;;  %6230 = vmatprep.mubr.f32.mxu0 %v9620_v23 }
 0xbd7   :  { %v6070_v49 = vsel %vm419_vm11, %v6067_v51, %v6069_v41  ;;  %v6073_v17 = vsel %vm419_vm11, %v6069_v41, %v6063_v15 }
 0xbd8   :  { %v6076_v21 = vmul.f32 %v7791_v1, %v6070_v49  ;;  %v6077_v61 = vmul.f32 %v9657_v2, %v6073_v17  ;;  %6864 = vmatprep.subr.msk.mxu1 %vm864_vm8, %v6075_v20  ;;  %v6242_v0 = vpop.permute.xlu1 %6241 }
 0xbd9   :  { %6865 = vmatpush1.msk.msra.mxu1 %vm864_vm8, %v6074_v33 }
 0xbda   :  { %v6244_v52 = vpop.permute.xlu0 %6243  ;;  %6866 = vmatmul.mubr.msk.f32.vlgmr.msra.gmra.mxu1 %vm860_vm15, %v6863_v30  ;;  %6867 = vmatprep.subr.msk.mxu0 %vm864_vm8, %v6077_v61 }
 0xbdb   :  { %6868 = vmatpush1.msk.msra.mxu0 %vm864_vm8, %v6076_v21  ;;  %6338 = vmatprep.mubr.f32.mxu1 %v9620_v23  ;;  %v6251_v4 = vsel %vm483_vm7, %v6242_v0, %v6244_v52 }
 0xbdc   :  { %6869 = vmatmul.mubr.msk.f32.vlgmr.msra.gmra.mxu0 %vm860_vm15, %v6863_v30  ;;  %v6246_v1 = vpop.permute.xlu1 %6245  ;;  %v6253_v45 = vmul.f32 %v9659_v11, %v6251_v4 }
 0xbdd   :  { %v6250_v47 = vsel %vm483_vm7, %v6244_v52, %v6246_v1  ;;  %6409 = vmatprep.mubr.f32.mxu0 %v9620_v23 }
 0xbde   :  { %v6254_v32 = vmul.f32 %v9658_v13, %v6250_v47  ;;  %v6248_v38 = vpop.permute.xlu0 %6247 }
 0xbdf   :  { %v6249_v8 = vsel %vm483_vm7, %v6246_v1, %v6248_v38  ;;  %v6252_v58 = vsel %vm483_vm7, %v6248_v38, %v6242_v0 }
 0xbe0   :  { %v6255_v5 = vmul.f32 %v9660_v36, %v6249_v8  ;;  %v6256_v18 = vmul.f32 %v9661_v40, %v6252_v58  ;;  %6871 = vmatprep.subr.msk.mxu1 %vm864_vm8, %v6254_v32  ;;  %v6421_v27 = vpop.permute.xlu1 %6420 }
 0xbe1   :  { %6872 = vmatpush1.msk.msra.mxu1 %vm864_vm8, %v6253_v45 }
 0xbe2   :  { %v6423_v46 = vpop.permute.xlu0 %6422  ;;  %6873 = vmatmul.mubr.msk.f32.vlgmr.msra.gmra.mxu1 %vm860_vm15, %v6870_v34  ;;  %6874 = vmatprep.subr.msk.mxu0 %vm864_vm8, %v6256_v18 }
 0xbe3   :  { %6875 = vmatpush1.msk.msra.mxu0 %vm864_vm8, %v6255_v5  ;;  %6517 = vmatprep.mubr.f32.mxu1 %v9620_v23  ;;  %v6430_v19 = vsel %vm539_vm4, %v6421_v27, %v6423_v46 }
 0xbe4   :  { %6876 = vmatmul.mubr.msk.f32.vlgmr.msra.gmra.mxu0 %vm860_vm15, %v6870_v34  ;;  %v6425_v14 = vpop.permute.xlu1 %6424  ;;  %v6432_v43 = vmul.f32 %v9663_v62, %v6430_v19 }
 0xbe5   :  { %v6429_v44 = vsel %vm539_vm4, %v6423_v46, %v6425_v14  ;;  %6588 = vmatprep.mubr.f32.mxu0 %v9620_v23 }
 0xbe6   :  { %v6433_v37 = vmul.f32 %v9662_v60, %v6429_v44  ;;  %v6427_v48 = vpop.permute.xlu0 %6426  ;;  %v7268_v44 = vmov 1966171168  }
 0xbe7   :  { %v6428_v53 = vsel %vm539_vm4, %v6425_v14, %v6427_v48  ;;  %v6431_v3 = vsel %vm539_vm4, %v6427_v48, %v6421_v27  ;;  %v6620_v60 = vunpack.c.l.s4 %v7268_v44 }
 0xbe8   :  { %v6434_v6 = vmul.f32 %v9664_v55, %v6428_v53  ;;  %v6435_v24 = vmul.f32 %v9665_v7, %v6431_v3  ;;  %6878 = vmatprep.subr.msk.mxu1 %vm864_vm8, %v6433_v37 }
 0xbe9   :  { %6879 = vmatpush1.msk.msra.mxu1 %vm864_vm8, %v6432_v43 }
 0xbea   :  { %6880 = vmatmul.mubr.msk.f32.vlgmr.msra.gmra.mxu1 %vm860_vm15, %v6877_v35  ;;  %6881 = vmatprep.subr.msk.mxu0 %vm864_vm8, %v6435_v24 }
 0xbeb   :  { %6882 = vmatpush1.msk.msra.mxu0 %vm864_vm8, %v6434_v6 }
 0xbec   :  { %6883 = vmatmul.mubr.msk.f32.vlgmr.msra.gmra.mxu0 %vm860_vm15, %v6877_v35 }
 0xbf1   :  { %v6603_v37 = vpop.permute.xlu1 %6602 }
 0xc73   :  { %v5129_v28 = vpop.f32.mrf.mxu1 }
 0xc74   :  { %v5200_v23 = vpop.f32.mrf.mxu0 }
 0xc75   :  { %v5131_v22 = vpop.f32.mrf.mxu1 }
 0xc76   :  { %v5202_v9 = vpop.f32.mrf.mxu0 }
 0xc7b   :  { %v5286_v59 = vpop.f32.mrf.mxu1 }
 0xc7c   :  { %v5357_v57 = vpop.f32.mrf.mxu0  ;;  %v5287_v51 = vadd.f32 %v5286_v59, %v5129_v28  ;;  %v9666_v28 = vld [vmem:[#allocation4_spill] sm:$0xff] }
 0xc7d   :  { %v5288_v63 = vpop.f32.mrf.mxu1  ;;  %v5358_v20 = vadd.f32 %v5357_v57, %v5200_v23  ;;  %v6608_v23 = vrot.slane %v6603_v37, %v9666_v28 }
 0xc7e   :  { %v5359_v16 = vpop.f32.mrf.mxu0  ;;  %v5289_v41 = vadd.f32 %v5288_v63, %v5131_v22  ;;  %v6621_v63 = vunpack.c.0.s8 %v6620_v60 }
 0xc7f   :  { %v5360_v30 = vadd.f32 %v5359_v16, %v5202_v9 }
 0xc83   :  { %v5461_v29 = vpop.f32.mrf.mxu1 }
 0xc84   :  { %v5532_v26 = vpop.f32.mrf.mxu0  ;;  %v5537_v49 = vadd.f32 %v5461_v29, %v5287_v51 }
 0xc85   :  { %v5463_v12 = vpop.f32.mrf.mxu1  ;;  %v5539_v21 = vadd.f32 %v5532_v26, %v5358_v20  ;;  %v9668_v20 = vlaneseq }
 0xc86   :  { %v5534_v42 = vpop.f32.mrf.mxu0  ;;  %v5538_v2 = vadd.f32 %v5463_v12, %v5289_v41 }
 0xc87   :  { %v5540_v1 = vadd.f32 %v5534_v42, %v5360_v30  ;;  %vm6644_vm6 = vcmp.lt.s32.totalorder %v9668_v20, 512 }
 0xc8c   :  { %v5640_v31 = vpop.f32.mrf.mxu1 }
 0xc8d   :  { %v5711_v39 = vpop.f32.mrf.mxu0  ;;  %v5716_v0 = vadd.f32 %v5640_v31, %v5537_v49 }
 0xc8e   :  { %v5642_v56 = vpop.f32.mrf.mxu1  ;;  %v5718_v47 = vadd.f32 %v5711_v39, %v5539_v21  ;;  %v9667_v39 = vld [vmem:[#allocation3_spill] sm:$0xff] }
 0xc8f   :  { %v5713_v15 = vpop.f32.mrf.mxu0  ;;  %v5717_v13 = vadd.f32 %v5642_v56, %v5538_v2  ;;  %v6624_v56 = vsub.s32 %v6621_v63, %v9667_v39 }
 0xc90   :  { %v5803_v54 = vpop.f32.mrf.mxu1  ;;  %v5719_v45 = vadd.f32 %v5713_v15, %v5540_v1 }
 0xc91   :  { %v5874_v10 = vpop.f32.mrf.mxu0  ;;  %v5879_v38 = vadd.f32 %v5803_v54, %v5716_v0 }
 0xc92   :  { %v5805_v50 = vpop.f32.mrf.mxu1  ;;  %v5881_v8 = vadd.f32 %v5874_v10, %v5718_v47 }
 0xc93   :  { %v5876_v25 = vpop.f32.mrf.mxu0  ;;  %v5880_v58 = vadd.f32 %v5805_v50, %v5717_v13 }
 0xc94   :  { %v5982_v33 = vpop.f32.mrf.mxu1  ;;  %v5882_v18 = vadd.f32 %v5876_v25, %v5719_v45 }
 0xc95   :  { %v6053_v17 = vpop.f32.mrf.mxu0  ;;  %v6058_v5 = vadd.f32 %v5982_v33, %v5879_v38 }
 0xc96   :  { %v5984_v61 = vpop.f32.mrf.mxu1  ;;  %v6060_v27 = vadd.f32 %v6053_v17, %v5881_v8 }
 0xc97   :  { %v6055_v52 = vpop.f32.mrf.mxu0  ;;  %v6059_v46 = vadd.f32 %v5984_v61, %v5880_v58 }
 0xc98   :  { %v6061_v48 = vadd.f32 %v6055_v52, %v5882_v18 }
 0xc9a   :  { %v6161_v4 = vpop.f32.mrf.mxu1 }
 0xc9b   :  { %v6237_v19 = vadd.f32 %v6161_v4, %v6058_v5 }
 0xc9c   :  { %v6232_v32 = vpop.f32.mrf.mxu0  ;;  %v6163_v11 = vpop.f32.mrf.mxu1 }
 0xc9d   :  { %v6238_v62 = vadd.f32 %v6163_v11, %v6059_v46  ;;  %v6239_v43 = vadd.f32 %v6232_v32, %v6060_v27 }
 0xc9e   :  { %v6234_v34 = vpop.f32.mrf.mxu0 }
 0xc9f   :  { %v6240_v55 = vadd.f32 %v6234_v34, %v6061_v48 }
 0xca2   :  { %v6340_v36 = vpop.f32.mrf.mxu1 }
 0xca3   :  { %v6416_v53 = vadd.f32 %v6340_v36, %v6237_v19 }
 0xca4   :  { %v6411_v40 = vpop.f32.mrf.mxu0  ;;  %v6342_v14 = vpop.f32.mrf.mxu1 }
 0xca5   :  { %v6417_v6 = vadd.f32 %v6342_v14, %v6238_v62  ;;  %v6418_v7 = vadd.f32 %v6411_v40, %v6239_v43 }
 0xca6   :  { %v6413_v3 = vpop.f32.mrf.mxu0 }
 0xca7   :  { %v6419_v59 = vadd.f32 %v6413_v3, %v6240_v55 }
 0xcaa   :  { %v6519_v35 = vpop.f32.mrf.mxu1 }
 0xcab   :  { %v6595_v24 = vadd.f32 %v6519_v35, %v6416_v53 }
 0xcac   :  { %v6521_v22 = vpop.f32.mrf.mxu1  ;;  %v6590_v9 = vpop.f32.mrf.mxu0 }
 0xcad   :  { %v6596_v57 = vadd.f32 %v6521_v22, %v6417_v6  ;;  %v6597_v16 = vadd.f32 %v6590_v9, %v6418_v7  ;;  %v6609_v26 = vadd.f32 %v6608_v23, %v6595_v24 }
 0xcae   :  { %v6592_v29 = vpop.f32.mrf.mxu0 }
 0xcaf   :  { %v6610_v12 = vadd.f32 %v6608_v23, %v6596_v57  ;;  %v6598_v42 = vadd.f32 %v6592_v29, %v6419_v59  ;;  %v6611_v15 = vadd.f32 %v6608_v23, %v6597_v16 }
 0xcb1   :  { %v6617_v31 = vcombine.low %v6609_v26, %v6610_v12  ;;  %v6612_v54 = vadd.f32 %v6608_v23, %v6598_v42 }
 0xcb3   :  { %v6618_v10 = vcombine.low %v6611_v15, %v6612_v54  ;;  %v6625_v50 = vrot.slane %v6617_v31, %v6624_v56 }
 0xcb5   :  { %v6632_v51 = vrot.slane %v6618_v10, %v6624_v56 }
 0xcb7   :  { %v6633_v25 = vcombine.low %v6625_v50, %v6632_v51 }
 0xcb9   :  { %v6640_v41 = vrot.slane %v6633_v25, %v6624_v56 }
 0xcbb   :  { %6646 = vst.msk [vmem:[%s9476_s17] sm:$0xf] %vm6644_vm6, %v6640_v41 }

</bundles_post_ra>
